<compile_context>
chip_gen: v5e
topology: v5e:2x2
jax: 0.10.0
libtpu: 0.0.40
codegen_flags: <defaults>
</compile_context>

<pallas_src>
import jax
import jax.numpy as jnp
from jax import lax
from jax.experimental import pallas as pl
from jax.experimental.pallas import tpu as pltpu


def _sigmoid(x):
    # exp and approx reciprocal both land on the EUP slot (short serial chain).
    return pl.reciprocal(1.0 + jnp.exp(-x), approx=True)


# --------------------------------------------------------------------------- #
# Kernel B: fused input-to-gates matmul + serial LSTM recurrence
# --------------------------------------------------------------------------- #
def lstm_block_kernel(x_ref, wih_ref, whh_ref, b_ref, h0_ref, c0_ref,
                      h_all_ref, hN_ref, cN_ref, gx_scr):
    """One grid step == TT LSTM time steps.

    x_ref:     (TT, B, E)   bf16  embedded tokens (time-major)
    wih_ref:   (E, 4H)      bf16  input->gates weights, gate cols [i,f,o,g]
    whh_ref:   (H, 4H)      bf16  hidden->gates weights, gate cols [i,f,o,g]
    b_ref:     (1, 4H)      f32   b_ih + b_hh, gate cols [i,f,o,g]
    h0_ref:    (1, B, H)    f32   initial hidden state
    c0_ref:    (1, B, H)    f32   initial cell state
    h_all_ref: (TT*B, H)    bf16  per-step hidden states (streamed slab)
    hN_ref:    (1, B, H)    f32   resident block; doubles as the h carry
    cN_ref:    (1, B, H)    f32   resident block; doubles as the c carry
    gx_scr:    (TT*B, 4H)   f32   scratch for x@W_ih + b
    """
    tb = pl.program_id(0)
    TT, B, E = x_ref.shape
    H = whh_ref.shape[0]

    @pl.when(tb == 0)
    def _():
        hN_ref[...] = h0_ref[...]
        cN_ref[...] = c0_ref[...]

    # Time-independent input matmul: one large, well-shaped MXU op per block.
    x2 = x_ref[...].reshape(TT * B, E)
    gx_scr[...] = jnp.dot(x2, wih_ref[...],
                          preferred_element_type=jnp.float32) + b_ref[...]

    h = hN_ref[0]          # f32 (B, H)
    c = cN_ref[0]          # f32 (B, H)
    for s in range(TT):    # static unroll, static slices
        gates = gx_scr[s * B:(s + 1) * B, :] + jnp.dot(
            h.astype(jnp.bfloat16), whh_ref[...],
            preferred_element_type=jnp.float32)          # (B, 4H) cols [i,f,o,g]
        sig = _sigmoid(gates[:, 0:3 * H])                # i, f, o in one shot
        g_g = jnp.tanh(gates[:, 3 * H:4 * H])
        i_g = sig[:, 0:H]
        f_g = sig[:, H:2 * H]
        o_g = sig[:, 2 * H:3 * H]
        c = f_g * c + i_g * g_g
        h = o_g * jnp.tanh(c)
        h_all_ref[s * B:(s + 1) * B, :] = h.astype(h_all_ref.dtype)

    hN_ref[0] = h
    cN_ref[0] = c


# --------------------------------------------------------------------------- #
# Kernel C: output projection as a tiled, fully parallel matmul
# --------------------------------------------------------------------------- #
def fc_kernel(h_ref, wfc_ref, bfc_ref, out_ref):
    """logits tile = h_tile @ W_fc_tile + b_fc_tile.

    h_ref:   (TM, H)  bf16   (batch-major rows)
    wfc_ref: (H, TV)  bf16
    bfc_ref: (1, TV)  f32
    out_ref: (TM, TV) f32
    """
    out_ref[...] = (jnp.dot(h_ref[...], wfc_ref[...],
                            preferred_element_type=jnp.float32)
                    + bfc_ref[...])


# --------------------------------------------------------------------------- #
# Wrapper / glue
# --------------------------------------------------------------------------- #
def _pick_tile(dim, cap, mults):
    """Largest divisor of `dim` <= cap that is a multiple of one of `mults`
    (tried in order). Falls back to the full dim (always a legal block)."""
    for m in mults:
        for d in range(min(cap, dim), 0, -1):
            if dim % d == 0 and d % m == 0:
                return d
    return dim


def _ifgo_to_ifog(w, H):
    """Reorder gate columns from PyTorch's [i,f,g,o] to [i,f,o,g]."""
    return jnp.concatenate(
        [w[..., 0:2 * H], w[..., 3 * H:4 * H], w[..., 2 * H:3 * H]], axis=-1)


def lstm_language_model_forward(x_ids, params, hidden=None):
    """Forward pass matching LSTMLanguageModel.forward(x, hidden=None).

    x_ids: (B, T) int32 token ids
    returns (logits (B, T, V), (h_n (1, B, H), c_n (1, B, H)))
    """
    emb = params["embedding"].astype(jnp.bfloat16)   # (V, E)
    w_ih = params["w_ih"].astype(jnp.bfloat16)       # (E, 4H) cols [i,f,g,o]
    w_hh = params["w_hh"].astype(jnp.bfloat16)       # (H, 4H) cols [i,f,g,o]
    b = params["b"].astype(jnp.float32)              # (1, 4H) cols [i,f,g,o]
    w_fc = params["w_fc"].astype(jnp.bfloat16)       # (H, V)
    b_fc = params["b_fc"].astype(jnp.float32)        # (1, V)

    B, T = x_ids.shape
    E = emb.shape[1]
    H = w_hh.shape[0]
    V = w_fc.shape[1]
    G = 4 * H

    # Gate-column permutation so i,f,o are contiguous and g last (tiny weight op).
    w_ih_r = _ifgo_to_ifog(w_ih, H)
    w_hh_r = _ifgo_to_ifog(w_hh, H)
    b_r = _ifgo_to_ifog(b, H)

    if hidden is None:
        h0 = jnp.zeros((1, B, H), jnp.float32)
        c0 = jnp.zeros((1, B, H), jnp.float32)
    else:
        h0 = hidden[0].astype(jnp.float32)
        c0 = hidden[1].astype(jnp.float32)

    # Glue: gather embeddings directly in time-major order (transpose the tiny
    # id matrix, not the (B,T,E) activation tensor).
    x_tbe = jnp.take(emb, x_ids.T, axis=0)           # (T, B, E) bf16

    TT = _pick_tile(T, 32, (1,))     # time steps per grid iteration
    n_tb = T // TT

    # ---- Kernel B: fused input matmul + serial recurrence (TT steps/iter) ----
    h_all_2d, h_n, c_n = pl.pallas_call(
        lstm_block_kernel,
        grid=(n_tb,),
        in_specs=[
            pl.BlockSpec((TT, B, E), lambda t: (t, 0, 0)),   # x slab (streamed)
            pl.BlockSpec((E, G), lambda t: (0, 0)),          # W_ih (invariant)
            pl.BlockSpec((H, G), lambda t: (0, 0)),          # W_hh (invariant)
            pl.BlockSpec((1, G), lambda t: (0, 0)),          # bias (invariant)
            pl.BlockSpec((1, B, H), lambda t: (0, 0, 0)),    # h0
            pl.BlockSpec((1, B, H), lambda t: (0, 0, 0)),    # c0
        ],
        out_specs=[
            pl.BlockSpec((TT * B, H), lambda t: (t, 0)),     # h_t slab (streamed)
            pl.BlockSpec((1, B, H), lambda t: (0, 0, 0)),    # h_n (resident carry)
            pl.BlockSpec((1, B, H), lambda t: (0, 0, 0)),    # c_n (resident carry)
        ],
        out_shape=(
            jax.ShapeDtypeStruct((T * B, H), jnp.bfloat16),
            jax.ShapeDtypeStruct((1, B, H), jnp.float32),
            jax.ShapeDtypeStruct((1, B, H), jnp.float32),
        ),
        scratch_shapes=[pltpu.VMEM((TT * B, G), jnp.float32)],
        compiler_params=pltpu.CompilerParams(
            dimension_semantics=("arbitrary",)),             # sequential in time
    )(x_tbe, w_ih_r, w_hh_r, b_r, h0, c0)

    # Glue: transpose the SMALL bf16 h tensor to batch-major (instead of the
    # V-wide logits), so Kernel C writes logits directly in (B, T, V) order.
    h_bt = h_all_2d.reshape(T, B, H).transpose(1, 0, 2).reshape(B * T, H)

    # ---- Kernel C: tiled output projection, weight-resident inner loop. ----
    M = B * T
    TM = _pick_tile(M, 256, (16, 8))           # bf16-friendly row tile
    V_pad = ((V + 127) // 128) * 128           # lane-dense vocab tiles
    if V_pad != V:
        w_fc = jnp.pad(w_fc, ((0, 0), (0, V_pad - V)))
        b_fc = jnp.pad(b_fc, ((0, 0), (0, V_pad - V)))
    TV = _pick_tile(V_pad, 1024, (128,))       # always a 128-multiple divisor

    logits_flat = pl.pallas_call(
        fc_kernel,
        # m innermost: W_fc / b_fc block index constant along the inner loop
        # -> the big (H, TV) weight tile is NOT re-read from HBM per row tile.
        grid=(V_pad // TV, M // TM),
        in_specs=[
            pl.BlockSpec((TM, H), lambda v, m: (m, 0)),
            pl.BlockSpec((H, TV), lambda v, m: (0, v)),
            pl.BlockSpec((1, TV), lambda v, m: (0, v)),
        ],
        out_specs=pl.BlockSpec((TM, TV), lambda v, m: (m, v)),
        out_shape=jax.ShapeDtypeStruct((M, V_pad), jnp.float32),
        compiler_params=pltpu.CompilerParams(
            dimension_semantics=("parallel", "parallel")),
    )(h_bt, w_fc, b_fc)

    logits = logits_flat[:, :V].reshape(B, T, V)   # batch-major already: no transpose
    return logits, (h_n, c_n)


# --------------------------------------------------------------------------- #
# Pure-JAX f32 reference (matches nn.LSTM semantics) for a correctness check
# --------------------------------------------------------------------------- #
def reference_forward(x_ids, params):
    emb, w_ih, w_hh = params["embedding"], params["w_ih"], params["w_hh"]
    b, w_fc, b_fc = params["b"], params["w_fc"], params["b_fc"]
    B, T = x_ids.shape
    H = w_hh.shape[0]
    embedded = jnp.take(emb, x_ids, axis=0)            # (B, T, E)
    x_tbe = jnp.transpose(embedded, (1, 0, 2))         # (T, B, E)

    def step(carry, x_t):
        h, c = carry
        g = x_t @ w_ih + h @ w_hh + b
        i_g = jax.nn.sigmoid(g[:, 0:H])
        f_g = jax.nn.sigmoid(g[:, H:2 * H])
        g_g = jnp.tanh(g[:, 2 * H:3 * H])
        o_g = jax.nn.sigmoid(g[:, 3 * H:4 * H])
        c = f_g * c + i_g * g_g
        h = o_g * jnp.tanh(c)
        return (h, c), h

    init = (jnp.zeros((B, H), jnp.float32), jnp.zeros((B, H), jnp.float32))
    (h_n, c_n), hs = lax.scan(step, init, x_tbe)       # hs: (T, B, H)
    logits = hs @ w_fc + b_fc                          # (T, B, V)
    return jnp.transpose(logits, (1, 0, 2)), (h_n[None], c_n[None])


def init_params(key, vocab_size, embedding_dim, hidden_dim):
    """Deterministic synthetic parameters matching the PyTorch module's shapes."""
    ks = jax.random.split(key, 7)
    E, H, V = embedding_dim, hidden_dim, vocab_size
    scale = 0.02
    w_ih_pt = scale * jax.random.normal(ks[1], (4 * H, E), jnp.float32)
    w_hh_pt = scale * jax.random.normal(ks[2], (4 * H, H), jnp.float32)
    b_ih = scale * jax.random.normal(ks[3], (4 * H,), jnp.float32)
    b_hh = scale * jax.random.normal(ks[4], (4 * H,), jnp.float32)
    w_fc_pt = scale * jax.random.normal(ks[5], (V, H), jnp.float32)
    b_fc = scale * jax.random.normal(ks[6], (V,), jnp.float32)
    return {
        "embedding": scale * jax.random.normal(ks[0], (V, E), jnp.float32),
        "w_ih": w_ih_pt.T,                       # (E, 4H), cols [i,f,g,o]
        "w_hh": w_hh_pt.T,                       # (H, 4H), cols [i,f,g,o]
        "b": (b_ih + b_hh).reshape(1, 4 * H),    # (1, 4H)
        "w_fc": w_fc_pt.T,                       # (H, V)
        "b_fc": b_fc.reshape(1, V),              # (1, V)
    }


if __name__ == "__main__":
    # Small but TPU-friendly sizes (lane-aligned feature dims, B multiple of 8).
    VOCAB = 256
    EMB = 128
    HIDDEN = 128
    BATCH = 8
    SEQ = 8

    key = jax.random.PRNGKey(0)
    pkey, xkey = jax.random.split(key)
    params = init_params(pkey, VOCAB, EMB, HIDDEN)
    x_ids = jax.random.randint(xkey, (BATCH, SEQ), 0, VOCAB, dtype=jnp.int32)

    fwd = jax.jit(lstm_language_model_forward)
    logits, (h_n, c_n) = fwd(x_ids, params)
    jax.block_until_ready((logits, h_n, c_n))

    assert logits.shape == (BATCH, SEQ, VOCAB)
    assert h_n.shape == (1, BATCH, HIDDEN)
    assert c_n.shape == (1, BATCH, HIDDEN)

    # Numerical check vs pure-f32 reference (kernel uses bf16 weights + approx
    # reciprocal sigmoid -> loose tolerance).
    ref_logits, (ref_h, ref_c) = reference_forward(x_ids, params)
    assert jnp.allclose(logits, ref_logits, atol=1e-2, rtol=1e-1)
    assert jnp.allclose(h_n, ref_h, atol=1e-2, rtol=1e-1)
    assert jnp.allclose(c_n, ref_c, atol=1e-2, rtol=1e-1)

    print("KERNEL_OK")
</pallas_src>

<mosaic_0001>
module attributes {stable_mosaic.version = 11 : i64} {
  func.func @lstm_block_kernel(%arg0: i32, %arg1: memref<8x8x128xbf16, #tpu.memory_space<vmem>>, %arg2: memref<128x512xbf16, #tpu.memory_space<vmem>>, %arg3: memref<128x512xbf16, #tpu.memory_space<vmem>>, %arg4: memref<1x512xf32, #tpu.memory_space<vmem>>, %arg5: memref<1x8x128xf32, #tpu.memory_space<vmem>>, %arg6: memref<1x8x128xf32, #tpu.memory_space<vmem>>, %arg7: memref<64x128xbf16, #tpu.memory_space<vmem>>, %arg8: memref<1x8x128xf32, #tpu.memory_space<vmem>>, %arg9: memref<1x8x128xf32, #tpu.memory_space<vmem>>, %arg10: memref<64x512xf32, #tpu.memory_space<vmem>>) attributes {dimension_semantics = [#tpu.dimension_semantics<arbitrary>], iteration_bounds = array<i64: 1>, scalar_prefetch = 0 : i64, scratch_operands = 1 : i64, tpu.core_type = #tpu.core_type<tc>, window_params = [{transform_indices = @transform_0, window_bounds = array<i64: 8, 8, 128>}, {pipeline_mode = #tpu.pipeline_mode<synchronous>, transform_indices = @transform_1, window_bounds = array<i64: 128, 512>}, {pipeline_mode = #tpu.pipeline_mode<synchronous>, transform_indices = @transform_2, window_bounds = array<i64: 128, 512>}, {pipeline_mode = #tpu.pipeline_mode<synchronous>, transform_indices = @transform_3, window_bounds = array<i64: 1, 512>}, {pipeline_mode = #tpu.pipeline_mode<synchronous>, transform_indices = @transform_4, window_bounds = array<i64: 1, 8, 128>}, {pipeline_mode = #tpu.pipeline_mode<synchronous>, transform_indices = @transform_5, window_bounds = array<i64: 1, 8, 128>}, {transform_indices = @transform_6, window_bounds = array<i64: 64, 128>}, {pipeline_mode = #tpu.pipeline_mode<synchronous>, transform_indices = @transform_7, window_bounds = array<i64: 1, 8, 128>}, {pipeline_mode = #tpu.pipeline_mode<synchronous>, transform_indices = @transform_8, window_bounds = array<i64: 1, 8, 128>}]} {
    %c0_i32 = arith.constant 0 : i32
    %0 = arith.cmpi eq, %arg0, %c0_i32 : i32
    %1 = arith.extui %0 : i1 to i32
    %c0_i32_0 = arith.constant 0 : i32
    %2 = arith.cmpi ne, %1, %c0_i32_0 : i32
    scf.if %2 {
      %c0_86 = arith.constant 0 : index
      %c0_87 = arith.constant 0 : index
      %c0_88 = arith.constant 0 : index
      %213 = vector.load %arg5[%c0_86, %c0_87, %c0_88] : memref<1x8x128xf32, #tpu.memory_space<vmem>>, vector<1x8x128xf32>
      %c0_89 = arith.constant 0 : index
      %c0_90 = arith.constant 0 : index
      %c0_91 = arith.constant 0 : index
      %214 = vector.load %arg8[%c0_89, %c0_90, %c0_91] : memref<1x8x128xf32, #tpu.memory_space<vmem>>, vector<1x8x128xf32>
      tpu.vector_store %arg8[%c0_89, %c0_90, %c0_91], %213 {strides = array<i32>} : memref<1x8x128xf32, #tpu.memory_space<vmem>>, vector<1x8x128xf32>,
      %c0_92 = arith.constant 0 : index
      %c0_93 = arith.constant 0 : index
      %c0_94 = arith.constant 0 : index
      %215 = vector.load %arg6[%c0_92, %c0_93, %c0_94] : memref<1x8x128xf32, #tpu.memory_space<vmem>>, vector<1x8x128xf32>
      %c0_95 = arith.constant 0 : index
      %c0_96 = arith.constant 0 : index
      %c0_97 = arith.constant 0 : index
      %216 = vector.load %arg9[%c0_95, %c0_96, %c0_97] : memref<1x8x128xf32, #tpu.memory_space<vmem>>, vector<1x8x128xf32>
      tpu.vector_store %arg9[%c0_95, %c0_96, %c0_97], %215 {strides = array<i32>} : memref<1x8x128xf32, #tpu.memory_space<vmem>>, vector<1x8x128xf32>,
    } else {
    }
    %c0 = arith.constant 0 : index
    %c0_1 = arith.constant 0 : index
    %c0_2 = arith.constant 0 : index
    %3 = vector.load %arg1[%c0, %c0_1, %c0_2] : memref<8x8x128xbf16, #tpu.memory_space<vmem>>, vector<8x8x128xbf16>
    %4 = vector.shape_cast %3 : vector<8x8x128xbf16> to vector<64x128xbf16>
    %c0_3 = arith.constant 0 : index
    %c0_4 = arith.constant 0 : index
    %5 = vector.load %arg2[%c0_3, %c0_4] : memref<128x512xbf16, #tpu.memory_space<vmem>>, vector<128x512xbf16>
    %cst = arith.constant dense<0.000000e+00> : vector<64x512xf32>
    %6 = tpu.matmul %4, %5, %cst {dimension_numbers = #tpu.dot_dimension_numbers<[1], [0], [0], [1], [0, 0, 1, 1], [], []>} : vector<64x128xbf16>, vector<128x512xbf16>, vector<64x512xf32> -> vector<64x512xf32>
    %c0_5 = arith.constant 0 : index
    %c0_6 = arith.constant 0 : index
    %7 = vector.load %arg4[%c0_5, %c0_6] : memref<1x512xf32, #tpu.memory_space<vmem>>, vector<1x512xf32>
    %8 = vector.broadcast %7 : vector<1x512xf32> to vector<64x512xf32>
    %9 = arith.addf %6, %8 : vector<64x512xf32>
    %c0_7 = arith.constant 0 : index
    %c0_8 = arith.constant 0 : index
    %10 = vector.load %arg10[%c0_7, %c0_8] : memref<64x512xf32, #tpu.memory_space<vmem>>, vector<64x512xf32>
    tpu.vector_store %arg10[%c0_7, %c0_8], %9 {strides = array<i32>} : memref<64x512xf32, #tpu.memory_space<vmem>>, vector<64x512xf32>,
    %c0_9 = arith.constant 0 : index
    %c0_10 = arith.constant 0 : index
    %c0_11 = arith.constant 0 : index
    %11 = vector.load %arg8[%c0_9, %c0_10, %c0_11] : memref<1x8x128xf32, #tpu.memory_space<vmem>>, vector<1x8x128xf32>
    %12 = vector.shape_cast %11 : vector<1x8x128xf32> to vector<8x128xf32>
    %c0_12 = arith.constant 0 : index
    %c0_13 = arith.constant 0 : index
    %c0_14 = arith.constant 0 : index
    %13 = vector.load %arg9[%c0_12, %c0_13, %c0_14] : memref<1x8x128xf32, #tpu.memory_space<vmem>>, vector<1x8x128xf32>
    %14 = vector.shape_cast %13 : vector<1x8x128xf32> to vector<8x128xf32>
    %c0_15 = arith.constant 0 : index
    %c0_16 = arith.constant 0 : index
    %15 = vector.load %arg10[%c0_15, %c0_16] : memref<64x512xf32, #tpu.memory_space<vmem>>, vector<8x512xf32>
    %16 = arith.truncf %12 : vector<8x128xf32> to vector<8x128xbf16>
    %c0_17 = arith.constant 0 : index
    %c0_18 = arith.constant 0 : index
    %17 = vector.load %arg3[%c0_17, %c0_18] : memref<128x512xbf16, #tpu.memory_space<vmem>>, vector<128x512xbf16>
    %cst_19 = arith.constant dense<0.000000e+00> : vector<8x512xf32>
    %18 = tpu.matmul %16, %17, %cst_19 {dimension_numbers = #tpu.dot_dimension_numbers<[1], [0], [0], [1], [0, 0, 1, 1], [], []>} : vector<8x128xbf16>, vector<128x512xbf16>, vector<8x512xf32> -> vector<8x512xf32>
    %19 = arith.addf %15, %18 : vector<8x512xf32>
    %20 = vector.extract_strided_slice %19 {offsets = [0, 0], sizes = [8, 384], strides = [1, 1]} : vector<8x512xf32> to vector<8x384xf32>
    %cst_20 = arith.constant 0.000000e+00 : f32
    %21 = vector.broadcast %cst_20 : f32 to vector<8x384xf32>
    %22 = arith.subf %21, %20 : vector<8x384xf32>
    %23 = math.exp %22 : vector<8x384xf32>
    %cst_21 = arith.constant 1.000000e+00 : f32
    %24 = vector.broadcast %cst_21 : f32 to vector<8x384xf32>
    %25 = arith.addf %24, %23 : vector<8x384xf32>
    %26 = tpu.reciprocal %25 {approx = true} : vector<8x384xf32> -> vector<8x384xf32>
    %27 = vector.extract_strided_slice %19 {offsets = [0, 384], sizes = [8, 128], strides = [1, 1]} : vector<8x512xf32> to vector<8x128xf32>
    %28 = math.tanh %27 : vector<8x128xf32>
    %29 = vector.extract_strided_slice %26 {offsets = [0, 0], sizes = [8, 128], strides = [1, 1]} : vector<8x384xf32> to vector<8x128xf32>
    %30 = vector.extract_strided_slice %26 {offsets = [0, 128], sizes = [8, 128], strides = [1, 1]} : vector<8x384xf32> to vector<8x128xf32>
    %31 = vector.extract_strided_slice %26 {offsets = [0, 256], sizes = [8, 128], strides = [1, 1]} : vector<8x384xf32> to vector<8x128xf32>
    %32 = arith.mulf %30, %14 : vector<8x128xf32>
    %33 = arith.mulf %29, %28 : vector<8x128xf32>
    %34 = arith.addf %32, %33 : vector<8x128xf32>
    %35 = math.tanh %34 : vector<8x128xf32>
    %36 = arith.mulf %31, %35 : vector<8x128xf32>
    %37 = arith.truncf %36 : vector<8x128xf32> to vector<8x128xbf16>
    %c0_22 = arith.constant 0 : index
    %c0_23 = arith.constant 0 : index
    %38 = vector.load %arg7[%c0_22, %c0_23] : memref<64x128xbf16, #tpu.memory_space<vmem>>, vector<8x128xbf16>
    tpu.vector_store %arg7[%c0_22, %c0_23], %37 {strides = array<i32>} : memref<64x128xbf16, #tpu.memory_space<vmem>>, vector<8x128xbf16>,
    %c8 = arith.constant 8 : index
    %c0_24 = arith.constant 0 : index
    %39 = vector.load %arg10[%c8, %c0_24] : memref<64x512xf32, #tpu.memory_space<vmem>>, vector<8x512xf32>
    %40 = arith.truncf %36 : vector<8x128xf32> to vector<8x128xbf16>
    %c0_25 = arith.constant 0 : index
    %c0_26 = arith.constant 0 : index
    %41 = vector.load %arg3[%c0_25, %c0_26] : memref<128x512xbf16, #tpu.memory_space<vmem>>, vector<128x512xbf16>
    %cst_27 = arith.constant dense<0.000000e+00> : vector<8x512xf32>
    %42 = tpu.matmul %40, %41, %cst_27 {dimension_numbers = #tpu.dot_dimension_numbers<[1], [0], [0], [1], [0, 0, 1, 1], [], []>} : vector<8x128xbf16>, vector<128x512xbf16>, vector<8x512xf32> -> vector<8x512xf32>
    %43 = arith.addf %39, %42 : vector<8x512xf32>
    %44 = vector.extract_strided_slice %43 {offsets = [0, 0], sizes = [8, 384], strides = [1, 1]} : vector<8x512xf32> to vector<8x384xf32>
    %cst_28 = arith.constant 0.000000e+00 : f32
    %45 = vector.broadcast %cst_28 : f32 to vector<8x384xf32>
    %46 = arith.subf %45, %44 : vector<8x384xf32>
    %47 = math.exp %46 : vector<8x384xf32>
    %cst_29 = arith.constant 1.000000e+00 : f32
    %48 = vector.broadcast %cst_29 : f32 to vector<8x384xf32>
    %49 = arith.addf %48, %47 : vector<8x384xf32>
    %50 = tpu.reciprocal %49 {approx = true} : vector<8x384xf32> -> vector<8x384xf32>
    %51 = vector.extract_strided_slice %43 {offsets = [0, 384], sizes = [8, 128], strides = [1, 1]} : vector<8x512xf32> to vector<8x128xf32>
    %52 = math.tanh %51 : vector<8x128xf32>
    %53 = vector.extract_strided_slice %50 {offsets = [0, 0], sizes = [8, 128], strides = [1, 1]} : vector<8x384xf32> to vector<8x128xf32>
    %54 = vector.extract_strided_slice %50 {offsets = [0, 128], sizes = [8, 128], strides = [1, 1]} : vector<8x384xf32> to vector<8x128xf32>
    %55 = vector.extract_strided_slice %50 {offsets = [0, 256], sizes = [8, 128], strides = [1, 1]} : vector<8x384xf32> to vector<8x128xf32>
    %56 = arith.mulf %54, %34 : vector<8x128xf32>
    %57 = arith.mulf %53, %52 : vector<8x128xf32>
    %58 = arith.addf %56, %57 : vector<8x128xf32>
    %59 = math.tanh %58 : vector<8x128xf32>
    %60 = arith.mulf %55, %59 : vector<8x128xf32>
    %61 = arith.truncf %60 : vector<8x128xf32> to vector<8x128xbf16>
    %c8_30 = arith.constant 8 : index
    %c0_31 = arith.constant 0 : index
    %62 = vector.load %arg7[%c8_30, %c0_31] : memref<64x128xbf16, #tpu.memory_space<vmem>>, vector<8x128xbf16>
    tpu.vector_store %arg7[%c8_30, %c0_31], %61 {strides = array<i32>} : memref<64x128xbf16, #tpu.memory_space<vmem>>, vector<8x128xbf16>,
    %c16 = arith.constant 16 : index
    %c0_32 = arith.constant 0 : index
    %63 = vector.load %arg10[%c16, %c0_32] : memref<64x512xf32, #tpu.memory_space<vmem>>, vector<8x512xf32>
    %64 = arith.truncf %60 : vector<8x128xf32> to vector<8x128xbf16>
    %c0_33 = arith.constant 0 : index
    %c0_34 = arith.constant 0 : index
    %65 = vector.load %arg3[%c0_33, %c0_34] : memref<128x512xbf16, #tpu.memory_space<vmem>>, vector<128x512xbf16>
    %cst_35 = arith.constant dense<0.000000e+00> : vector<8x512xf32>
    %66 = tpu.matmul %64, %65, %cst_35 {dimension_numbers = #tpu.dot_dimension_numbers<[1], [0], [0], [1], [0, 0, 1, 1], [], []>} : vector<8x128xbf16>, vector<128x512xbf16>, vector<8x512xf32> -> vector<8x512xf32>
    %67 = arith.addf %63, %66 : vector<8x512xf32>
    %68 = vector.extract_strided_slice %67 {offsets = [0, 0], sizes = [8, 384], strides = [1, 1]} : vector<8x512xf32> to vector<8x384xf32>
    %cst_36 = arith.constant 0.000000e+00 : f32
    %69 = vector.broadcast %cst_36 : f32 to vector<8x384xf32>
    %70 = arith.subf %69, %68 : vector<8x384xf32>
    %71 = math.exp %70 : vector<8x384xf32>
    %cst_37 = arith.constant 1.000000e+00 : f32
    %72 = vector.broadcast %cst_37 : f32 to vector<8x384xf32>
    %73 = arith.addf %72, %71 : vector<8x384xf32>
    %74 = tpu.reciprocal %73 {approx = true} : vector<8x384xf32> -> vector<8x384xf32>
    %75 = vector.extract_strided_slice %67 {offsets = [0, 384], sizes = [8, 128], strides = [1, 1]} : vector<8x512xf32> to vector<8x128xf32>
    %76 = math.tanh %75 : vector<8x128xf32>
    %77 = vector.extract_strided_slice %74 {offsets = [0, 0], sizes = [8, 128], strides = [1, 1]} : vector<8x384xf32> to vector<8x128xf32>
    %78 = vector.extract_strided_slice %74 {offsets = [0, 128], sizes = [8, 128], strides = [1, 1]} : vector<8x384xf32> to vector<8x128xf32>
    %79 = vector.extract_strided_slice %74 {offsets = [0, 256], sizes = [8, 128], strides = [1, 1]} : vector<8x384xf32> to vector<8x128xf32>
    %80 = arith.mulf %78, %58 : vector<8x128xf32>
    %81 = arith.mulf %77, %76 : vector<8x128xf32>
    %82 = arith.addf %80, %81 : vector<8x128xf32>
    %83 = math.tanh %82 : vector<8x128xf32>
    %84 = arith.mulf %79, %83 : vector<8x128xf32>
    %85 = arith.truncf %84 : vector<8x128xf32> to vector<8x128xbf16>
    %c16_38 = arith.constant 16 : index
    %c0_39 = arith.constant 0 : index
    %86 = vector.load %arg7[%c16_38, %c0_39] : memref<64x128xbf16, #tpu.memory_space<vmem>>, vector<8x128xbf16>
    tpu.vector_store %arg7[%c16_38, %c0_39], %85 {strides = array<i32>} : memref<64x128xbf16, #tpu.memory_space<vmem>>, vector<8x128xbf16>,
    %c24 = arith.constant 24 : index
    %c0_40 = arith.constant 0 : index
    %87 = vector.load %arg10[%c24, %c0_40] : memref<64x512xf32, #tpu.memory_space<vmem>>, vector<8x512xf32>
    %88 = arith.truncf %84 : vector<8x128xf32> to vector<8x128xbf16>
    %c0_41 = arith.constant 0 : index
    %c0_42 = arith.constant 0 : index
    %89 = vector.load %arg3[%c0_41, %c0_42] : memref<128x512xbf16, #tpu.memory_space<vmem>>, vector<128x512xbf16>
    %cst_43 = arith.constant dense<0.000000e+00> : vector<8x512xf32>
    %90 = tpu.matmul %88, %89, %cst_43 {dimension_numbers = #tpu.dot_dimension_numbers<[1], [0], [0], [1], [0, 0, 1, 1], [], []>} : vector<8x128xbf16>, vector<128x512xbf16>, vector<8x512xf32> -> vector<8x512xf32>
    %91 = arith.addf %87, %90 : vector<8x512xf32>
    %92 = vector.extract_strided_slice %91 {offsets = [0, 0], sizes = [8, 384], strides = [1, 1]} : vector<8x512xf32> to vector<8x384xf32>
    %cst_44 = arith.constant 0.000000e+00 : f32
    %93 = vector.broadcast %cst_44 : f32 to vector<8x384xf32>
    %94 = arith.subf %93, %92 : vector<8x384xf32>
    %95 = math.exp %94 : vector<8x384xf32>
    %cst_45 = arith.constant 1.000000e+00 : f32
    %96 = vector.broadcast %cst_45 : f32 to vector<8x384xf32>
    %97 = arith.addf %96, %95 : vector<8x384xf32>
    %98 = tpu.reciprocal %97 {approx = true} : vector<8x384xf32> -> vector<8x384xf32>
    %99 = vector.extract_strided_slice %91 {offsets = [0, 384], sizes = [8, 128], strides = [1, 1]} : vector<8x512xf32> to vector<8x128xf32>
    %100 = math.tanh %99 : vector<8x128xf32>
    %101 = vector.extract_strided_slice %98 {offsets = [0, 0], sizes = [8, 128], strides = [1, 1]} : vector<8x384xf32> to vector<8x128xf32>
    %102 = vector.extract_strided_slice %98 {offsets = [0, 128], sizes = [8, 128], strides = [1, 1]} : vector<8x384xf32> to vector<8x128xf32>
    %103 = vector.extract_strided_slice %98 {offsets = [0, 256], sizes = [8, 128], strides = [1, 1]} : vector<8x384xf32> to vector<8x128xf32>
    %104 = arith.mulf %102, %82 : vector<8x128xf32>
    %105 = arith.mulf %101, %100 : vector<8x128xf32>
    %106 = arith.addf %104, %105 : vector<8x128xf32>
    %107 = math.tanh %106 : vector<8x128xf32>
    %108 = arith.mulf %103, %107 : vector<8x128xf32>
    %109 = arith.truncf %108 : vector<8x128xf32> to vector<8x128xbf16>
    %c24_46 = arith.constant 24 : index
    %c0_47 = arith.constant 0 : index
    %110 = vector.load %arg7[%c24_46, %c0_47] : memref<64x128xbf16, #tpu.memory_space<vmem>>, vector<8x128xbf16>
    tpu.vector_store %arg7[%c24_46, %c0_47], %109 {strides = array<i32>} : memref<64x128xbf16, #tpu.memory_space<vmem>>, vector<8x128xbf16>,
    %c32 = arith.constant 32 : index
    %c0_48 = arith.constant 0 : index
    %111 = vector.load %arg10[%c32, %c0_48] : memref<64x512xf32, #tpu.memory_space<vmem>>, vector<8x512xf32>
    %112 = arith.truncf %108 : vector<8x128xf32> to vector<8x128xbf16>
    %c0_49 = arith.constant 0 : index
    %c0_50 = arith.constant 0 : index
    %113 = vector.load %arg3[%c0_49, %c0_50] : memref<128x512xbf16, #tpu.memory_space<vmem>>, vector<128x512xbf16>
    %cst_51 = arith.constant dense<0.000000e+00> : vector<8x512xf32>
    %114 = tpu.matmul %112, %113, %cst_51 {dimension_numbers = #tpu.dot_dimension_numbers<[1], [0], [0], [1], [0, 0, 1, 1], [], []>} : vector<8x128xbf16>, vector<128x512xbf16>, vector<8x512xf32> -> vector<8x512xf32>
    %115 = arith.addf %111, %114 : vector<8x512xf32>
    %116 = vector.extract_strided_slice %115 {offsets = [0, 0], sizes = [8, 384], strides = [1, 1]} : vector<8x512xf32> to vector<8x384xf32>
    %cst_52 = arith.constant 0.000000e+00 : f32
    %117 = vector.broadcast %cst_52 : f32 to vector<8x384xf32>
    %118 = arith.subf %117, %116 : vector<8x384xf32>
    %119 = math.exp %118 : vector<8x384xf32>
    %cst_53 = arith.constant 1.000000e+00 : f32
    %120 = vector.broadcast %cst_53 : f32 to vector<8x384xf32>
    %121 = arith.addf %120, %119 : vector<8x384xf32>
    %122 = tpu.reciprocal %121 {approx = true} : vector<8x384xf32> -> vector<8x384xf32>
    %123 = vector.extract_strided_slice %115 {offsets = [0, 384], sizes = [8, 128], strides = [1, 1]} : vector<8x512xf32> to vector<8x128xf32>
    %124 = math.tanh %123 : vector<8x128xf32>
    %125 = vector.extract_strided_slice %122 {offsets = [0, 0], sizes = [8, 128], strides = [1, 1]} : vector<8x384xf32> to vector<8x128xf32>
    %126 = vector.extract_strided_slice %122 {offsets = [0, 128], sizes = [8, 128], strides = [1, 1]} : vector<8x384xf32> to vector<8x128xf32>
    %127 = vector.extract_strided_slice %122 {offsets = [0, 256], sizes = [8, 128], strides = [1, 1]} : vector<8x384xf32> to vector<8x128xf32>
    %128 = arith.mulf %126, %106 : vector<8x128xf32>
    %129 = arith.mulf %125, %124 : vector<8x128xf32>
    %130 = arith.addf %128, %129 : vector<8x128xf32>
    %131 = math.tanh %130 : vector<8x128xf32>
    %132 = arith.mulf %127, %131 : vector<8x128xf32>
    %133 = arith.truncf %132 : vector<8x128xf32> to vector<8x128xbf16>
    %c32_54 = arith.constant 32 : index
    %c0_55 = arith.constant 0 : index
    %134 = vector.load %arg7[%c32_54, %c0_55] : memref<64x128xbf16, #tpu.memory_space<vmem>>, vector<8x128xbf16>
    tpu.vector_store %arg7[%c32_54, %c0_55], %133 {strides = array<i32>} : memref<64x128xbf16, #tpu.memory_space<vmem>>, vector<8x128xbf16>,
    %c40 = arith.constant 40 : index
    %c0_56 = arith.constant 0 : index
    %135 = vector.load %arg10[%c40, %c0_56] : memref<64x512xf32, #tpu.memory_space<vmem>>, vector<8x512xf32>
    %136 = arith.truncf %132 : vector<8x128xf32> to vector<8x128xbf16>
    %c0_57 = arith.constant 0 : index
    %c0_58 = arith.constant 0 : index
    %137 = vector.load %arg3[%c0_57, %c0_58] : memref<128x512xbf16, #tpu.memory_space<vmem>>, vector<128x512xbf16>
    %cst_59 = arith.constant dense<0.000000e+00> : vector<8x512xf32>
    %138 = tpu.matmul %136, %137, %cst_59 {dimension_numbers = #tpu.dot_dimension_numbers<[1], [0], [0], [1], [0, 0, 1, 1], [], []>} : vector<8x128xbf16>, vector<128x512xbf16>, vector<8x512xf32> -> vector<8x512xf32>
    %139 = arith.addf %135, %138 : vector<8x512xf32>
    %140 = vector.extract_strided_slice %139 {offsets = [0, 0], sizes = [8, 384], strides = [1, 1]} : vector<8x512xf32> to vector<8x384xf32>
    %cst_60 = arith.constant 0.000000e+00 : f32
    %141 = vector.broadcast %cst_60 : f32 to vector<8x384xf32>
    %142 = arith.subf %141, %140 : vector<8x384xf32>
    %143 = math.exp %142 : vector<8x384xf32>
    %cst_61 = arith.constant 1.000000e+00 : f32
    %144 = vector.broadcast %cst_61 : f32 to vector<8x384xf32>
    %145 = arith.addf %144, %143 : vector<8x384xf32>
    %146 = tpu.reciprocal %145 {approx = true} : vector<8x384xf32> -> vector<8x384xf32>
    %147 = vector.extract_strided_slice %139 {offsets = [0, 384], sizes = [8, 128], strides = [1, 1]} : vector<8x512xf32> to vector<8x128xf32>
    %148 = math.tanh %147 : vector<8x128xf32>
    %149 = vector.extract_strided_slice %146 {offsets = [0, 0], sizes = [8, 128], strides = [1, 1]} : vector<8x384xf32> to vector<8x128xf32>
    %150 = vector.extract_strided_slice %146 {offsets = [0, 128], sizes = [8, 128], strides = [1, 1]} : vector<8x384xf32> to vector<8x128xf32>
    %151 = vector.extract_strided_slice %146 {offsets = [0, 256], sizes = [8, 128], strides = [1, 1]} : vector<8x384xf32> to vector<8x128xf32>
    %152 = arith.mulf %150, %130 : vector<8x128xf32>
    %153 = arith.mulf %149, %148 : vector<8x128xf32>
    %154 = arith.addf %152, %153 : vector<8x128xf32>
    %155 = math.tanh %154 : vector<8x128xf32>
    %156 = arith.mulf %151, %155 : vector<8x128xf32>
    %157 = arith.truncf %156 : vector<8x128xf32> to vector<8x128xbf16>
    %c40_62 = arith.constant 40 : index
    %c0_63 = arith.constant 0 : index
    %158 = vector.load %arg7[%c40_62, %c0_63] : memref<64x128xbf16, #tpu.memory_space<vmem>>, vector<8x128xbf16>
    tpu.vector_store %arg7[%c40_62, %c0_63], %157 {strides = array<i32>} : memref<64x128xbf16, #tpu.memory_space<vmem>>, vector<8x128xbf16>,
    %c48 = arith.constant 48 : index
    %c0_64 = arith.constant 0 : index
    %159 = vector.load %arg10[%c48, %c0_64] : memref<64x512xf32, #tpu.memory_space<vmem>>, vector<8x512xf32>
    %160 = arith.truncf %156 : vector<8x128xf32> to vector<8x128xbf16>
    %c0_65 = arith.constant 0 : index
    %c0_66 = arith.constant 0 : index
    %161 = vector.load %arg3[%c0_65, %c0_66] : memref<128x512xbf16, #tpu.memory_space<vmem>>, vector<128x512xbf16>
    %cst_67 = arith.constant dense<0.000000e+00> : vector<8x512xf32>
    %162 = tpu.matmul %160, %161, %cst_67 {dimension_numbers = #tpu.dot_dimension_numbers<[1], [0], [0], [1], [0, 0, 1, 1], [], []>} : vector<8x128xbf16>, vector<128x512xbf16>, vector<8x512xf32> -> vector<8x512xf32>
    %163 = arith.addf %159, %162 : vector<8x512xf32>
    %164 = vector.extract_strided_slice %163 {offsets = [0, 0], sizes = [8, 384], strides = [1, 1]} : vector<8x512xf32> to vector<8x384xf32>
    %cst_68 = arith.constant 0.000000e+00 : f32
    %165 = vector.broadcast %cst_68 : f32 to vector<8x384xf32>
    %166 = arith.subf %165, %164 : vector<8x384xf32>
    %167 = math.exp %166 : vector<8x384xf32>
    %cst_69 = arith.constant 1.000000e+00 : f32
    %168 = vector.broadcast %cst_69 : f32 to vector<8x384xf32>
    %169 = arith.addf %168, %167 : vector<8x384xf32>
    %170 = tpu.reciprocal %169 {approx = true} : vector<8x384xf32> -> vector<8x384xf32>
    %171 = vector.extract_strided_slice %163 {offsets = [0, 384], sizes = [8, 128], strides = [1, 1]} : vector<8x512xf32> to vector<8x128xf32>
    %172 = math.tanh %171 : vector<8x128xf32>
    %173 = vector.extract_strided_slice %170 {offsets = [0, 0], sizes = [8, 128], strides = [1, 1]} : vector<8x384xf32> to vector<8x128xf32>
    %174 = vector.extract_strided_slice %170 {offsets = [0, 128], sizes = [8, 128], strides = [1, 1]} : vector<8x384xf32> to vector<8x128xf32>
    %175 = vector.extract_strided_slice %170 {offsets = [0, 256], sizes = [8, 128], strides = [1, 1]} : vector<8x384xf32> to vector<8x128xf32>
    %176 = arith.mulf %174, %154 : vector<8x128xf32>
    %177 = arith.mulf %173, %172 : vector<8x128xf32>
    %178 = arith.addf %176, %177 : vector<8x128xf32>
    %179 = math.tanh %178 : vector<8x128xf32>
    %180 = arith.mulf %175, %179 : vector<8x128xf32>
    %181 = arith.truncf %180 : vector<8x128xf32> to vector<8x128xbf16>
    %c48_70 = arith.constant 48 : index
    %c0_71 = arith.constant 0 : index
    %182 = vector.load %arg7[%c48_70, %c0_71] : memref<64x128xbf16, #tpu.memory_space<vmem>>, vector<8x128xbf16>
    tpu.vector_store %arg7[%c48_70, %c0_71], %181 {strides = array<i32>} : memref<64x128xbf16, #tpu.memory_space<vmem>>, vector<8x128xbf16>,
    %c56 = arith.constant 56 : index
    %c0_72 = arith.constant 0 : index
    %183 = vector.load %arg10[%c56, %c0_72] : memref<64x512xf32, #tpu.memory_space<vmem>>, vector<8x512xf32>
    %184 = arith.truncf %180 : vector<8x128xf32> to vector<8x128xbf16>
    %c0_73 = arith.constant 0 : index
    %c0_74 = arith.constant 0 : index
    %185 = vector.load %arg3[%c0_73, %c0_74] : memref<128x512xbf16, #tpu.memory_space<vmem>>, vector<128x512xbf16>
    %cst_75 = arith.constant dense<0.000000e+00> : vector<8x512xf32>
    %186 = tpu.matmul %184, %185, %cst_75 {dimension_numbers = #tpu.dot_dimension_numbers<[1], [0], [0], [1], [0, 0, 1, 1], [], []>} : vector<8x128xbf16>, vector<128x512xbf16>, vector<8x512xf32> -> vector<8x512xf32>
    %187 = arith.addf %183, %186 : vector<8x512xf32>
    %188 = vector.extract_strided_slice %187 {offsets = [0, 0], sizes = [8, 384], strides = [1, 1]} : vector<8x512xf32> to vector<8x384xf32>
    %cst_76 = arith.constant 0.000000e+00 : f32
    %189 = vector.broadcast %cst_76 : f32 to vector<8x384xf32>
    %190 = arith.subf %189, %188 : vector<8x384xf32>
    %191 = math.exp %190 : vector<8x384xf32>
    %cst_77 = arith.constant 1.000000e+00 : f32
    %192 = vector.broadcast %cst_77 : f32 to vector<8x384xf32>
    %193 = arith.addf %192, %191 : vector<8x384xf32>
    %194 = tpu.reciprocal %193 {approx = true} : vector<8x384xf32> -> vector<8x384xf32>
    %195 = vector.extract_strided_slice %187 {offsets = [0, 384], sizes = [8, 128], strides = [1, 1]} : vector<8x512xf32> to vector<8x128xf32>
    %196 = math.tanh %195 : vector<8x128xf32>
    %197 = vector.extract_strided_slice %194 {offsets = [0, 0], sizes = [8, 128], strides = [1, 1]} : vector<8x384xf32> to vector<8x128xf32>
    %198 = vector.extract_strided_slice %194 {offsets = [0, 128], sizes = [8, 128], strides = [1, 1]} : vector<8x384xf32> to vector<8x128xf32>
    %199 = vector.extract_strided_slice %194 {offsets = [0, 256], sizes = [8, 128], strides = [1, 1]} : vector<8x384xf32> to vector<8x128xf32>
    %200 = arith.mulf %198, %178 : vector<8x128xf32>
    %201 = arith.mulf %197, %196 : vector<8x128xf32>
    %202 = arith.addf %200, %201 : vector<8x128xf32>
    %203 = math.tanh %202 : vector<8x128xf32>
    %204 = arith.mulf %199, %203 : vector<8x128xf32>
    %205 = arith.truncf %204 : vector<8x128xf32> to vector<8x128xbf16>
    %c56_78 = arith.constant 56 : index
    %c0_79 = arith.constant 0 : index
    %206 = vector.load %arg7[%c56_78, %c0_79] : memref<64x128xbf16, #tpu.memory_space<vmem>>, vector<8x128xbf16>
    tpu.vector_store %arg7[%c56_78, %c0_79], %205 {strides = array<i32>} : memref<64x128xbf16, #tpu.memory_space<vmem>>, vector<8x128xbf16>,
    %c0_80 = arith.constant 0 : index
    %c0_81 = arith.constant 0 : index
    %c0_82 = arith.constant 0 : index
    %207 = vector.load %arg8[%c0_80, %c0_81, %c0_82] : memref<1x8x128xf32, #tpu.memory_space<vmem>>, vector<1x8x128xf32>
    %208 = vector.shape_cast %207 : vector<1x8x128xf32> to vector<8x128xf32>
    %209 = vector.shape_cast %204 : vector<8x128xf32> to vector<1x8x128xf32>
    tpu.vector_store %arg8[%c0_80, %c0_81, %c0_82], %209 {strides = array<i32>} : memref<1x8x128xf32, #tpu.memory_space<vmem>>, vector<1x8x128xf32>,
    %c0_83 = arith.constant 0 : index
    %c0_84 = arith.constant 0 : index
    %c0_85 = arith.constant 0 : index
    %210 = vector.load %arg9[%c0_83, %c0_84, %c0_85] : memref<1x8x128xf32, #tpu.memory_space<vmem>>, vector<1x8x128xf32>
    %211 = vector.shape_cast %210 : vector<1x8x128xf32> to vector<8x128xf32>
    %212 = vector.shape_cast %202 : vector<8x128xf32> to vector<1x8x128xf32>
    tpu.vector_store %arg9[%c0_83, %c0_84, %c0_85], %212 {strides = array<i32>} : memref<1x8x128xf32, #tpu.memory_space<vmem>>, vector<1x8x128xf32>,
    return
  }
  func.func @transform_0(%arg0: i32) -> (i32, i32, i32) {
    %c0_i32 = arith.constant 0 : i32
    %c0_i32_0 = arith.constant 0 : i32
    %c0_i32_1 = arith.constant 0 : i32
    return %arg0, %c0_i32, %c0_i32_0 : i32, i32, i32
  }
  func.func @transform_1(%arg0: i32) -> (i32, i32) {
    %c0_i32 = arith.constant 0 : i32
    %c0_i32_0 = arith.constant 0 : i32
    %c0_i32_1 = arith.constant 0 : i32
    return %c0_i32, %c0_i32_0 : i32, i32
  }
  func.func @transform_2(%arg0: i32) -> (i32, i32) {
    %c0_i32 = arith.constant 0 : i32
    %c0_i32_0 = arith.constant 0 : i32
    %c0_i32_1 = arith.constant 0 : i32
    return %c0_i32, %c0_i32_0 : i32, i32
  }
  func.func @transform_3(%arg0: i32) -> (i32, i32) {
    %c0_i32 = arith.constant 0 : i32
    %c0_i32_0 = arith.constant 0 : i32
    %c0_i32_1 = arith.constant 0 : i32
    return %c0_i32, %c0_i32_0 : i32, i32
  }
  func.func @transform_4(%arg0: i32) -> (i32, i32, i32) {
    %c0_i32 = arith.constant 0 : i32
    %c0_i32_0 = arith.constant 0 : i32
    %c0_i32_1 = arith.constant 0 : i32
    %c0_i32_2 = arith.constant 0 : i32
    return %c0_i32, %c0_i32_0, %c0_i32_1 : i32, i32, i32
  }
  func.func @transform_5(%arg0: i32) -> (i32, i32, i32) {
    %c0_i32 = arith.constant 0 : i32
    %c0_i32_0 = arith.constant 0 : i32
    %c0_i32_1 = arith.constant 0 : i32
    %c0_i32_2 = arith.constant 0 : i32
    return %c0_i32, %c0_i32_0, %c0_i32_1 : i32, i32, i32
  }
  func.func @transform_6(%arg0: i32) -> (i32, i32) {
    %c0_i32 = arith.constant 0 : i32
    %c0_i32_0 = arith.constant 0 : i32
    return %arg0, %c0_i32 : i32, i32
  }
  func.func @transform_7(%arg0: i32) -> (i32, i32, i32) {
    %c0_i32 = arith.constant 0 : i32
    %c0_i32_0 = arith.constant 0 : i32
    %c0_i32_1 = arith.constant 0 : i32
    %c0_i32_2 = arith.constant 0 : i32
    return %c0_i32, %c0_i32_0, %c0_i32_1 : i32, i32, i32
  }
  func.func @transform_8(%arg0: i32) -> (i32, i32, i32) {
    %c0_i32 = arith.constant 0 : i32
    %c0_i32_0 = arith.constant 0 : i32
    %c0_i32_1 = arith.constant 0 : i32
    %c0_i32_2 = arith.constant 0 : i32
    return %c0_i32, %c0_i32_0, %c0_i32_1 : i32, i32, i32
  }
}

module attributes {stable_mosaic.version = 11 : i64} {
  func.func @fc_kernel(%arg0: i32, %arg1: i32, %arg2: memref<64x128xbf16, #tpu.memory_space<vmem>>, %arg3: memref<128x256xbf16, #tpu.memory_space<vmem>>, %arg4: memref<1x256xf32, #tpu.memory_space<vmem>>, %arg5: memref<64x256xf32, #tpu.memory_space<vmem>>) attributes {dimension_semantics = [#tpu.dimension_semantics<parallel>, #tpu.dimension_semantics<parallel>], iteration_bounds = array<i64: 1, 1>, scalar_prefetch = 0 : i64, scratch_operands = 0 : i64, tpu.core_type = #tpu.core_type<tc>, window_params = [{transform_indices = @transform_0, window_bounds = array<i64: 64, 128>}, {transform_indices = @transform_1, window_bounds = array<i64: 128, 256>}, {transform_indices = @transform_2, window_bounds = array<i64: 1, 256>}, {transform_indices = @transform_3, window_bounds = array<i64: 64, 256>}]} {
    %c0 = arith.constant 0 : index
    %c0_0 = arith.constant 0 : index
    %0 = vector.load %arg2[%c0, %c0_0] : memref<64x128xbf16, #tpu.memory_space<vmem>>, vector<64x128xbf16>
    %c0_1 = arith.constant 0 : index
    %c0_2 = arith.constant 0 : index
    %1 = vector.load %arg3[%c0_1, %c0_2] : memref<128x256xbf16, #tpu.memory_space<vmem>>, vector<128x256xbf16>
    %cst = arith.constant dense<0.000000e+00> : vector<64x256xf32>
    %2 = tpu.matmul %0, %1, %cst {dimension_numbers = #tpu.dot_dimension_numbers<[1], [0], [0], [1], [0, 0, 1, 1], [], []>} : vector<64x128xbf16>, vector<128x256xbf16>, vector<64x256xf32> -> vector<64x256xf32>
    %c0_3 = arith.constant 0 : index
    %c0_4 = arith.constant 0 : index
    %3 = vector.load %arg4[%c0_3, %c0_4] : memref<1x256xf32, #tpu.memory_space<vmem>>, vector<1x256xf32>
    %4 = vector.broadcast %3 : vector<1x256xf32> to vector<64x256xf32>
    %5 = arith.addf %2, %4 : vector<64x256xf32>
    %c0_5 = arith.constant 0 : index
    %c0_6 = arith.constant 0 : index
    %6 = vector.load %arg5[%c0_5, %c0_6] : memref<64x256xf32, #tpu.memory_space<vmem>>, vector<64x256xf32>
    tpu.vector_store %arg5[%c0_5, %c0_6], %5 {strides = array<i32>} : memref<64x256xf32, #tpu.memory_space<vmem>>, vector<64x256xf32>,
    return
  }
  func.func @transform_0(%arg0: i32, %arg1: i32) -> (i32, i32) {
    %c0_i32 = arith.constant 0 : i32
    %c0_i32_0 = arith.constant 0 : i32
    return %arg1, %c0_i32 : i32, i32
  }
  func.func @transform_1(%arg0: i32, %arg1: i32) -> (i32, i32) {
    %c0_i32 = arith.constant 0 : i32
    %c0_i32_0 = arith.constant 0 : i32
    return %c0_i32, %arg0 : i32, i32
  }
  func.func @transform_2(%arg0: i32, %arg1: i32) -> (i32, i32) {
    %c0_i32 = arith.constant 0 : i32
    %c0_i32_0 = arith.constant 0 : i32
    return %c0_i32, %arg0 : i32, i32
  }
  func.func @transform_3(%arg0: i32, %arg1: i32) -> (i32, i32) {
    %c0_i32 = arith.constant 0 : i32
    return %arg1, %arg0 : i32, i32
  }
}

</mosaic_0001>

<bundles_post_ra>
// kernel: lstm_language_model_forward.3
= control target key start
LH: loop header
LB: loop body
LE: loop exit
PB: predicated region body
PF: predicated region fallthrough
CT: control target
= control target key end

     0   :  { %s523_s0 = inlined_call_operand.vmem [shape: bf16[64,128], index: 0, kind: input, shape index: {}]   ;;  %s524_s1 = inlined_call_operand.vmem [shape: bf16[128,256], index: 1, kind: input, shape index: {}]   ;;  %s525_s2 = inlined_call_operand.vmem [shape: f32[1,256], index: 2, kind: input, shape index: {}]   ;;  %s526_s3 = inlined_call_operand.hbm [shape: f32[64,256], index: 3, kind: output, shape index: {}]  }
   0x1   :  { %v315_v0 = vld [vmem:[%s524_s1 + $0x70] sm:$0xf]  ;;  %v340_v1 = vld [vmem:[%s524_s1 + $0x74] sm:$0xf0]  ;;  %v339_v2 = vld [vmem:[%s524_s1 + $0x74] sm:$0xf] }
   0x2   :  { %v316_v3 = vor.u32 %v340_v1, %v315_v0  ;;  %v317_v4 = vld [vmem:[%s524_s1 + $0x78] sm:$0xf0]  ;;  %v307_v5 = vld [vmem:[%s524_s1 + $0x60] sm:$0xf]  ;;  %v338_v6 = vld [vmem:[%s524_s1 + $0x64] sm:$0xf0] }
   0x3   :  { %v320_v7 = vor.u32 %v339_v2, %v317_v4  ;;  %v337_v8 = vld [vmem:[%s524_s1 + $0x64] sm:$0xf]  ;;  %v309_v9 = vld [vmem:[%s524_s1 + $0x68] sm:$0xf0]  ;;  %v308_v10 = vor.u32 %v338_v6, %v307_v5  ;;  %v299_v12 = vld [vmem:[%s524_s1 + $0x50] sm:$0xf] }
   0x4   :  { %149 = vmatpush.bf16.msra.mxu0 %v316_v3  ;;  %341 = vmatpush.bf16.msra.mxu2 %v316_v3  ;;  %v312_v11 = vor.u32 %v337_v8, %v309_v9  ;;  %v336_v13 = vld [vmem:[%s524_s1 + $0x54] sm:$0xf0]  ;;  %v335_v14 = vld [vmem:[%s524_s1 + $0x54] sm:$0xf]  ;;  %v301_v15 = vld [vmem:[%s524_s1 + $0x58] sm:$0xf0] }
   0x5   :  { %178 = vmatpush.bf16.msra.mxu1 %v320_v7  ;;  %349 = vmatpush.bf16.msra.mxu3 %v320_v7  ;;  %v300_v16 = vor.u32 %v336_v13, %v299_v12  ;;  %v304_v17 = vor.u32 %v335_v14, %v301_v15  ;;  %v291_v18 = vld [vmem:[%s524_s1 + $0x40] sm:$0xf]  ;;  %v334_v19 = vld [vmem:[%s524_s1 + $0x44] sm:$0xf0]  ;;  %v333_v20 = vld [vmem:[%s524_s1 + $0x44] sm:$0xf] }
   0x6   :  { %v293_v21 = vld [vmem:[%s524_s1 + $0x48] sm:$0xf0]  ;;  %v292_v22 = vor.u32 %v334_v19, %v291_v18 }
   0x8   :  { %150 = vmatpush.bf16.msra.mxu0 %v308_v10  ;;  %342 = vmatpush.bf16.msra.mxu2 %v308_v10 }
   0x9   :  { %179 = vmatpush.bf16.msra.mxu1 %v312_v11  ;;  %350 = vmatpush.bf16.msra.mxu3 %v312_v11 }
   0xc   :  { %151 = vmatpush.bf16.msra.mxu0 %v300_v16  ;;  %343 = vmatpush.bf16.msra.mxu2 %v300_v16 }
   0xd   :  { %8 = vsyncpa [#allocation3], 0  ;;  %180 = vmatpush.bf16.msra.mxu1 %v304_v17  ;;  %351 = vmatpush.bf16.msra.mxu3 %v304_v17  ;;  %v296_v23 = vor.u32 %v333_v20, %v293_v21  ;;  %v283_v24 = vld [vmem:[%s524_s1 + $0x30] sm:$0xf]  ;;  %v332_v25 = vld [vmem:[%s524_s1 + $0x34] sm:$0xf0] }
   0xe   :  { %v331_v26 = vld [vmem:[%s524_s1 + $0x34] sm:$0xf]  ;;  %v285_v27 = vld [vmem:[%s524_s1 + $0x38] sm:$0xf0]  ;;  %v284_v28 = vor.u32 %v332_v25, %v283_v24  ;;  %v275_v30 = vld [vmem:[%s524_s1 + $0x20] sm:$0xf] }
   0xf   :  { %v288_v29 = vor.u32 %v331_v26, %v285_v27  ;;  %v330_v31 = vld [vmem:[%s524_s1 + $0x24] sm:$0xf0]  ;;  %v329_v32 = vld [vmem:[%s524_s1 + $0x24] sm:$0xf]  ;;  %v277_v33 = vld [vmem:[%s524_s1 + $0x28] sm:$0xf0] }
  0x10   :  { %152 = vmatpush.bf16.msra.mxu0 %v292_v22  ;;  %344 = vmatpush.bf16.msra.mxu2 %v292_v22  ;;  %v276_v34 = vor.u32 %v330_v31, %v275_v30  ;;  %v280_v35 = vor.u32 %v329_v32, %v277_v33  ;;  %v267_v36 = vld [vmem:[%s524_s1 + $0x10] sm:$0xf]  ;;  %v328_v37 = vld [vmem:[%s524_s1 + $0x14] sm:$0xf0]  ;;  %v327_v38 = vld [vmem:[%s524_s1 + $0x14] sm:$0xf] }
  0x11   :  { %181 = vmatpush.bf16.msra.mxu1 %v296_v23  ;;  %352 = vmatpush.bf16.msra.mxu3 %v296_v23  ;;  %v269_v39 = vld [vmem:[%s524_s1 + $0x18] sm:$0xf0]  ;;  %v268_v40 = vor.u32 %v328_v37, %v267_v36  ;;  %v259_v42 = vld [vmem:[%s524_s1] sm:$0xf]  ;;  %v326_v43 = vld [vmem:[%s524_s1 + $0x4] sm:$0xf0] }
  0x12   :  { %v272_v41 = vor.u32 %v327_v38, %v269_v39  ;;  %v325_v44 = vld [vmem:[%s524_s1 + $0x4] sm:$0xf]  ;;  %v261_v45 = vld [vmem:[%s524_s1 + $0x8] sm:$0xf0]  ;;  %v260_v46 = vor.u32 %v326_v43, %v259_v42  ;;  %v323_v49 = vld [vmem:[%s523_s0 + $0x10] sm:$0xff]  ;;  %s229_s6 = sshll.u32 %s526_s3, 4  ;;  %s230_s6 = int_to_ptr.hbm [resolvable:$true] %s229_s6 }
  0x13   :  { %v264_v47 = vor.u32 %v325_v44, %v261_v45  ;;  %v321_v48 = vld [vmem:[%s523_s0] sm:$0xff]  ;;  %v322_v50 = vld [vmem:[%s523_s0 + $0x8] sm:$0xff]  ;;  %v324_v51 = vld [vmem:[%s523_s0 + $0x18] sm:$0xff]  ;;  %s386_s0 = smov [#allocation2]   ;;  %s387_s7 = smov 256  }
  0x14   :  { %153 = vmatpush.bf16.msra.mxu0 %v284_v28  ;;  %345 = vmatpush.bf16.msra.mxu2 %v284_v28  ;;  %v39_v52 = vld [vmem:[%s525_s2] sm:$0x3]  ;;  %s227_s2 = sshll.u32 %s386_s0, 4  ;;  %s388_s8 = smov 16   ;;  %s228_s2 = int_to_ptr.vmem [resolvable:$true] %s227_s2 }
  0x15   :  { %182 = vmatpush.bf16.msra.mxu1 %v288_v29  ;;  %353 = vmatpush.bf16.msra.mxu3 %v288_v29  ;;  %v41_v53 = vperm.slane %v39_v52, 0  ;;  %v42_v54 = vperm.slane %v39_v52, 1 }
  0x18   :  { %154 = vmatpush.bf16.msra.mxu0 %v276_v34  ;;  %346 = vmatpush.bf16.msra.mxu2 %v276_v34 }
  0x19   :  { %183 = vmatpush.bf16.msra.mxu1 %v280_v35  ;;  %354 = vmatpush.bf16.msra.mxu3 %v280_v35 }
  0x1c   :  { %155 = vmatpush.bf16.msra.mxu0 %v268_v40  ;;  %347 = vmatpush.bf16.msra.mxu2 %v268_v40 }
  0x1d   :  { %184 = vmatpush.bf16.msra.mxu1 %v272_v41  ;;  %355 = vmatpush.bf16.msra.mxu3 %v272_v41 }
  0x20   :  { %156 = vmatpush.bf16.msra.mxu0 %v260_v46  ;;  %348 = vmatpush.bf16.msra.mxu2 %v260_v46 }
  0x21   :  { %185 = vmatpush.bf16.msra.mxu1 %v264_v47  ;;  %356 = vmatpush.bf16.msra.mxu3 %v264_v47 }
  0x23   :  { %157 = vmatmul.bf16.vlgmr.msra.gmra.mxu0 %v321_v48  ;;  %167 = vmatmul.bf16.vlgmr.msra.gmra.mxu2 %v323_v49 }
  0x24   :  { %186 = vmatmul.bf16.vlgmr.msra.gmra.mxu1 %v321_v48  ;;  %196 = vmatmul.bf16.vlgmr.msra.gmra.mxu3 %v323_v49 }
  0x33   :  { %162 = vmatmul.bf16.gmra.mxu0 %v322_v50  ;;  %172 = vmatmul.bf16.gmra.mxu2 %v324_v51 }
  0x34   :  { %191 = vmatmul.bf16.gmra.mxu1 %v322_v50  ;;  %201 = vmatmul.bf16.gmra.mxu3 %v324_v51 }
  0xa0   :  { %v158_v55 = vpop.f32.mrf.mxu0 }
  0xa1   :  { %v159_v56 = vadd.f32 %v158_v55, %v41_v53  ;;  %v187_v57 = vpop.f32.mrf.mxu1 }
  0xa2   :  { %v188_v58 = vadd.f32 %v187_v57, %v42_v54 }
  0xa3   :  { %207 = vst [vmem:[#allocation2] sm:$0xff] %v159_v56 }
  0xa4   :  { %208 = vst [vmem:[#allocation2 + $0x8] sm:$0xff] %v188_v58 }
  0xa6   :  { %v168_v59 = vpop.f32.mrf.mxu2 }
  0xa7   :  { %v169_v60 = vadd.f32 %v168_v59, %v41_v53  ;;  %v197_v61 = vpop.f32.mrf.mxu3 }
  0xa8   :  { %v198_v62 = vadd.f32 %v197_v61, %v42_v54  ;;  %v160_v63 = vpop.f32.mrf.mxu0 }
  0xa9   :  { %215 = vst [vmem:[#allocation2 + $0x40] sm:$0xff] %v169_v60  ;;  %v161_v0 = vadd.f32 %v160_v63, %v41_v53  ;;  %v189_v1 = vpop.f32.mrf.mxu1 }
  0xaa   :  { %216 = vst [vmem:[#allocation2 + $0x48] sm:$0xff] %v198_v62  ;;  %v190_v2 = vadd.f32 %v189_v1, %v42_v54 }
  0xab   :  { %209 = vst [vmem:[#allocation2 + $0x10] sm:$0xff] %v161_v0 }
  0xac   :  { %210 = vst [vmem:[#allocation2 + $0x18] sm:$0xff] %v190_v2 }
  0xae   :  { %v170_v3 = vpop.f32.mrf.mxu2 }
  0xaf   :  { %v171_v4 = vadd.f32 %v170_v3, %v41_v53  ;;  %v199_v5 = vpop.f32.mrf.mxu3 }
  0xb0   :  { %v200_v6 = vadd.f32 %v199_v5, %v42_v54  ;;  %v163_v7 = vpop.f32.mrf.mxu0 }
  0xb1   :  { %217 = vst [vmem:[#allocation2 + $0x50] sm:$0xff] %v171_v4  ;;  %v164_v8 = vadd.f32 %v163_v7, %v41_v53  ;;  %v192_v9 = vpop.f32.mrf.mxu1 }
  0xb2   :  { %218 = vst [vmem:[#allocation2 + $0x58] sm:$0xff] %v200_v6  ;;  %v193_v10 = vadd.f32 %v192_v9, %v42_v54 }
  0xb3   :  { %211 = vst [vmem:[#allocation2 + $0x20] sm:$0xff] %v164_v8 }
  0xb4   :  { %212 = vst [vmem:[#allocation2 + $0x28] sm:$0xff] %v193_v10 }
  0xb6   :  { %v173_v11 = vpop.f32.mrf.mxu2 }
  0xb7   :  { %v174_v12 = vadd.f32 %v173_v11, %v41_v53  ;;  %v202_v13 = vpop.f32.mrf.mxu3 }
  0xb8   :  { %v203_v14 = vadd.f32 %v202_v13, %v42_v54  ;;  %v165_v15 = vpop.f32.mrf.mxu0 }
  0xb9   :  { %219 = vst [vmem:[#allocation2 + $0x60] sm:$0xff] %v174_v12  ;;  %v166_v16 = vadd.f32 %v165_v15, %v41_v53  ;;  %v194_v17 = vpop.f32.mrf.mxu1 }
  0xba   :  { %220 = vst [vmem:[#allocation2 + $0x68] sm:$0xff] %v203_v14  ;;  %v195_v18 = vadd.f32 %v194_v17, %v42_v54 }
  0xbb   :  { %213 = vst [vmem:[#allocation2 + $0x30] sm:$0xff] %v166_v16 }
  0xbc   :  { %214 = vst [vmem:[#allocation2 + $0x38] sm:$0xff] %v195_v18 }
  0xbe   :  { %v175_v19 = vpop.f32.mrf.mxu2 }
  0xbf   :  { %v176_v20 = vadd.f32 %v175_v19, %v41_v53  ;;  %v204_v21 = vpop.f32.mrf.mxu3 }
  0xc0   :  { %v205_v22 = vadd.f32 %v204_v21, %v42_v54 }
  0xc1   :  { %221 = vst [vmem:[#allocation2 + $0x70] sm:$0xff] %v176_v20 }
  0xc2   :  { %222 = vst [vmem:[#allocation2 + $0x78] sm:$0xff] %v205_v22 }
  0xc3   :  { %235 = dma.vmem_to_hbm [thread:$0]  %s228_s2, 2048, %s230_s6, [#allocation3], %s387_s7, %s387_s7, %s388_s8  }
  0xc4   :  { %384 = dma.done.wait [#allocation3], 2048  }
  0xc5   :  { %385 = vsyncadd [#allocation3], 4294965248 }
  0xc6   :  { %240 = vsyncpa [#allocation3], 1 }

// kernel: lstm_language_model_forward.2
= control target key start
LH: loop header
LB: loop body
LE: loop exit
PB: predicated region body
PF: predicated region fallthrough
CT: control target
= control target key end

     0   :  { %14 = vsyncpa [#allocation4], 0  ;;  %s6287_s0 = inlined_call_operand.vmem [shape: bf16[8,8,128], index: 0, kind: input, shape index: {}]   ;;  %s6288_s1 = inlined_call_operand.vmem [shape: bf16[128,512], index: 1, kind: input, shape index: {}]   ;;  %s6289_s2 = inlined_call_operand.vmem [shape: bf16[128,512], index: 2, kind: input, shape index: {}]   ;;  %s6290_s3 = inlined_call_operand.vmem [shape: f32[1,512], index: 3, kind: input, shape index: {}]   ;;  %s6291_s4 = inlined_call_operand.vmem [shape: f32[1,8,128], index: 4, kind: input, shape index: {}, may-alias: {4,5}]   ;;  %s6292_s5 = inlined_call_operand.vmem [shape: f32[1,8,128], index: 5, kind: input, shape index: {}, may-alias: {4,5}]   ;;  %s6293_s6 = inlined_call_operand.vmem [shape: bf16[64,128], index: 6, kind: output, shape index: {0}]   ;;  %s6294_s7 = inlined_call_operand.hbm [shape: f32[1,8,128], index: 7, kind: output, shape index: {1}]   ;;  %s6295_s8 = inlined_call_operand.hbm [shape: f32[1,8,128], index: 8, kind: output, shape index: {2}]  }
   0x1   :  { %v2789_v0 = vld [vmem:[%s6288_s1 + $0xe0] sm:$0xf]  ;;  %v3861_v1 = vld [vmem:[%s6288_s1 + $0xec] sm:$0xf0]  ;;  %v3859_v2 = vld [vmem:[%s6288_s1 + $0xe4] sm:$0xf] }
   0x2   :  { %v2790_v3 = vor.u32 %v3861_v1, %v2789_v0  ;;  %v2791_v4 = vld [vmem:[%s6288_s1 + $0xf0] sm:$0xf0]  ;;  %v2797_v5 = vld [vmem:[%s6288_s1 + $0xe8] sm:$0xf]  ;;  %v3862_v6 = vld [vmem:[%s6288_s1 + $0xf4] sm:$0xf0] }
   0x3   :  { %v2794_v7 = vor.u32 %v3859_v2, %v2791_v4  ;;  %v2798_v8 = vor.u32 %v3862_v6, %v2797_v5  ;;  %v3860_v9 = vld [vmem:[%s6288_s1 + $0xec] sm:$0xf]  ;;  %v2799_v10 = vld [vmem:[%s6288_s1 + $0xf8] sm:$0xf0]  ;;  %v2773_v11 = vld [vmem:[%s6288_s1 + $0xc0] sm:$0xf] }
   0x4   :  { %270 = vmatpush.bf16.msra.mxu0 %v2790_v3  ;;  %v2802_v12 = vor.u32 %v3860_v9, %v2799_v10  ;;  %v3857_v13 = vld [vmem:[%s6288_s1 + $0xcc] sm:$0xf0]  ;;  %v3855_v14 = vld [vmem:[%s6288_s1 + $0xc4] sm:$0xf]  ;;  %v2775_v15 = vld [vmem:[%s6288_s1 + $0xd0] sm:$0xf0] }
   0x5   :  { %299 = vmatpush.bf16.msra.mxu1 %v2794_v7  ;;  %328 = vmatpush.bf16.msra.mxu2 %v2798_v8  ;;  %v2774_v16 = vor.u32 %v3857_v13, %v2773_v11  ;;  %v2778_v17 = vor.u32 %v3855_v14, %v2775_v15  ;;  %v2781_v18 = vld [vmem:[%s6288_s1 + $0xc8] sm:$0xf]  ;;  %v3858_v19 = vld [vmem:[%s6288_s1 + $0xd4] sm:$0xf0]  ;;  %v3856_v20 = vld [vmem:[%s6288_s1 + $0xcc] sm:$0xf] }
   0x6   :  { %357 = vmatpush.bf16.msra.mxu3 %v2802_v12  ;;  %v2782_v21 = vor.u32 %v3858_v19, %v2781_v18  ;;  %v2783_v22 = vld [vmem:[%s6288_s1 + $0xd8] sm:$0xf0]  ;;  %v2757_v23 = vld [vmem:[%s6288_s1 + $0xa0] sm:$0xf]  ;;  %v3853_v24 = vld [vmem:[%s6288_s1 + $0xac] sm:$0xf0] }
   0x7   :  { %v2786_v25 = vor.u32 %v3856_v20, %v2783_v22  ;;  %v3851_v26 = vld [vmem:[%s6288_s1 + $0xa4] sm:$0xf]  ;;  %v2759_v27 = vld [vmem:[%s6288_s1 + $0xb0] sm:$0xf0]  ;;  %v2765_v28 = vld [vmem:[%s6288_s1 + $0xa8] sm:$0xf]  ;;  %v2758_v29 = vor.u32 %v3853_v24, %v2757_v23 }
   0x8   :  { %271 = vmatpush.bf16.msra.mxu0 %v2774_v16  ;;  %v3854_v30 = vld [vmem:[%s6288_s1 + $0xb4] sm:$0xf0]  ;;  %v3852_v31 = vld [vmem:[%s6288_s1 + $0xac] sm:$0xf]  ;;  %v2767_v32 = vld [vmem:[%s6288_s1 + $0xb8] sm:$0xf0]  ;;  %v2762_v33 = vor.u32 %v3851_v26, %v2759_v27 }
   0x9   :  { %300 = vmatpush.bf16.msra.mxu1 %v2778_v17  ;;  %329 = vmatpush.bf16.msra.mxu2 %v2782_v21  ;;  %v2766_v34 = vor.u32 %v3854_v30, %v2765_v28  ;;  %v2741_v35 = vld [vmem:[%s6288_s1 + $0x80] sm:$0xf]  ;;  %v3849_v36 = vld [vmem:[%s6288_s1 + $0x8c] sm:$0xf0]  ;;  %v3847_v37 = vld [vmem:[%s6288_s1 + $0x84] sm:$0xf]  ;;  %v2770_v38 = vor.u32 %v3852_v31, %v2767_v32 }
   0xa   :  { %358 = vmatpush.bf16.msra.mxu3 %v2786_v25  ;;  %v2743_v39 = vld [vmem:[%s6288_s1 + $0x90] sm:$0xf0]  ;;  %v2749_v40 = vld [vmem:[%s6288_s1 + $0x88] sm:$0xf]  ;;  %v3850_v41 = vld [vmem:[%s6288_s1 + $0x94] sm:$0xf0]  ;;  %v2742_v44 = vor.u32 %v3849_v36, %v2741_v35 }
   0xb   :  { %v3848_v42 = vld [vmem:[%s6288_s1 + $0x8c] sm:$0xf]  ;;  %v2751_v43 = vld [vmem:[%s6288_s1 + $0x98] sm:$0xf0]  ;;  %v2746_v45 = vor.u32 %v3847_v37, %v2743_v39  ;;  %v2750_v46 = vor.u32 %v3850_v41, %v2749_v40  ;;  %v2725_v47 = vld [vmem:[%s6288_s1 + $0x60] sm:$0xf] }
   0xc   :  { %272 = vmatpush.bf16.msra.mxu0 %v2758_v29  ;;  %v3845_v48 = vld [vmem:[%s6288_s1 + $0x6c] sm:$0xf0]  ;;  %v3843_v49 = vld [vmem:[%s6288_s1 + $0x64] sm:$0xf]  ;;  %v2754_v50 = vor.u32 %v3848_v42, %v2751_v43  ;;  %v2727_v51 = vld [vmem:[%s6288_s1 + $0x70] sm:$0xf0] }
   0xd   :  { %301 = vmatpush.bf16.msra.mxu1 %v2762_v33  ;;  %330 = vmatpush.bf16.msra.mxu2 %v2766_v34  ;;  %v2733_v52 = vld [vmem:[%s6288_s1 + $0x68] sm:$0xf]  ;;  %v3846_v53 = vld [vmem:[%s6288_s1 + $0x74] sm:$0xf0]  ;;  %v3844_v54 = vld [vmem:[%s6288_s1 + $0x6c] sm:$0xf]  ;;  %v2726_v56 = vor.u32 %v3845_v48, %v2725_v47  ;;  %v2730_v57 = vor.u32 %v3843_v49, %v2727_v51 }
   0xe   :  { %359 = vmatpush.bf16.msra.mxu3 %v2770_v38  ;;  %v2735_v55 = vld [vmem:[%s6288_s1 + $0x78] sm:$0xf0]  ;;  %v2734_v58 = vor.u32 %v3846_v53, %v2733_v52  ;;  %v2709_v59 = vld [vmem:[%s6288_s1 + $0x40] sm:$0xf]  ;;  %v3841_v60 = vld [vmem:[%s6288_s1 + $0x4c] sm:$0xf0] }
   0xf   :  { %v3839_v61 = vld [vmem:[%s6288_s1 + $0x44] sm:$0xf]  ;;  %v2738_v62 = vor.u32 %v3844_v54, %v2735_v55  ;;  %v2711_v63 = vld [vmem:[%s6288_s1 + $0x50] sm:$0xf0]  ;;  %v2717_v0 = vld [vmem:[%s6288_s1 + $0x48] sm:$0xf]  ;;  %v2710_v4 = vor.u32 %v3841_v60, %v2709_v59 }
  0x10   :  { %273 = vmatpush.bf16.msra.mxu0 %v2742_v44  ;;  %v3842_v1 = vld [vmem:[%s6288_s1 + $0x54] sm:$0xf0]  ;;  %v3840_v2 = vld [vmem:[%s6288_s1 + $0x4c] sm:$0xf]  ;;  %v2719_v3 = vld [vmem:[%s6288_s1 + $0x58] sm:$0xf0]  ;;  %v2714_v5 = vor.u32 %v3839_v61, %v2711_v63 }
  0x11   :  { %302 = vmatpush.bf16.msra.mxu1 %v2746_v45  ;;  %331 = vmatpush.bf16.msra.mxu2 %v2750_v46  ;;  %v2718_v6 = vor.u32 %v3842_v1, %v2717_v0  ;;  %v2693_v7 = vld [vmem:[%s6288_s1 + $0x20] sm:$0xf]  ;;  %v3837_v8 = vld [vmem:[%s6288_s1 + $0x2c] sm:$0xf0]  ;;  %v3835_v9 = vld [vmem:[%s6288_s1 + $0x24] sm:$0xf]  ;;  %v2722_v10 = vor.u32 %v3840_v2, %v2719_v3 }
  0x12   :  { %360 = vmatpush.bf16.msra.mxu3 %v2754_v50  ;;  %v2695_v11 = vld [vmem:[%s6288_s1 + $0x30] sm:$0xf0]  ;;  %v2701_v12 = vld [vmem:[%s6288_s1 + $0x28] sm:$0xf]  ;;  %v3838_v13 = vld [vmem:[%s6288_s1 + $0x34] sm:$0xf0]  ;;  %v2694_v16 = vor.u32 %v3837_v8, %v2693_v7 }
  0x13   :  { %v3836_v14 = vld [vmem:[%s6288_s1 + $0x2c] sm:$0xf]  ;;  %v2703_v15 = vld [vmem:[%s6288_s1 + $0x38] sm:$0xf0]  ;;  %v2677_v17 = vld [vmem:[%s6288_s1] sm:$0xf]  ;;  %v2698_v18 = vor.u32 %v3835_v9, %v2695_v11  ;;  %v2702_v19 = vor.u32 %v3838_v13, %v2701_v12 }
  0x14   :  { %274 = vmatpush.bf16.msra.mxu0 %v2726_v56  ;;  %v3833_v20 = vld [vmem:[%s6288_s1 + $0xc] sm:$0xf0]  ;;  %v3831_v21 = vld [vmem:[%s6288_s1 + $0x4] sm:$0xf]  ;;  %v2679_v22 = vld [vmem:[%s6288_s1 + $0x10] sm:$0xf0]  ;;  %v2706_v23 = vor.u32 %v3836_v14, %v2703_v15 }
  0x15   :  { %303 = vmatpush.bf16.msra.mxu1 %v2730_v57  ;;  %332 = vmatpush.bf16.msra.mxu2 %v2734_v58  ;;  %v2685_v24 = vld [vmem:[%s6288_s1 + $0x8] sm:$0xf]  ;;  %v3834_v25 = vld [vmem:[%s6288_s1 + $0x14] sm:$0xf0]  ;;  %v3832_v26 = vld [vmem:[%s6288_s1 + $0xc] sm:$0xf]  ;;  %v2678_v30 = vor.u32 %v3833_v20, %v2677_v17  ;;  %v2682_v33 = vor.u32 %v3831_v21, %v2679_v22 }
  0x16   :  { %361 = vmatpush.bf16.msra.mxu3 %v2738_v62  ;;  %v2687_v27 = vld [vmem:[%s6288_s1 + $0x18] sm:$0xf0]  ;;  %v2917_v28 = vld [vmem:[%s6289_s2 + $0xe0] sm:$0xf]  ;;  %v3893_v29 = vld [vmem:[%s6289_s2 + $0xec] sm:$0xf0]  ;;  %v2686_v34 = vor.u32 %v3834_v25, %v2685_v24 }
  0x17   :  { %v3891_v31 = vld [vmem:[%s6289_s2 + $0xe4] sm:$0xf]  ;;  %v2919_v32 = vld [vmem:[%s6289_s2 + $0xf0] sm:$0xf0]  ;;  %v2690_v36 = vor.u32 %v3832_v26, %v2687_v27  ;;  %v2918_v37 = vor.u32 %v3893_v29, %v2917_v28  ;;  %v2925_v38 = vld [vmem:[%s6289_s2 + $0xe8] sm:$0xf] }
  0x18   :  { %275 = vmatpush.bf16.msra.mxu0 %v2710_v4  ;;  %v3827_v35 = vld [vmem:[%s6287_s0] sm:$0xff]  ;;  %v3894_v39 = vld [vmem:[%s6289_s2 + $0xf4] sm:$0xf0]  ;;  %v3892_v40 = vld [vmem:[%s6289_s2 + $0xec] sm:$0xf]  ;;  %v2922_v41 = vor.u32 %v3891_v31, %v2919_v32 }
  0x19   :  { %304 = vmatpush.bf16.msra.mxu1 %v2714_v5  ;;  %333 = vmatpush.bf16.msra.mxu2 %v2718_v6  ;;  %v2927_v42 = vld [vmem:[%s6289_s2 + $0xf8] sm:$0xf0]  ;;  %v2901_v43 = vld [vmem:[%s6289_s2 + $0xc0] sm:$0xf]  ;;  %v3889_v44 = vld [vmem:[%s6289_s2 + $0xcc] sm:$0xf0]  ;;  %v2926_v47 = vor.u32 %v3894_v39, %v2925_v38 }
  0x1a   :  { %362 = vmatpush.bf16.msra.mxu3 %v2722_v10  ;;  %v3887_v45 = vld [vmem:[%s6289_s2 + $0xc4] sm:$0xf]  ;;  %v2903_v46 = vld [vmem:[%s6289_s2 + $0xd0] sm:$0xf0]  ;;  %v2909_v48 = vld [vmem:[%s6289_s2 + $0xc8] sm:$0xf]  ;;  %v2930_v49 = vor.u32 %v3892_v40, %v2927_v42  ;;  %v2902_v50 = vor.u32 %v3889_v44, %v2901_v43 }
  0x1b   :  { %v3890_v51 = vld [vmem:[%s6289_s2 + $0xd4] sm:$0xf0]  ;;  %v3888_v52 = vld [vmem:[%s6289_s2 + $0xcc] sm:$0xf] }
  0x1c   :  { %276 = vmatpush.bf16.msra.mxu0 %v2694_v16 }
  0x1d   :  { %305 = vmatpush.bf16.msra.mxu1 %v2698_v18  ;;  %334 = vmatpush.bf16.msra.mxu2 %v2702_v19 }
  0x1e   :  { %363 = vmatpush.bf16.msra.mxu3 %v2706_v23 }
  0x20   :  { %277 = vmatpush.bf16.msra.mxu0 %v2678_v30 }
  0x21   :  { %306 = vmatpush.bf16.msra.mxu1 %v2682_v33  ;;  %335 = vmatpush.bf16.msra.mxu2 %v2686_v34 }
  0x22   :  { %364 = vmatpush.bf16.msra.mxu3 %v2690_v36 }
  0x24   :  { %617 = vmatpush.bf16.msrb.mxu0 %v2918_v37 }
  0x25   :  { %15 = vsyncpa [#allocation6], 0  ;;  %278 = vmatmul.bf16.vlgmr.msra.gmra.mxu0 %v3827_v35  ;;  %630 = vmatpush.bf16.msrb.mxu1 %v2922_v41  ;;  %v2906_v53 = vor.u32 %v3887_v45, %v2903_v46  ;;  %v2911_v54 = vld [vmem:[%s6289_s2 + $0xd8] sm:$0xf0]  ;;  %v2885_v55 = vld [vmem:[%s6289_s2 + $0xa0] sm:$0xf]  ;;  %v2910_v59 = vor.u32 %v3890_v51, %v2909_v48 }
  0x26   :  { %v3885_v56 = vld [vmem:[%s6289_s2 + $0xac] sm:$0xf0]  ;;  %307 = vmatmul.bf16.vlgmr.msra.gmra.mxu1 %v3827_v35  ;;  %336 = vmatmul.bf16.vlgmr.msra.gmra.mxu2 %v3827_v35  ;;  %v3883_v57 = vld [vmem:[%s6289_s2 + $0xa4] sm:$0xf]  ;;  %v2887_v58 = vld [vmem:[%s6289_s2 + $0xb0] sm:$0xf0]  ;;  %v2914_v60 = vor.u32 %v3888_v52, %v2911_v54 }
  0x27   :  { %365 = vmatmul.bf16.vlgmr.msra.gmra.mxu3 %v3827_v35  ;;  %643 = vmatpush.bf16.msrb.mxu2 %v2926_v47  ;;  %v2886_v61 = vor.u32 %v3885_v56, %v2885_v55  ;;  %v2893_v62 = vld [vmem:[%s6289_s2 + $0xa8] sm:$0xf]  ;;  %v3886_v63 = vld [vmem:[%s6289_s2 + $0xb4] sm:$0xf0]  ;;  %v3884_v0 = vld [vmem:[%s6289_s2 + $0xac] sm:$0xf]  ;;  %v2890_v1 = vor.u32 %v3883_v57, %v2887_v58 }
  0x28   :  { %656 = vmatpush.bf16.msrb.mxu3 %v2930_v49  ;;  %618 = vmatpush.bf16.msrb.mxu0 %v2902_v50  ;;  %v2895_v2 = vld [vmem:[%s6289_s2 + $0xb8] sm:$0xf0]  ;;  %v2869_v3 = vld [vmem:[%s6289_s2 + $0x80] sm:$0xf]  ;;  %v3881_v4 = vld [vmem:[%s6289_s2 + $0x8c] sm:$0xf0]  ;;  %v2894_v7 = vor.u32 %v3886_v63, %v2893_v62 }
  0x29   :  { %631 = vmatpush.bf16.msrb.mxu1 %v2906_v53  ;;  %v3879_v5 = vld [vmem:[%s6289_s2 + $0x84] sm:$0xf]  ;;  %v2871_v6 = vld [vmem:[%s6289_s2 + $0x90] sm:$0xf0]  ;;  %v2898_v8 = vor.u32 %v3884_v0, %v2895_v2  ;;  %v2870_v9 = vor.u32 %v3881_v4, %v2869_v3  ;;  %v2877_v10 = vld [vmem:[%s6289_s2 + $0x88] sm:$0xf] }
  0x2a   :  { %v3882_v11 = vld [vmem:[%s6289_s2 + $0x94] sm:$0xf0]  ;;  %v3880_v12 = vld [vmem:[%s6289_s2 + $0x8c] sm:$0xf]  ;;  %v2874_v13 = vor.u32 %v3879_v5, %v2871_v6  ;;  %v2879_v14 = vld [vmem:[%s6289_s2 + $0x98] sm:$0xf0] }
  0x2b   :  { %644 = vmatpush.bf16.msrb.mxu2 %v2910_v59  ;;  %v2853_v15 = vld [vmem:[%s6289_s2 + $0x60] sm:$0xf]  ;;  %v3877_v16 = vld [vmem:[%s6289_s2 + $0x6c] sm:$0xf0]  ;;  %v3875_v17 = vld [vmem:[%s6289_s2 + $0x64] sm:$0xf]  ;;  %v2878_v20 = vor.u32 %v3882_v11, %v2877_v10  ;;  %v2882_v21 = vor.u32 %v3880_v12, %v2879_v14 }
  0x2c   :  { %657 = vmatpush.bf16.msrb.mxu3 %v2914_v60  ;;  %619 = vmatpush.bf16.msrb.mxu0 %v2886_v61  ;;  %v2855_v18 = vld [vmem:[%s6289_s2 + $0x70] sm:$0xf0]  ;;  %v3828_v19 = vld [vmem:[%s6287_s0 + $0x8] sm:$0xff]  ;;  %v2854_v22 = vor.u32 %v3877_v16, %v2853_v15  ;;  %v3878_v24 = vld [vmem:[%s6289_s2 + $0x74] sm:$0xf0]  ;;  %s4301_s23 = smov [#allocation5]  }
  0x2d   :  { %632 = vmatpush.bf16.msrb.mxu1 %v2890_v1  ;;  %v2861_v23 = vld [vmem:[%s6289_s2 + $0x68] sm:$0xf]  ;;  %v3876_v25 = vld [vmem:[%s6289_s2 + $0x6c] sm:$0xf]  ;;  %v2858_v26 = vor.u32 %v3875_v17, %v2855_v18  ;;  %v2863_v27 = vld [vmem:[%s6289_s2 + $0x78] sm:$0xf0] }
  0x2e   :  { %v2837_v28 = vld [vmem:[%s6289_s2 + $0x40] sm:$0xf]  ;;  %v3873_v29 = vld [vmem:[%s6289_s2 + $0x4c] sm:$0xf0]  ;;  %v3871_v30 = vld [vmem:[%s6289_s2 + $0x44] sm:$0xf]  ;;  %v2862_v32 = vor.u32 %v3878_v24, %v2861_v23  ;;  %v2866_v33 = vor.u32 %v3876_v25, %v2863_v27 }
  0x2f   :  { %645 = vmatpush.bf16.msrb.mxu2 %v2894_v7  ;;  %v2839_v31 = vld [vmem:[%s6289_s2 + $0x50] sm:$0xf0]  ;;  %v2838_v34 = vor.u32 %v3873_v29, %v2837_v28  ;;  %v2845_v35 = vld [vmem:[%s6289_s2 + $0x48] sm:$0xf]  ;;  %v3874_v36 = vld [vmem:[%s6289_s2 + $0x54] sm:$0xf0] }
  0x30   :  { %658 = vmatpush.bf16.msrb.mxu3 %v2898_v8  ;;  %620 = vmatpush.bf16.msrb.mxu0 %v2870_v9  ;;  %v2842_v37 = vor.u32 %v3871_v30, %v2839_v31  ;;  %v3872_v38 = vld [vmem:[%s6289_s2 + $0x4c] sm:$0xf]  ;;  %v2847_v39 = vld [vmem:[%s6289_s2 + $0x58] sm:$0xf0]  ;;  %v2846_v40 = vor.u32 %v3874_v36, %v2845_v35  ;;  %v2821_v41 = vld [vmem:[%s6289_s2 + $0x20] sm:$0xf] }
  0x31   :  { %633 = vmatpush.bf16.msrb.mxu1 %v2874_v13  ;;  %v3869_v42 = vld [vmem:[%s6289_s2 + $0x2c] sm:$0xf0]  ;;  %v3867_v43 = vld [vmem:[%s6289_s2 + $0x24] sm:$0xf]  ;;  %v2850_v44 = vor.u32 %v3872_v38, %v2847_v39  ;;  %v2823_v46 = vld [vmem:[%s6289_s2 + $0x30] sm:$0xf0] }
  0x32   :  { %v2822_v45 = vor.u32 %v3869_v42, %v2821_v41  ;;  %v2829_v47 = vld [vmem:[%s6289_s2 + $0x28] sm:$0xf]  ;;  %v3870_v48 = vld [vmem:[%s6289_s2 + $0x34] sm:$0xf0]  ;;  %v2826_v49 = vor.u32 %v3867_v43, %v2823_v46  ;;  %v3868_v50 = vld [vmem:[%s6289_s2 + $0x2c] sm:$0xf] }
  0x33   :  { %646 = vmatpush.bf16.msrb.mxu2 %v2878_v20  ;;  %v2831_v51 = vld [vmem:[%s6289_s2 + $0x38] sm:$0xf0]  ;;  %v2805_v52 = vld [vmem:[%s6289_s2] sm:$0xf]  ;;  %v3865_v53 = vld [vmem:[%s6289_s2 + $0xc] sm:$0xf0]  ;;  %v2830_v56 = vor.u32 %v3870_v48, %v2829_v47 }
  0x34   :  { %659 = vmatpush.bf16.msrb.mxu3 %v2882_v21  ;;  %621 = vmatpush.bf16.msrb.mxu0 %v2854_v22  ;;  %v3863_v54 = vld [vmem:[%s6289_s2 + $0x4] sm:$0xf]  ;;  %v2807_v55 = vld [vmem:[%s6289_s2 + $0x10] sm:$0xf0]  ;;  %v2834_v57 = vor.u32 %v3868_v50, %v2831_v51  ;;  %v2806_v58 = vor.u32 %v3865_v53, %v2805_v52  ;;  %v2813_v59 = vld [vmem:[%s6289_s2 + $0x8] sm:$0xf] }
  0x35   :  { %283 = vmatmul.bf16.gmra.mxu0 %v3828_v19  ;;  %634 = vmatpush.bf16.msrb.mxu1 %v2858_v26  ;;  %v3866_v60 = vld [vmem:[%s6289_s2 + $0x14] sm:$0xf0]  ;;  %v2810_v61 = vor.u32 %v3863_v54, %v2807_v55  ;;  %v3864_v62 = vld [vmem:[%s6289_s2 + $0xc] sm:$0xf]  ;;  %v2815_v63 = vld [vmem:[%s6289_s2 + $0x18] sm:$0xf0] }
  0x36   :  { %312 = vmatmul.bf16.gmra.mxu1 %v3828_v19  ;;  %341 = vmatmul.bf16.gmra.mxu2 %v3828_v19  ;;  %v2814_v0 = vor.u32 %v3866_v60, %v2813_v59  ;;  %v2818_v1 = vor.u32 %v3864_v62, %v2815_v63  ;;  %v3829_v2 = vld [vmem:[%s6287_s0 + $0x10] sm:$0xff]  ;;  %v3830_v3 = vld [vmem:[%s6287_s0 + $0x18] sm:$0xff]  ;;  %v32_v4 = vld [vmem:[%s6291_s4] sm:$0xff]  ;;  %s2641_s24 = sshll.u32 %s4301_s23, 4  ;;  %s4302_s4 = smov [#allocation3]   ;;  %s2642_s24 = int_to_ptr.vmem [resolvable:$true] %s2641_s24 }
  0x37   :  { %370 = vmatmul.bf16.gmra.mxu3 %v3828_v19  ;;  %647 = vmatpush.bf16.msrb.mxu2 %v2862_v32  ;;  %v424_v5 = vpack.c.bf16 %v32_v4, %v32_v4  ;;  %v76_v8 = vld [vmem:[%s6290_s3] sm:$0xf]  ;;  %v3047_v48 = vld [vmem:[%s6289_s2 + $0xf0] sm:$0xf0]  ;;  %v3926_v50 = vld [vmem:[%s6289_s2 + $0xf4] sm:$0xf0] }
  0x38   :  { %660 = vmatpush.bf16.msrb.mxu3 %v2866_v33  ;;  %622 = vmatpush.bf16.msrb.mxu0 %v2838_v34  ;;  %v4754_v9 = vperm.slane %v76_v8, 0  ;;  %v4758_v11 = vperm.slane %v76_v8, 1  ;;  %v4768_v17 = vperm.slane %v76_v8, 3  ;;  %v4770_v18 = vperm.slane %v76_v8, 2  ;;  %v3045_v43 = vld [vmem:[%s6289_s2 + $0xe0] sm:$0xf] }
  0x39   :  { %635 = vmatpush.bf16.msrb.mxu1 %v2842_v37  ;;  %v3029_v63 = vld [vmem:[%s6289_s2 + $0xc0] sm:$0xf]  ;;  %v3037_v4 = vld [vmem:[%s6289_s2 + $0xc8] sm:$0xf]  ;;  %s2630_s25 = sshll.u32 %s4302_s4, 4  ;;  %s2632_s28 = sshll.u32 %s6294_s7, 4  ;;  %s2631_s25 = int_to_ptr.vmem [resolvable:$true] %s2630_s25  ;;  %s2633_s28 = int_to_ptr.hbm [resolvable:$true] %s2632_s28 }
  0x3b   :  { %648 = vmatpush.bf16.msrb.mxu2 %v2846_v40 }
  0x3c   :  { %661 = vmatpush.bf16.msrb.mxu3 %v2850_v44  ;;  %623 = vmatpush.bf16.msrb.mxu0 %v2822_v45  ;;  %v3925_v44 = vld [vmem:[%s6289_s2 + $0xec] sm:$0xf0]  ;;  %v3923_v45 = vld [vmem:[%s6289_s2 + $0xe4] sm:$0xf] }
  0x3d   :  { %636 = vmatpush.bf16.msrb.mxu1 %v2826_v49  ;;  %v3046_v47 = vor.u32 %v3925_v44, %v3045_v43  ;;  %v3053_v49 = vld [vmem:[%s6289_s2 + $0xe8] sm:$0xf]  ;;  %v3050_v54 = vor.u32 %v3923_v45, %v3047_v48 }
  0x3e   :  { %v3054_v55 = vor.u32 %v3926_v50, %v3053_v49 }
  0x3f   :  { %649 = vmatpush.bf16.msrb.mxu2 %v2830_v56  ;;  %v3924_v56 = vld [vmem:[%s6289_s2 + $0xec] sm:$0xf] }
  0x40   :  { %662 = vmatpush.bf16.msrb.mxu3 %v2834_v57  ;;  %624 = vmatpush.bf16.msrb.mxu0 %v2806_v58  ;;  %v3055_v57 = vld [vmem:[%s6289_s2 + $0xf8] sm:$0xf0] }
  0x41   :  { %637 = vmatpush.bf16.msrb.mxu1 %v2810_v61  ;;  %v3058_v61 = vor.u32 %v3924_v56, %v3055_v57  ;;  %v3911_v56 = vld [vmem:[%s6289_s2 + $0x84] sm:$0xf] }
  0x43   :  { %650 = vmatpush.bf16.msrb.mxu2 %v2814_v0  ;;  %v3921_v0 = vld [vmem:[%s6289_s2 + $0xcc] sm:$0xf0] }
  0x44   :  { %663 = vmatpush.bf16.msrb.mxu3 %v2818_v1  ;;  %892 = vmatpush.bf16.msra.mxu0 %v3046_v47  ;;  %v3919_v1 = vld [vmem:[%s6289_s2 + $0xc4] sm:$0xf]  ;;  %v3023_v47 = vld [vmem:[%s6289_s2 + $0xb8] sm:$0xf0] }
  0x45   :  { %288 = vmatmul.bf16.gmra.mxu0 %v3829_v2  ;;  %905 = vmatpush.bf16.msra.mxu1 %v3050_v54  ;;  %v2997_v54 = vld [vmem:[%s6289_s2 + $0x80] sm:$0xf] }
  0x46   :  { %317 = vmatmul.bf16.gmra.mxu1 %v3829_v2  ;;  %346 = vmatmul.bf16.gmra.mxu2 %v3829_v2 }
  0x47   :  { %375 = vmatmul.bf16.gmra.mxu3 %v3829_v2  ;;  %918 = vmatpush.bf16.msra.mxu2 %v3054_v55  ;;  %v3030_v2 = vor.u32 %v3921_v0, %v3029_v63  ;;  %v3913_v55 = vld [vmem:[%s6289_s2 + $0x8c] sm:$0xf0]  ;;  %v3914_v63 = vld [vmem:[%s6289_s2 + $0x94] sm:$0xf0] }
  0x48   :  { %931 = vmatpush.bf16.msra.mxu3 %v3058_v61  ;;  %v2998_v57 = vor.u32 %v3913_v55, %v2997_v54  ;;  %v3005_v61 = vld [vmem:[%s6289_s2 + $0x88] sm:$0xf]  ;;  %v3903_v54 = vld [vmem:[%s6289_s2 + $0x44] sm:$0xf] }
  0x49   :  { %893 = vmatpush.bf16.msra.mxu0 %v3030_v2  ;;  %v3912_v2 = vld [vmem:[%s6289_s2 + $0x8c] sm:$0xf] }
  0x55   :  { %293 = vmatmul.bf16.gmra.mxu0 %v3830_v3 }
  0x56   :  { %322 = vmatmul.bf16.gmra.mxu1 %v3830_v3  ;;  %351 = vmatmul.bf16.gmra.mxu2 %v3830_v3 }
  0x57   :  { %380 = vmatmul.bf16.gmra.mxu3 %v3830_v3  ;;  %v3031_v3 = vld [vmem:[%s6289_s2 + $0xd0] sm:$0xf0] }
  0x58   :  { %v3034_v8 = vor.u32 %v3919_v1, %v3031_v3  ;;  %v3006_v1 = vor.u32 %v3914_v63, %v3005_v61  ;;  %v3007_v3 = vld [vmem:[%s6289_s2 + $0x98] sm:$0xf0] }
  0x5a   :  { %906 = vmatpush.bf16.msra.mxu1 %v3034_v8  ;;  %v3909_v8 = vld [vmem:[%s6289_s2 + $0x6c] sm:$0xf0] }
  0x65   :  { %625 = vmatmul.bf16.vlgmr.msrb.gmra.mxu0 %v424_v5 }
  0x66   :  { %638 = vmatmul.bf16.vlgmr.msrb.gmra.mxu1 %v424_v5  ;;  %651 = vmatmul.bf16.vlgmr.msrb.gmra.mxu2 %v424_v5 }
  0x67   :  { %664 = vmatmul.bf16.vlgmr.msrb.gmra.mxu3 %v424_v5  ;;  %v3922_v5 = vld [vmem:[%s6289_s2 + $0xd4] sm:$0xf0] }
  0xa2   :  { %v4747_v6 = vpop.f32.mrf.mxu0 }
  0xa3   :  { %v4749_v7 = vpop.f32.mrf.mxu1 }
  0xa9   :  { %v4756_v10 = vpop.f32.mrf.mxu2 }
  0xaa   :  { %v4760_v12 = vpop.f32.mrf.mxu3  ;;  %v281_v13 = vpop.f32.mrf.mxu0 }
  0xab   :  { %v4763_v14 = vadd.f32 %v281_v13, %v4754_v9  ;;  %v310_v15 = vpop.f32.mrf.mxu1  ;;  %v3038_v13 = vor.u32 %v3922_v5, %v3037_v4  ;;  %v3010_v4 = vor.u32 %v3912_v2, %v3007_v3  ;;  %v2981_v5 = vld [vmem:[%s6289_s2 + $0x60] sm:$0xf] }
  0xac   :  { %v4766_v16 = vadd.f32 %v310_v15, %v4758_v11  ;;  %v3920_v15 = vld [vmem:[%s6289_s2 + $0xcc] sm:$0xf]  ;;  %v2949_v2 = vld [vmem:[%s6289_s2 + $0x20] sm:$0xf] }
  0xad   :  { %919 = vmatpush.bf16.msra.mxu2 %v3038_v13  ;;  %v3907_v13 = vld [vmem:[%s6289_s2 + $0x64] sm:$0xf] }
  0xb1   :  { %v339_v19 = vpop.f32.mrf.mxu2 }
  0xb2   :  { %v4773_v20 = vadd.f32 %v339_v19, %v4770_v18  ;;  %v368_v21 = vpop.f32.mrf.mxu3  ;;  %v284_v22 = vpop.f32.mrf.mxu0  ;;  %v3039_v19 = vld [vmem:[%s6289_s2 + $0xd8] sm:$0xf0] }
  0xb3   :  { %v4776_v23 = vadd.f32 %v368_v21, %v4768_v17  ;;  %v4779_v24 = vadd.f32 %v284_v22, %v4754_v9  ;;  %v313_v25 = vpop.f32.mrf.mxu1  ;;  %v3042_v21 = vor.u32 %v3920_v15, %v3039_v19  ;;  %v3013_v22 = vld [vmem:[%s6289_s2 + $0xa0] sm:$0xf]  ;;  %v2982_v19 = vor.u32 %v3909_v8, %v2981_v5  ;;  %v3899_v5 = vld [vmem:[%s6289_s2 + $0x24] sm:$0xf]  ;;  %v2951_v8 = vld [vmem:[%s6289_s2 + $0x30] sm:$0xf0] }
  0xb4   :  { %v4782_v26 = vadd.f32 %v313_v25, %v4758_v11  ;;  %v3917_v25 = vld [vmem:[%s6289_s2 + $0xac] sm:$0xf0] }
  0xb5   :  { %932 = vmatpush.bf16.msra.mxu3 %v3042_v21  ;;  %v2983_v21 = vld [vmem:[%s6289_s2 + $0x70] sm:$0xf0] }
  0xb9   :  { %v342_v27 = vpop.f32.mrf.mxu2 }
  0xba   :  { %v4785_v28 = vadd.f32 %v342_v27, %v4770_v18  ;;  %v371_v29 = vpop.f32.mrf.mxu3  ;;  %v286_v30 = vpop.f32.mrf.mxu0  ;;  %v3915_v27 = vld [vmem:[%s6289_s2 + $0xa4] sm:$0xf] }
  0xbb   :  { %v4788_v31 = vadd.f32 %v371_v29, %v4768_v17  ;;  %v4791_v32 = vadd.f32 %v286_v30, %v4754_v9  ;;  %v315_v33 = vpop.f32.mrf.mxu1  ;;  %v3014_v30 = vor.u32 %v3917_v25, %v3013_v22  ;;  %v2989_v22 = vld [vmem:[%s6289_s2 + $0x68] sm:$0xf]  ;;  %v3910_v25 = vld [vmem:[%s6289_s2 + $0x74] sm:$0xf0] }
  0xbc   :  { %v4794_v34 = vadd.f32 %v315_v33, %v4758_v11  ;;  %v3015_v33 = vld [vmem:[%s6289_s2 + $0xb0] sm:$0xf0] }
  0xbd   :  { %v3018_v44 = vor.u32 %v3915_v27, %v3015_v33  ;;  %894 = vmatpush.bf16.msra.mxu0 %v3014_v30  ;;  %v2986_v33 = vor.u32 %v3907_v13, %v2983_v21  ;;  %v3902_v21 = vld [vmem:[%s6289_s2 + $0x34] sm:$0xf0] }
  0xbf   :  { %907 = vmatpush.bf16.msra.mxu1 %v3018_v44 }
  0xc1   :  { %v344_v35 = vpop.f32.mrf.mxu2  ;;  %895 = vmatpush.bf16.msra.mxu0 %v2998_v57  ;;  %v2973_v57 = vld [vmem:[%s6289_s2 + $0x48] sm:$0xf] }
  0xc2   :  { %v4797_v36 = vadd.f32 %v344_v35, %v4770_v18  ;;  %v373_v37 = vpop.f32.mrf.mxu3  ;;  %v289_v38 = vpop.f32.mrf.mxu0  ;;  %v3021_v35 = vld [vmem:[%s6289_s2 + $0xa8] sm:$0xf] }
  0xc3   :  { %v4800_v39 = vadd.f32 %v373_v37, %v4768_v17  ;;  %v4803_v40 = vadd.f32 %v289_v38, %v4754_v9  ;;  %v318_v41 = vpop.f32.mrf.mxu1  ;;  %v3918_v37 = vld [vmem:[%s6289_s2 + $0xb4] sm:$0xf0] }
  0xc4   :  { %v4806_v42 = vadd.f32 %v318_v41, %v4758_v11  ;;  %v3022_v45 = vor.u32 %v3918_v37, %v3021_v35  ;;  %v2990_v35 = vor.u32 %v3910_v25, %v2989_v22  ;;  %v3908_v37 = vld [vmem:[%s6289_s2 + $0x6c] sm:$0xf]  ;;  %v280_v25 = vadd.f32 %v4747_v6, %v4754_v9 }
  0xc5   :  { %896 = vmatpush.bf16.msra.mxu0 %v2982_v19  ;;  %v2957_v19 = vld [vmem:[%s6289_s2 + $0x28] sm:$0xf]  ;;  %v3900_v22 = vld [vmem:[%s6289_s2 + $0x2c] sm:$0xf] }
  0xc6   :  { %920 = vmatpush.bf16.msra.mxu2 %v3022_v45 }
  0xc9   :  { %v347_v46 = vpop.f32.mrf.mxu2 }
  0xca   :  { %v4827_v51 = vadd.f32 %v347_v46, %v4770_v18  ;;  %v376_v52 = vpop.f32.mrf.mxu3  ;;  %v291_v53 = vpop.f32.mrf.mxu0  ;;  %v3916_v46 = vld [vmem:[%s6289_s2 + $0xac] sm:$0xf]  ;;  %921 = vmatpush.bf16.msra.mxu2 %v3006_v1  ;;  %v2975_v1 = vld [vmem:[%s6289_s2 + $0x58] sm:$0xf0] }
  0xcb   :  { %v4836_v58 = vadd.f32 %v376_v52, %v4768_v17  ;;  %v4839_v59 = vadd.f32 %v291_v53, %v4754_v9  ;;  %v320_v60 = vpop.f32.mrf.mxu1  ;;  %v3026_v52 = vor.u32 %v3916_v46, %v3023_v47 }
  0xcc   :  { %v4842_v62 = vadd.f32 %v320_v60, %v4758_v11  ;;  %v2999_v60 = vld [vmem:[%s6289_s2 + $0x90] sm:$0xf0] }
  0xcd   :  { %933 = vmatpush.bf16.msra.mxu3 %v3026_v52  ;;  %v3002_v0 = vor.u32 %v3911_v56, %v2999_v60  ;;  %v3905_v52 = vld [vmem:[%s6289_s2 + $0x4c] sm:$0xf0]  ;;  %v2967_v56 = vld [vmem:[%s6289_s2 + $0x50] sm:$0xf0]  ;;  %v3906_v60 = vld [vmem:[%s6289_s2 + $0x54] sm:$0xf0] }
  0xce   :  { %922 = vmatpush.bf16.msra.mxu2 %v2990_v35  ;;  %v2970_v61 = vor.u32 %v3903_v54, %v2967_v56  ;;  %v2974_v63 = vor.u32 %v3906_v60, %v2973_v57  ;;  %v2933_v35 = vld [vmem:[%s6289_s2] sm:$0xf]  ;;  %v2941_v54 = vld [vmem:[%s6289_s2 + $0x8] sm:$0xf]  ;;  %v3898_v57 = vld [vmem:[%s6289_s2 + $0x14] sm:$0xf0] }
  0xcf   :  { %908 = vmatpush.bf16.msra.mxu1 %v3002_v0  ;;  %v3904_v0 = vld [vmem:[%s6289_s2 + $0x4c] sm:$0xf] }
  0xd0   :  { %v2978_v3 = vor.u32 %v3904_v0, %v2975_v1  ;;  %v3896_v60 = vld [vmem:[%s6289_s2 + $0xc] sm:$0xf]  ;;  %v2942_v1 = vor.u32 %v3898_v57, %v2941_v54 }
  0xd1   :  { %v349_v29 = vpop.f32.mrf.mxu2  ;;  %934 = vmatpush.bf16.msra.mxu3 %v3010_v4  ;;  %v3901_v4 = vld [vmem:[%s6289_s2 + $0x2c] sm:$0xf0] }
  0xd2   :  { %v4887_v38 = vadd.f32 %v349_v29, %v4770_v18  ;;  %v378_v41 = vpop.f32.mrf.mxu3  ;;  %v294_v43 = vpop.f32.mrf.mxu0  ;;  %923 = vmatpush.bf16.msra.mxu2 %v2974_v63  ;;  %v2950_v13 = vor.u32 %v3901_v4, %v2949_v2 }
  0xd3   :  { %v4896_v48 = vadd.f32 %v378_v41, %v4768_v17  ;;  %v4899_v49 = vadd.f32 %v294_v43, %v4754_v9  ;;  %v323_v50 = vpop.f32.mrf.mxu1  ;;  %v2991_v41 = vld [vmem:[%s6289_s2 + $0x78] sm:$0xf0]  ;;  %909 = vmatpush.bf16.msra.mxu1 %v2986_v33 }
  0xd4   :  { %v4902_v53 = vadd.f32 %v323_v50, %v4758_v11  ;;  %v2994_v46 = vor.u32 %v3908_v37, %v2991_v41  ;;  %v2965_v50 = vld [vmem:[%s6289_s2 + $0x40] sm:$0xf]  ;;  %v2959_v33 = vld [vmem:[%s6289_s2 + $0x38] sm:$0xf0]  ;;  %v3897_v37 = vld [vmem:[%s6289_s2 + $0xc] sm:$0xf0]  ;;  %v309_v41 = vadd.f32 %v4749_v7, %v4758_v11 }
  0xd5   :  { %v2966_v55 = vor.u32 %v3905_v52, %v2965_v50  ;;  %v3895_v50 = vld [vmem:[%s6289_s2 + $0x4] sm:$0xf]  ;;  %v2935_v52 = vld [vmem:[%s6289_s2 + $0x10] sm:$0xf0]  ;;  %v2934_v56 = vor.u32 %v3897_v37, %v2933_v35 }
  0xd6   :  { %935 = vmatpush.bf16.msra.mxu3 %v2994_v46  ;;  %v2962_v46 = vor.u32 %v3900_v22, %v2959_v33  ;;  %v2938_v0 = vor.u32 %v3895_v50, %v2935_v52 }
  0xd7   :  { %897 = vmatpush.bf16.msra.mxu0 %v2966_v55  ;;  %910 = vmatpush.bf16.msra.mxu1 %v2970_v61  ;;  %v2943_v61 = vld [vmem:[%s6289_s2 + $0x18] sm:$0xf0] }
  0xd9   :  { %v352_v15 = vpop.f32.mrf.mxu2 }
  0xda   :  { %v4947_v27 = vadd.f32 %v352_v15, %v4770_v18  ;;  %v381_v29 = vpop.f32.mrf.mxu3  ;;  %v296_v30 = vpop.f32.mrf.mxu0  ;;  %v2954_v15 = vor.u32 %v3899_v5, %v2951_v8  ;;  %936 = vmatpush.bf16.msra.mxu3 %v2978_v3  ;;  %v2946_v3 = vor.u32 %v3896_v60, %v2943_v61  ;;  %v338_v8 = vadd.f32 %v4756_v10, %v4770_v18 }
  0xdb   :  { %v4956_v43 = vadd.f32 %v381_v29, %v4768_v17  ;;  %v4959_v44 = vadd.f32 %v296_v30, %v4754_v9  ;;  %v325_v45 = vpop.f32.mrf.mxu1  ;;  %v2958_v30 = vor.u32 %v3902_v21, %v2957_v19  ;;  %898 = vmatpush.bf16.msra.mxu0 %v2950_v13 }
  0xdc   :  { %v4962_v47 = vadd.f32 %v325_v45, %v4758_v11  ;;  %911 = vmatpush.bf16.msra.mxu1 %v2954_v15 }
  0xdd   :  { %924 = vmatpush.bf16.msra.mxu2 %v2958_v30 }
  0xde   :  { %937 = vmatpush.bf16.msra.mxu3 %v2962_v46 }
  0xdf   :  { %899 = vmatpush.bf16.msra.mxu0 %v2934_v56 }
  0xe0   :  { %912 = vmatpush.bf16.msra.mxu1 %v2938_v0  ;;  %v3173_v0 = vld [vmem:[%s6289_s2 + $0xe0] sm:$0xf] }
  0xe1   :  { %v354_v29 = vpop.f32.mrf.mxu2  ;;  %925 = vmatpush.bf16.msra.mxu2 %v2942_v1  ;;  %v3957_v1 = vld [vmem:[%s6289_s2 + $0xec] sm:$0xf0] }
  0xe2   :  { %v5023_v6 = vadd.f32 %v354_v29, %v4770_v18  ;;  %v383_v9 = vpop.f32.mrf.mxu3  ;;  %v626_v45 = vpop.f32.mrf.mxu0  ;;  %938 = vmatpush.bf16.msra.mxu3 %v2946_v3  ;;  %v3174_v3 = vor.u32 %v3957_v1, %v3173_v0  ;;  %v3125_v1 = vld [vmem:[%s6289_s2 + $0x80] sm:$0xf] }
  0xe3   :  { %v5035_v7 = vadd.f32 %v383_v9, %v4768_v17  ;;  %v669_v11 = vadd.f32 %v626_v45, %v280_v25  ;;  %v639_v55 = vpop.f32.mrf.mxu1  ;;  %v367_v25 = vadd.f32 %v4760_v12, %v4768_v17  ;;  %v34_v12 = vld [vmem:[%s6292_s5] sm:$0xff]  ;;  %s2643_s5 = sshll.u32 %s6295_s8, 4  ;;  %s2644_s5 = int_to_ptr.hbm [resolvable:$true] %s2643_s5 }
  0xe4   :  { %v670_v63 = vadd.f32 %v639_v55, %v309_v41  ;;  %1167 = vmatpush.bf16.msrb.mxu0 %v3174_v3  ;;  %v3943_v3 = vld [vmem:[%s6289_s2 + $0x84] sm:$0xf] }
  0xe5   :  { %v673_v2 = vsub.f32 0.0, %v669_v11 }
  0xe6   :  { %v674_v4 = vsub.f32 0.0, %v670_v63 }
  0xe7   :  { %v676_v5 = vmul.f32 1.442695, %v673_v2  ;;  %v3955_v2 = vld [vmem:[%s6289_s2 + $0xe4] sm:$0xf] }
  0xe8   :  { %v678_v13 = vmul.f32 1.442695, %v674_v4  ;;  %v3175_v4 = vld [vmem:[%s6289_s2 + $0xf0] sm:$0xf0] }
  0xe9   :  { %4121 = vpow2.f32 %v676_v5  ;;  %v652_v19 = vpop.f32.mrf.mxu2  ;;  %v3181_v5 = vld [vmem:[%s6289_s2 + $0xe8] sm:$0xf] }
  0xea   :  { %4123 = vpow2.f32 %v678_v13  ;;  %v671_v15 = vadd.f32 %v652_v19, %v338_v8  ;;  %v665_v21 = vpop.f32.mrf.mxu3  ;;  %v628_v22 = vpop.f32.mrf.mxu0  ;;  %v3958_v8 = vld [vmem:[%s6289_s2 + $0xf4] sm:$0xf0]  ;;  %v3178_v13 = vor.u32 %v3955_v2, %v3175_v4  ;;  %v3945_v2 = vld [vmem:[%s6289_s2 + $0x8c] sm:$0xf0] }
  0xeb   :  { %v641_v29 = vpop.f32.mrf.mxu1  ;;  %v672_v33 = vadd.f32 %v665_v21, %v367_v25  ;;  %v3182_v19 = vor.u32 %v3958_v8, %v3181_v5  ;;  %v3183_v21 = vld [vmem:[%s6289_s2 + $0xf8] sm:$0xf0]  ;;  %v3157_v25 = vld [vmem:[%s6289_s2 + $0xc0] sm:$0xf]  ;;  %v3126_v4 = vor.u32 %v3945_v2, %v3125_v1  ;;  %v3127_v5 = vld [vmem:[%s6289_s2 + $0x90] sm:$0xf0] }
  0xec   :  { %v675_v30 = vsub.f32 0.0, %v671_v15  ;;  %v3956_v15 = vld [vmem:[%s6289_s2 + $0xec] sm:$0xf]  ;;  %1180 = vmatpush.bf16.msrb.mxu1 %v3178_v13  ;;  %v3953_v29 = vld [vmem:[%s6289_s2 + $0xcc] sm:$0xf0] }
  0xed   :  { %v3186_v22 = vor.u32 %v3956_v15, %v3183_v21  ;;  %1193 = vmatpush.bf16.msrb.mxu2 %v3182_v19  ;;  %v3133_v8 = vld [vmem:[%s6289_s2 + $0x88] sm:$0xf]  ;;  %v3946_v13 = vld [vmem:[%s6289_s2 + $0x94] sm:$0xf0]  ;;  %v3130_v19 = vor.u32 %v3943_v3, %v3127_v5  ;;  %v3944_v21 = vld [vmem:[%s6289_s2 + $0x8c] sm:$0xf] }
  0xee   :  { %v680_v35 = vmul.f32 1.442695, %v675_v30  ;;  %v3951_v30 = vld [vmem:[%s6289_s2 + $0xc4] sm:$0xf]  ;;  %v3134_v15 = vor.u32 %v3946_v13, %v3133_v8  ;;  %v3077_v2 = vld [vmem:[%s6289_s2 + $0x20] sm:$0xf] }
  0xef   :  { %v4122_v37 = vpop.eup %4121  ;;  %1206 = vmatpush.bf16.msrb.mxu3 %v3186_v22  ;;  %v3135_v22 = vld [vmem:[%s6289_s2 + $0x98] sm:$0xf0]  ;;  %v3933_v3 = vld [vmem:[%s6289_s2 + $0x2c] sm:$0xf0]  ;;  %v3079_v8 = vld [vmem:[%s6289_s2 + $0x30] sm:$0xf0] }
  0xf0   :  { %v4124_v41 = vpop.eup %4123  ;;  %v682_v10 = vadd.f32 1.0, %v4122_v37  ;;  %4125 = vpow2.f32 %v680_v35  ;;  %v3159_v35 = vld [vmem:[%s6289_s2 + $0xd0] sm:$0xf0]  ;;  %v3165_v37 = vld [vmem:[%s6289_s2 + $0xc8] sm:$0xf]  ;;  %v3078_v5 = vor.u32 %v3933_v3, %v3077_v2 }
  0xf1   :  { %v683_v18 = vadd.f32 1.0, %v4124_v41  ;;  %4127 = vtanh.f32 %v672_v33  ;;  %v654_v9 = vpop.f32.mrf.mxu2  ;;  %v3158_v33 = vor.u32 %v3953_v29, %v3157_v25  ;;  %v3954_v41 = vld [vmem:[%s6289_s2 + $0xd4] sm:$0xf0]  ;;  %v3138_v25 = vor.u32 %v3944_v21, %v3135_v22  ;;  %v3109_v29 = vld [vmem:[%s6289_s2 + $0x60] sm:$0xf] }
  0xf2   :  { %4129 = vrcp.f32 %v682_v10  ;;  %v667_v45 = vpop.f32.mrf.mxu3  ;;  %v3162_v10 = vor.u32 %v3951_v30, %v3159_v35  ;;  %v3952_v9 = vld [vmem:[%s6289_s2 + $0xcc] sm:$0xf]  ;;  %v3941_v30 = vld [vmem:[%s6289_s2 + $0x6c] sm:$0xf0]  ;;  %v3085_v13 = vld [vmem:[%s6289_s2 + $0x28] sm:$0xf] }
  0xf3   :  { %4131 = vrcp.f32 %v683_v18  ;;  %v3166_v18 = vor.u32 %v3954_v41, %v3165_v37  ;;  %v3167_v45 = vld [vmem:[%s6289_s2 + $0xd8] sm:$0xf0]  ;;  %1168 = vmatpush.bf16.msrb.mxu0 %v3158_v33  ;;  %v3939_v33 = vld [vmem:[%s6289_s2 + $0x64] sm:$0xf]  ;;  %v3110_v35 = vor.u32 %v3941_v30, %v3109_v29  ;;  %v3111_v37 = vld [vmem:[%s6289_s2 + $0x70] sm:$0xf0] }
  0xf4   :  { %1181 = vmatpush.bf16.msrb.mxu1 %v3162_v10  ;;  %v3117_v41 = vld [vmem:[%s6289_s2 + $0x68] sm:$0xf]  ;;  %v3942_v10 = vld [vmem:[%s6289_s2 + $0x74] sm:$0xf0]  ;;  %v3932_v22 = vld [vmem:[%s6289_s2 + $0x2c] sm:$0xf] }
  0xf5   :  { %1194 = vmatpush.bf16.msrb.mxu2 %v3166_v18  ;;  %v3114_v18 = vor.u32 %v3939_v33, %v3111_v37  ;;  %v3061_v29 = vld [vmem:[%s6289_s2] sm:$0xf]  ;;  %v3929_v33 = vld [vmem:[%s6289_s2 + $0xc] sm:$0xf0]  ;;  %v3063_v37 = vld [vmem:[%s6289_s2 + $0x10] sm:$0xf0] }
  0xf6   :  { %v4126_v46 = vpop.eup %4125 }
  0xf7   :  { %v4128_v50 = vpop.eup %4127  ;;  %v684_v54 = vadd.f32 1.0, %v4126_v46  ;;  %v3170_v46 = vor.u32 %v3952_v9, %v3167_v45  ;;  %v3118_v9 = vor.u32 %v3942_v10, %v3117_v41  ;;  %v3940_v45 = vld [vmem:[%s6289_s2 + $0x6c] sm:$0xf] }
  0xf8   :  { %v4130_v17 = vpop.eup %4129 }
  0xf9   :  { %v4132_v52 = vpop.eup %4131  ;;  %v690_v11 = vmul.f32 %v4130_v17, %v4128_v50  ;;  %4133 = vrcp.f32 %v684_v54  ;;  %v3141_v50 = vld [vmem:[%s6289_s2 + $0xa0] sm:$0xf]  ;;  %v3947_v17 = vld [vmem:[%s6289_s2 + $0xa4] sm:$0xf]  ;;  %1207 = vmatpush.bf16.msrb.mxu3 %v3170_v46  ;;  %v3143_v54 = vld [vmem:[%s6289_s2 + $0xb0] sm:$0xf0] }
  0xfa   :  { %v689_v55 = vmul.f32 %v4132_v52, %v34_v12  ;;  %v3949_v12 = vld [vmem:[%s6289_s2 + $0xac] sm:$0xf0]  ;;  %v3119_v46 = vld [vmem:[%s6289_s2 + $0x78] sm:$0xf0] }
  0xfb   :  { %v3142_v52 = vor.u32 %v3949_v12, %v3141_v50  ;;  %v3122_v50 = vor.u32 %v3940_v45, %v3119_v46  ;;  %v3093_v12 = vld [vmem:[%s6289_s2 + $0x40] sm:$0xf]  ;;  %v3069_v45 = vld [vmem:[%s6289_s2 + $0x8] sm:$0xf]  ;;  %v3930_v46 = vld [vmem:[%s6289_s2 + $0x14] sm:$0xf0] }
  0xfc   :  { %v5053_v56 = vadd.f32 %v690_v11, %v689_v55  ;;  %v3149_v11 = vld [vmem:[%s6289_s2 + $0xa8] sm:$0xf]  ;;  %v3950_v55 = vld [vmem:[%s6289_s2 + $0xb4] sm:$0xf0] }
  0xfd   :  { %1169 = vmatpush.bf16.msrb.mxu0 %v3142_v52  ;;  %v3935_v52 = vld [vmem:[%s6289_s2 + $0x44] sm:$0xf] }
  0xfe   :  { %4135 = vtanh.f32 %v5053_v56 }
  0xff   :  { %v4134_v57 = vpop.eup %4133 }
 0x101   :  { %1170 = vmatpush.bf16.msrb.mxu0 %v3126_v4  ;;  %v3931_v4 = vld [vmem:[%s6289_s2 + $0x24] sm:$0xf] }
 0x104   :  { %v4136_v60 = vpop.eup %4135 }
 0x105   :  { %v693_v61 = vmul.f32 %v4136_v60, %v4134_v57  ;;  %v3146_v57 = vor.u32 %v3947_v17, %v3143_v54  ;;  %v3150_v60 = vor.u32 %v3950_v55, %v3149_v11  ;;  %1171 = vmatpush.bf16.msrb.mxu0 %v3110_v35  ;;  %v3937_v17 = vld [vmem:[%s6289_s2 + $0x4c] sm:$0xf0]  ;;  %v3095_v11 = vld [vmem:[%s6289_s2 + $0x50] sm:$0xf0]  ;;  %v3101_v55 = vld [vmem:[%s6289_s2 + $0x48] sm:$0xf] }
 0x106   :  { %v3094_v54 = vor.u32 %v3937_v17, %v3093_v12  ;;  %v3927_v35 = vld [vmem:[%s6289_s2 + $0x4] sm:$0xf] }
 0x107   :  { %v694_v63 = vpack.c.bf16 %v693_v61, %v693_v61  ;;  %v3948_v61 = vld [vmem:[%s6289_s2 + $0xac] sm:$0xf]  ;;  %1182 = vmatpush.bf16.msrb.mxu1 %v3146_v57  ;;  %1195 = vmatpush.bf16.msrb.mxu2 %v3150_v60  ;;  %v3938_v57 = vld [vmem:[%s6289_s2 + $0x54] sm:$0xf0]  ;;  %v3098_v60 = vor.u32 %v3935_v52, %v3095_v11  ;;  %v3070_v52 = vor.u32 %v3930_v46, %v3069_v45  ;;  %v3987_v45 = vld [vmem:[%s6289_s2 + $0xe4] sm:$0xf] }
 0x109   :  { %695 = vst [vmem:[%s6293_s6] sm:$0xf] %v694_v63  ;;  %900 = vmatmul.bf16.vlgmr.msra.gmra.mxu0 %v694_v63  ;;  %913 = vmatmul.bf16.vlgmr.msra.gmra.mxu1 %v694_v63 }
 0x10a   :  { %926 = vmatmul.bf16.vlgmr.msra.gmra.mxu2 %v694_v63  ;;  %939 = vmatmul.bf16.vlgmr.msra.gmra.mxu3 %v694_v63  ;;  %v3151_v63 = vld [vmem:[%s6289_s2 + $0xb8] sm:$0xf0] }
 0x10b   :  { %v3154_v0 = vor.u32 %v3948_v61, %v3151_v63  ;;  %1183 = vmatpush.bf16.msrb.mxu1 %v3130_v19  ;;  %1196 = vmatpush.bf16.msrb.mxu2 %v3134_v15  ;;  %v3102_v61 = vor.u32 %v3938_v57, %v3101_v55  ;;  %v3936_v63 = vld [vmem:[%s6289_s2 + $0x4c] sm:$0xf]  ;;  %v3934_v19 = vld [vmem:[%s6289_s2 + $0x34] sm:$0xf0]  ;;  %v3082_v15 = vor.u32 %v3931_v4, %v3079_v8 }
 0x10c   :  { %1172 = vmatpush.bf16.msrb.mxu0 %v3094_v54  ;;  %v3086_v21 = vor.u32 %v3934_v19, %v3085_v13  ;;  %v3071_v54 = vld [vmem:[%s6289_s2 + $0x18] sm:$0xf0] }
 0x10d   :  { %1208 = vmatpush.bf16.msrb.mxu3 %v3154_v0  ;;  %v3103_v0 = vld [vmem:[%s6289_s2 + $0x58] sm:$0xf0] }
 0x10e   :  { %v3106_v1 = vor.u32 %v3936_v63, %v3103_v0 }
 0x10f   :  { %1184 = vmatpush.bf16.msrb.mxu1 %v3114_v18  ;;  %1197 = vmatpush.bf16.msrb.mxu2 %v3118_v9  ;;  %v3062_v18 = vor.u32 %v3929_v33, %v3061_v29  ;;  %v3066_v9 = vor.u32 %v3927_v35, %v3063_v37 }
 0x110   :  { %1173 = vmatpush.bf16.msrb.mxu0 %v3078_v5 }
 0x111   :  { %1209 = vmatpush.bf16.msrb.mxu3 %v3138_v25  ;;  %v3087_v25 = vld [vmem:[%s6289_s2 + $0x38] sm:$0xf0] }
 0x112   :  { %v3090_v30 = vor.u32 %v3932_v22, %v3087_v25 }
 0x113   :  { %1185 = vmatpush.bf16.msrb.mxu1 %v3098_v60  ;;  %1198 = vmatpush.bf16.msrb.mxu2 %v3102_v61 }
 0x114   :  { %1174 = vmatpush.bf16.msrb.mxu0 %v3062_v18 }
 0x115   :  { %1210 = vmatpush.bf16.msrb.mxu3 %v3122_v50  ;;  %v3928_v50 = vld [vmem:[%s6289_s2 + $0xc] sm:$0xf] }
 0x116   :  { %v3074_v11 = vor.u32 %v3928_v50, %v3071_v54  ;;  %v3303_v50 = vld [vmem:[%s6289_s2 + $0xf0] sm:$0xf0] }
 0x117   :  { %1186 = vmatpush.bf16.msrb.mxu1 %v3082_v15  ;;  %1199 = vmatpush.bf16.msrb.mxu2 %v3086_v21 }
 0x119   :  { %1211 = vmatpush.bf16.msrb.mxu3 %v3106_v1 }
 0x11b   :  { %1187 = vmatpush.bf16.msrb.mxu1 %v3066_v9  ;;  %1200 = vmatpush.bf16.msrb.mxu2 %v3070_v52  ;;  %v3989_v9 = vld [vmem:[%s6289_s2 + $0xec] sm:$0xf0]  ;;  %v3306_v52 = vor.u32 %v3987_v45, %v3303_v50  ;;  %v3261_v45 = vld [vmem:[%s6289_s2 + $0x88] sm:$0xf] }
 0x11d   :  { %1212 = vmatpush.bf16.msrb.mxu3 %v3090_v30 }
 0x11f   :  { %1455 = vmatpush.bf16.msra.mxu1 %v3306_v52  ;;  %v3263_v52 = vld [vmem:[%s6289_s2 + $0x98] sm:$0xf0] }
 0x121   :  { %1213 = vmatpush.bf16.msrb.mxu3 %v3074_v11  ;;  %v3988_v11 = vld [vmem:[%s6289_s2 + $0xec] sm:$0xf] }
 0x186   :  { %v901_v41 = vpop.f32.mrf.mxu0  ;;  %v914_v10 = vpop.f32.mrf.mxu1 }
 0x187   :  { %v944_v12 = vadd.f32 %v901_v41, %v4763_v14  ;;  %v945_v17 = vadd.f32 %v914_v10, %v4766_v16 }
 0x189   :  { %v948_v55 = vsub.f32 0.0, %v944_v12  ;;  %v949_v57 = vsub.f32 0.0, %v945_v17  ;;  %v3309_v12 = vld [vmem:[%s6289_s2 + $0xe8] sm:$0xf]  ;;  %v3990_v17 = vld [vmem:[%s6289_s2 + $0xf4] sm:$0xf0] }
 0x18a   :  { %v3310_v54 = vor.u32 %v3990_v17, %v3309_v12  ;;  %v3976_v17 = vld [vmem:[%s6289_s2 + $0x8c] sm:$0xf] }
 0x18b   :  { %v951_v60 = vmul.f32 1.442695, %v948_v55  ;;  %v953_v61 = vmul.f32 1.442695, %v949_v57  ;;  %v3311_v55 = vld [vmem:[%s6289_s2 + $0xf8] sm:$0xf0] }
 0x18c   :  { %v3314_v57 = vor.u32 %v3988_v11, %v3311_v55  ;;  %1468 = vmatpush.bf16.msra.mxu2 %v3310_v54  ;;  %v3266_v54 = vor.u32 %v3976_v17, %v3263_v52  ;;  %v3237_v11 = vld [vmem:[%s6289_s2 + $0x60] sm:$0xf]  ;;  %v3973_v55 = vld [vmem:[%s6289_s2 + $0x6c] sm:$0xf0] }
 0x18d   :  { %4137 = vpow2.f32 %v951_v60  ;;  %v927_v14 = vpop.f32.mrf.mxu2  ;;  %v940_v16 = vpop.f32.mrf.mxu3  ;;  %v3285_v60 = vld [vmem:[%s6289_s2 + $0xc0] sm:$0xf]  ;;  %v3961_v52 = vld [vmem:[%s6289_s2 + $0xc] sm:$0xf0] }
 0x18e   :  { %4139 = vpow2.f32 %v953_v61  ;;  %v946_v63 = vadd.f32 %v927_v14, %v4773_v20  ;;  %v903_v0 = vpop.f32.mrf.mxu0  ;;  %v916_v1 = vpop.f32.mrf.mxu1  ;;  %v947_v3 = vadd.f32 %v940_v16, %v4776_v23  ;;  %v3985_v61 = vld [vmem:[%s6289_s2 + $0xcc] sm:$0xf0]  ;;  %v3983_v14 = vld [vmem:[%s6289_s2 + $0xc4] sm:$0xf]  ;;  %1481 = vmatpush.bf16.msra.mxu3 %v3314_v57 }
 0x18f   :  { %v3286_v16 = vor.u32 %v3985_v61, %v3285_v60  ;;  %v3293_v0 = vld [vmem:[%s6289_s2 + $0xc8] sm:$0xf]  ;;  %v3986_v1 = vld [vmem:[%s6289_s2 + $0xd4] sm:$0xf0]  ;;  %v3971_v57 = vld [vmem:[%s6289_s2 + $0x64] sm:$0xf]  ;;  %v3238_v60 = vor.u32 %v3973_v55, %v3237_v11 }
 0x190   :  { %v950_v2 = vsub.f32 0.0, %v946_v63  ;;  %v3287_v63 = vld [vmem:[%s6289_s2 + $0xd0] sm:$0xf0] }
 0x191   :  { %v3239_v61 = vld [vmem:[%s6289_s2 + $0x70] sm:$0xf0] }
 0x192   :  { %v955_v4 = vmul.f32 1.442695, %v950_v2  ;;  %v3290_v2 = vor.u32 %v3983_v14, %v3287_v63  ;;  %v3245_v14 = vld [vmem:[%s6289_s2 + $0x68] sm:$0xf]  ;;  %v3242_v63 = vor.u32 %v3971_v57, %v3239_v61  ;;  %v3191_v11 = vld [vmem:[%s6289_s2 + $0x10] sm:$0xf0] }
 0x193   :  { %v4138_v5 = vpop.eup %4137 }
 0x194   :  { %v4140_v8 = vpop.eup %4139  ;;  %v957_v13 = vadd.f32 1.0, %v4138_v5  ;;  %4141 = vpow2.f32 %v955_v4  ;;  %v3984_v4 = vld [vmem:[%s6289_s2 + $0xcc] sm:$0xf]  ;;  %v3295_v5 = vld [vmem:[%s6289_s2 + $0xd8] sm:$0xf0]  ;;  %1456 = vmatpush.bf16.msra.mxu1 %v3290_v2 }
 0x195   :  { %v958_v19 = vadd.f32 1.0, %v4140_v8  ;;  %4143 = vtanh.f32 %v947_v3  ;;  %v929_v15 = vpop.f32.mrf.mxu2  ;;  %v942_v21 = vpop.f32.mrf.mxu3  ;;  %v3294_v3 = vor.u32 %v3986_v1, %v3293_v0  ;;  %v3298_v8 = vor.u32 %v3984_v4, %v3295_v5  ;;  %v3972_v1 = vld [vmem:[%s6289_s2 + $0x6c] sm:$0xf]  ;;  %v3247_v2 = vld [vmem:[%s6289_s2 + $0x78] sm:$0xf0] }
 0x196   :  { %4145 = vrcp.f32 %v957_v13  ;;  %v3269_v13 = vld [vmem:[%s6289_s2 + $0xa0] sm:$0xf]  ;;  %v3979_v15 = vld [vmem:[%s6289_s2 + $0xa4] sm:$0xf]  ;;  %v3969_v5 = vld [vmem:[%s6289_s2 + $0x4c] sm:$0xf0] }
 0x197   :  { %4147 = vrcp.f32 %v958_v19  ;;  %1469 = vmatpush.bf16.msra.mxu2 %v3294_v3  ;;  %v3981_v19 = vld [vmem:[%s6289_s2 + $0xac] sm:$0xf0]  ;;  %1482 = vmatpush.bf16.msra.mxu3 %v3298_v8  ;;  %v3250_v3 = vor.u32 %v3972_v1, %v3247_v2  ;;  %v3221_v4 = vld [vmem:[%s6289_s2 + $0x40] sm:$0xf]  ;;  %v3967_v8 = vld [vmem:[%s6289_s2 + $0x44] sm:$0xf] }
 0x198   :  { %v3270_v21 = vor.u32 %v3981_v19, %v3269_v13  ;;  %v3222_v13 = vor.u32 %v3969_v5, %v3221_v4  ;;  %v3223_v19 = vld [vmem:[%s6289_s2 + $0x50] sm:$0xf0] }
 0x19a   :  { %v4142_v22 = vpop.eup %4141 }
 0x19b   :  { %v4144_v25 = vpop.eup %4143  ;;  %v959_v30 = vadd.f32 1.0, %v4142_v22  ;;  %v3271_v22 = vld [vmem:[%s6289_s2 + $0xb0] sm:$0xf0] }
 0x19c   :  { %v4146_v29 = vpop.eup %4145 }
 0x19d   :  { %v4148_v20 = vpop.eup %4147  ;;  %v965_v33 = vmul.f32 %v4146_v29, %v4144_v25  ;;  %4149 = vrcp.f32 %v959_v30  ;;  %v3277_v25 = vld [vmem:[%s6289_s2 + $0xa8] sm:$0xf]  ;;  %v3982_v29 = vld [vmem:[%s6289_s2 + $0xb4] sm:$0xf0] }
 0x19e   :  { %v964_v35 = vmul.f32 %v4148_v20, %v5053_v56  ;;  %v3301_v56 = vld [vmem:[%s6289_s2 + $0xe0] sm:$0xf]  ;;  %v3274_v20 = vor.u32 %v3979_v15, %v3271_v22  ;;  %v3278_v30 = vor.u32 %v3982_v29, %v3277_v25  ;;  %v3229_v15 = vld [vmem:[%s6289_s2 + $0x48] sm:$0xf]  ;;  %v3226_v22 = vor.u32 %v3967_v8, %v3223_v19  ;;  %v3968_v29 = vld [vmem:[%s6289_s2 + $0x4c] sm:$0xf] }
 0x19f   :  { %v3302_v46 = vor.u32 %v3989_v9, %v3301_v56  ;;  %v3255_v9 = vld [vmem:[%s6289_s2 + $0x90] sm:$0xf0] }
 0x1a0   :  { %v5256_v23 = vadd.f32 %v965_v33, %v964_v35  ;;  %v3980_v33 = vld [vmem:[%s6289_s2 + $0xac] sm:$0xf]  ;;  %v3279_v35 = vld [vmem:[%s6289_s2 + $0xb8] sm:$0xf0]  ;;  %1457 = vmatpush.bf16.msra.mxu1 %v3274_v20  ;;  %1470 = vmatpush.bf16.msra.mxu2 %v3278_v30 }
 0x1a1   :  { %1442 = vmatpush.bf16.msra.mxu0 %v3302_v46  ;;  %v3978_v46 = vld [vmem:[%s6289_s2 + $0x94] sm:$0xf0]  ;;  %v3231_v20 = vld [vmem:[%s6289_s2 + $0x58] sm:$0xf0] }
 0x1a2   :  { %4151 = vtanh.f32 %v5256_v23  ;;  %v3262_v12 = vor.u32 %v3978_v46, %v3261_v45  ;;  %v3234_v30 = vor.u32 %v3968_v29, %v3231_v20  ;;  %v3964_v46 = vld [vmem:[%s6289_s2 + $0x2c] sm:$0xf] }
 0x1a3   :  { %v4150_v37 = vpop.eup %4149 }
 0x1a4   :  { %1471 = vmatpush.bf16.msra.mxu2 %v3262_v12  ;;  %v3189_v12 = vld [vmem:[%s6289_s2] sm:$0xf] }
 0x1a5   :  { %1443 = vmatpush.bf16.msra.mxu0 %v3286_v16  ;;  %v3974_v16 = vld [vmem:[%s6289_s2 + $0x74] sm:$0xf0] }
 0x1a6   :  { %v3246_v0 = vor.u32 %v3974_v16, %v3245_v14  ;;  %v3197_v14 = vld [vmem:[%s6289_s2 + $0x8] sm:$0xf]  ;;  %v3962_v16 = vld [vmem:[%s6289_s2 + $0x14] sm:$0xf0] }
 0x1a7   :  { %v3198_v2 = vor.u32 %v3962_v16, %v3197_v14  ;;  %v4022_v14 = vld [vmem:[%s6289_s2 + $0xf4] sm:$0xf0] }
 0x1a8   :  { %v4152_v41 = vpop.eup %4151  ;;  %1472 = vmatpush.bf16.msra.mxu2 %v3246_v0 }
 0x1a9   :  { %v968_v10 = vmul.f32 %v4152_v41, %v4150_v37  ;;  %1444 = vmatpush.bf16.msra.mxu0 %v3270_v21  ;;  %v3282_v37 = vor.u32 %v3980_v33, %v3279_v35  ;;  %v3253_v41 = vld [vmem:[%s6289_s2 + $0x80] sm:$0xf]  ;;  %v3970_v21 = vld [vmem:[%s6289_s2 + $0x54] sm:$0xf0]  ;;  %v3965_v35 = vld [vmem:[%s6289_s2 + $0x2c] sm:$0xf0] }
 0x1aa   :  { %v3230_v25 = vor.u32 %v3970_v21, %v3229_v15  ;;  %v3205_v33 = vld [vmem:[%s6289_s2 + $0x20] sm:$0xf] }
 0x1ab   :  { %v969_v18 = vpack.c.bf16 %v968_v10, %v968_v10  ;;  %v3977_v10 = vld [vmem:[%s6289_s2 + $0x8c] sm:$0xf0]  ;;  %1483 = vmatpush.bf16.msra.mxu3 %v3282_v37  ;;  %v3963_v37 = vld [vmem:[%s6289_s2 + $0x24] sm:$0xf] }
 0x1ac   :  { %v3254_v56 = vor.u32 %v3977_v10, %v3253_v41  ;;  %1473 = vmatpush.bf16.msra.mxu2 %v3230_v25  ;;  %v3206_v41 = vor.u32 %v3965_v35, %v3205_v33  ;;  %v3207_v10 = vld [vmem:[%s6289_s2 + $0x30] sm:$0xf0] }
 0x1ad   :  { %970 = vst [vmem:[%s6293_s6 + $0x4] sm:$0xf] %v969_v18  ;;  %1175 = vmatmul.bf16.vlgmr.msrb.gmra.mxu0 %v969_v18  ;;  %1188 = vmatmul.bf16.vlgmr.msrb.gmra.mxu1 %v969_v18 }
 0x1ae   :  { %1201 = vmatmul.bf16.vlgmr.msrb.gmra.mxu2 %v969_v18  ;;  %1214 = vmatmul.bf16.vlgmr.msrb.gmra.mxu3 %v969_v18  ;;  %v3975_v18 = vld [vmem:[%s6289_s2 + $0x84] sm:$0xf] }
 0x1af   :  { %v3258_v50 = vor.u32 %v3975_v18, %v3255_v9  ;;  %1445 = vmatpush.bf16.msra.mxu0 %v3254_v56  ;;  %1484 = vmatpush.bf16.msra.mxu3 %v3266_v54  ;;  %v3213_v18 = vld [vmem:[%s6289_s2 + $0x28] sm:$0xf]  ;;  %v3966_v56 = vld [vmem:[%s6289_s2 + $0x34] sm:$0xf0]  ;;  %v3210_v9 = vor.u32 %v3963_v37, %v3207_v10  ;;  %v3959_v54 = vld [vmem:[%s6289_s2 + $0x4] sm:$0xf] }
 0x1b0   :  { %v3214_v45 = vor.u32 %v3966_v56, %v3213_v18  ;;  %v3194_v61 = vor.u32 %v3959_v54, %v3191_v11  ;;  %v4021_v11 = vld [vmem:[%s6289_s2 + $0xec] sm:$0xf0] }
 0x1b1   :  { %1458 = vmatpush.bf16.msra.mxu1 %v3258_v50  ;;  %v3215_v50 = vld [vmem:[%s6289_s2 + $0x38] sm:$0xf0] }
 0x1b2   :  { %v3218_v17 = vor.u32 %v3964_v46, %v3215_v50  ;;  %1474 = vmatpush.bf16.msra.mxu2 %v3214_v45 }
 0x1b3   :  { %1446 = vmatpush.bf16.msra.mxu0 %v3238_v60  ;;  %1485 = vmatpush.bf16.msra.mxu3 %v3250_v3  ;;  %v3190_v60 = vor.u32 %v3961_v52, %v3189_v12  ;;  %v3199_v3 = vld [vmem:[%s6289_s2 + $0x18] sm:$0xf0] }
 0x1b5   :  { %1459 = vmatpush.bf16.msra.mxu1 %v3242_v63  ;;  %v3960_v63 = vld [vmem:[%s6289_s2 + $0xc] sm:$0xf] }
 0x1b6   :  { %v3202_v4 = vor.u32 %v3960_v63, %v3199_v3  ;;  %1475 = vmatpush.bf16.msra.mxu2 %v3198_v2  ;;  %v3413_v3 = vld [vmem:[%s6289_s2 + $0xc0] sm:$0xf] }
 0x1b7   :  { %1447 = vmatpush.bf16.msra.mxu0 %v3222_v13  ;;  %1486 = vmatpush.bf16.msra.mxu3 %v3234_v30 }
 0x1b9   :  { %1460 = vmatpush.bf16.msra.mxu1 %v3226_v22 }
 0x1bb   :  { %1448 = vmatpush.bf16.msra.mxu0 %v3206_v41  ;;  %1487 = vmatpush.bf16.msra.mxu3 %v3218_v17 }
 0x1bd   :  { %1461 = vmatpush.bf16.msra.mxu1 %v3210_v9 }
 0x1bf   :  { %1449 = vmatpush.bf16.msra.mxu0 %v3190_v60  ;;  %1488 = vmatpush.bf16.msra.mxu3 %v3202_v4  ;;  %v3431_v60 = vld [vmem:[%s6289_s2 + $0xf0] sm:$0xf0]  ;;  %v4017_v4 = vld [vmem:[%s6289_s2 + $0xcc] sm:$0xf0] }
 0x1c1   :  { %1462 = vmatpush.bf16.msra.mxu1 %v3194_v61  ;;  %v3437_v61 = vld [vmem:[%s6289_s2 + $0xe8] sm:$0xf] }
 0x1c2   :  { %v3438_v63 = vor.u32 %v4022_v14, %v3437_v61  ;;  %v3365_v61 = vld [vmem:[%s6289_s2 + $0x60] sm:$0xf]  ;;  %v4005_v14 = vld [vmem:[%s6289_s2 + $0x6c] sm:$0xf0] }
 0x1c4   :  { %1743 = vmatpush.bf16.msrb.mxu2 %v3438_v63  ;;  %v3366_v63 = vor.u32 %v4005_v14, %v3365_v61  ;;  %v3325_v14 = vld [vmem:[%s6289_s2 + $0x8] sm:$0xf] }
 0x22a   :  { %v1176_v55 = vpop.f32.mrf.mxu0  ;;  %v1189_v57 = vpop.f32.mrf.mxu1 }
 0x22b   :  { %v1219_v0 = vadd.f32 %v1176_v55, %v4779_v24  ;;  %v1220_v1 = vadd.f32 %v1189_v57, %v4782_v26  ;;  %v4019_v55 = vld [vmem:[%s6289_s2 + $0xe4] sm:$0xf] }
 0x22c   :  { %v3434_v16 = vor.u32 %v4019_v55, %v3431_v60  ;;  %v4008_v55 = vld [vmem:[%s6289_s2 + $0x8c] sm:$0xf] }
 0x22d   :  { %v1223_v5 = vsub.f32 0.0, %v1219_v0  ;;  %v1224_v8 = vsub.f32 0.0, %v1220_v1  ;;  %v4020_v0 = vld [vmem:[%s6289_s2 + $0xec] sm:$0xf]  ;;  %v3439_v1 = vld [vmem:[%s6289_s2 + $0xf8] sm:$0xf0] }
 0x22e   :  { %v3442_v2 = vor.u32 %v4020_v0, %v3439_v1  ;;  %1730 = vmatpush.bf16.msrb.mxu1 %v3434_v16  ;;  %v4003_v16 = vld [vmem:[%s6289_s2 + $0x64] sm:$0xf]  ;;  %v3367_v0 = vld [vmem:[%s6289_s2 + $0x70] sm:$0xf0]  ;;  %v3373_v1 = vld [vmem:[%s6289_s2 + $0x68] sm:$0xf] }
 0x22f   :  { %v1226_v13 = vmul.f32 1.442695, %v1223_v5  ;;  %v1228_v19 = vmul.f32 1.442695, %v1224_v8  ;;  %v4015_v5 = vld [vmem:[%s6289_s2 + $0xc4] sm:$0xf]  ;;  %v3414_v8 = vor.u32 %v4017_v4, %v3413_v3  ;;  %v3370_v3 = vor.u32 %v4003_v16, %v3367_v0 }
 0x230   :  { %1756 = vmatpush.bf16.msrb.mxu3 %v3442_v2  ;;  %v4006_v2 = vld [vmem:[%s6289_s2 + $0x74] sm:$0xf0] }
 0x231   :  { %4153 = vpow2.f32 %v1226_v13  ;;  %v1202_v24 = vpop.f32.mrf.mxu2  ;;  %v1215_v26 = vpop.f32.mrf.mxu3  ;;  %v3415_v13 = vld [vmem:[%s6289_s2 + $0xd0] sm:$0xf0]  ;;  %v3374_v4 = vor.u32 %v4006_v2, %v3373_v1  ;;  %v3994_v16 = vld [vmem:[%s6289_s2 + $0x14] sm:$0xf0] }
 0x232   :  { %4155 = vpow2.f32 %v1228_v19  ;;  %v1221_v15 = vadd.f32 %v1202_v24, %v4785_v28  ;;  %v1178_v21 = vpop.f32.mrf.mxu0  ;;  %v1191_v22 = vpop.f32.mrf.mxu1  ;;  %v1222_v29 = vadd.f32 %v1215_v26, %v4788_v31  ;;  %v3421_v19 = vld [vmem:[%s6289_s2 + $0xc8] sm:$0xf]  ;;  %v4018_v24 = vld [vmem:[%s6289_s2 + $0xd4] sm:$0xf0]  ;;  %v3418_v26 = vor.u32 %v4015_v5, %v3415_v13  ;;  %v4004_v5 = vld [vmem:[%s6289_s2 + $0x6c] sm:$0xf] }
 0x233   :  { %v4016_v21 = vld [vmem:[%s6289_s2 + $0xcc] sm:$0xf]  ;;  %v3423_v22 = vld [vmem:[%s6289_s2 + $0xd8] sm:$0xf0]  ;;  %v3326_v2 = vor.u32 %v3994_v16, %v3325_v14 }
 0x234   :  { %v1225_v25 = vsub.f32 0.0, %v1221_v15  ;;  %v3422_v15 = vor.u32 %v4018_v24, %v3421_v19  ;;  %1731 = vmatpush.bf16.msrb.mxu1 %v3418_v26  ;;  %v3349_v19 = vld [vmem:[%s6289_s2 + $0x40] sm:$0xf]  ;;  %v4001_v24 = vld [vmem:[%s6289_s2 + $0x4c] sm:$0xf0] }
 0x235   :  { %v3999_v26 = vld [vmem:[%s6289_s2 + $0x44] sm:$0xf]  ;;  %v3567_v14 = vld [vmem:[%s6289_s2 + $0xf8] sm:$0xf0] }
 0x236   :  { %v1230_v20 = vmul.f32 1.442695, %v1225_v25  ;;  %v3426_v25 = vor.u32 %v4016_v21, %v3423_v22  ;;  %1744 = vmatpush.bf16.msrb.mxu2 %v3422_v15  ;;  %v3350_v15 = vor.u32 %v4001_v24, %v3349_v19  ;;  %v3351_v21 = vld [vmem:[%s6289_s2 + $0x50] sm:$0xf0]  ;;  %v3357_v22 = vld [vmem:[%s6289_s2 + $0x48] sm:$0xf] }
 0x237   :  { %v4154_v30 = vpop.eup %4153 }
 0x238   :  { %v4156_v33 = vpop.eup %4155  ;;  %v1232_v35 = vadd.f32 1.0, %v4154_v30  ;;  %4157 = vpow2.f32 %v1230_v20  ;;  %v4013_v20 = vld [vmem:[%s6289_s2 + $0xac] sm:$0xf0]  ;;  %v4011_v30 = vld [vmem:[%s6289_s2 + $0xa4] sm:$0xf]  ;;  %1757 = vmatpush.bf16.msrb.mxu3 %v3426_v25 }
 0x239   :  { %v1233_v37 = vadd.f32 1.0, %v4156_v33  ;;  %4159 = vtanh.f32 %v1222_v29  ;;  %v1204_v41 = vpop.f32.mrf.mxu2  ;;  %v1217_v10 = vpop.f32.mrf.mxu3  ;;  %v3397_v29 = vld [vmem:[%s6289_s2 + $0xa0] sm:$0xf]  ;;  %v4002_v25 = vld [vmem:[%s6289_s2 + $0x54] sm:$0xf0] }
 0x23a   :  { %4161 = vrcp.f32 %v1232_v35  ;;  %v3398_v33 = vor.u32 %v4013_v20, %v3397_v29  ;;  %v3399_v35 = vld [vmem:[%s6289_s2 + $0xb0] sm:$0xf0]  ;;  %v4014_v41 = vld [vmem:[%s6289_s2 + $0xb4] sm:$0xf0]  ;;  %v3354_v29 = vor.u32 %v3999_v26, %v3351_v21  ;;  %v3358_v20 = vor.u32 %v4002_v25, %v3357_v22 }
 0x23b   :  { %4163 = vrcp.f32 %v1233_v37  ;;  %v3405_v37 = vld [vmem:[%s6289_s2 + $0xa8] sm:$0xf]  ;;  %v3402_v10 = vor.u32 %v4011_v30, %v3399_v35  ;;  %v4000_v30 = vld [vmem:[%s6289_s2 + $0x4c] sm:$0xf] }
 0x23d   :  { %1732 = vmatpush.bf16.msrb.mxu1 %v3402_v10  ;;  %v3995_v10 = vld [vmem:[%s6289_s2 + $0x24] sm:$0xf] }
 0x23e   :  { %v4158_v18 = vpop.eup %4157 }
 0x23f   :  { %v4160_v56 = vpop.eup %4159  ;;  %v1234_v45 = vadd.f32 1.0, %v4158_v18  ;;  %v3406_v18 = vor.u32 %v4014_v41, %v3405_v37  ;;  %v3333_v37 = vld [vmem:[%s6289_s2 + $0x20] sm:$0xf]  ;;  %v3997_v41 = vld [vmem:[%s6289_s2 + $0x2c] sm:$0xf0] }
 0x240   :  { %v4162_v9 = vpop.eup %4161 }
 0x241   :  { %v4164_v28 = vpop.eup %4163  ;;  %v1240_v46 = vmul.f32 %v4162_v9, %v4160_v56  ;;  %4165 = vrcp.f32 %v1234_v45  ;;  %v4012_v56 = vld [vmem:[%s6289_s2 + $0xac] sm:$0xf]  ;;  %v3407_v9 = vld [vmem:[%s6289_s2 + $0xb8] sm:$0xf0]  ;;  %1745 = vmatpush.bf16.msrb.mxu2 %v3406_v18  ;;  %v3381_v45 = vld [vmem:[%s6289_s2 + $0x80] sm:$0xf]  ;;  %v3334_v18 = vor.u32 %v3997_v41, %v3333_v37 }
 0x242   :  { %v1239_v50 = vmul.f32 %v4164_v28, %v5256_v23  ;;  %v3429_v23 = vld [vmem:[%s6289_s2 + $0xe0] sm:$0xf]  ;;  %v3410_v28 = vor.u32 %v4012_v56, %v3407_v9  ;;  %v3335_v56 = vld [vmem:[%s6289_s2 + $0x30] sm:$0xf0]  ;;  %v3341_v9 = vld [vmem:[%s6289_s2 + $0x28] sm:$0xf] }
 0x243   :  { %v3430_v57 = vor.u32 %v4021_v11, %v3429_v23 }
 0x244   :  { %v5459_v31 = vadd.f32 %v1240_v46, %v1239_v50  ;;  %v4009_v46 = vld [vmem:[%s6289_s2 + $0x8c] sm:$0xf0]  ;;  %v4007_v50 = vld [vmem:[%s6289_s2 + $0x84] sm:$0xf]  ;;  %1758 = vmatpush.bf16.msrb.mxu3 %v3410_v28  ;;  %v3998_v28 = vld [vmem:[%s6289_s2 + $0x34] sm:$0xf0] }
 0x245   :  { %1717 = vmatpush.bf16.msrb.mxu0 %v3430_v57  ;;  %v3391_v57 = vld [vmem:[%s6289_s2 + $0x98] sm:$0xf0] }
 0x246   :  { %4167 = vtanh.f32 %v5459_v31  ;;  %v3394_v60 = vor.u32 %v4008_v55, %v3391_v57 }
 0x247   :  { %v4166_v12 = vpop.eup %4165 }
 0x248   :  { %1759 = vmatpush.bf16.msrb.mxu3 %v3394_v60 }
 0x249   :  { %1718 = vmatpush.bf16.msrb.mxu0 %v3414_v8  ;;  %v3375_v8 = vld [vmem:[%s6289_s2 + $0x78] sm:$0xf0] }
 0x24a   :  { %v3378_v13 = vor.u32 %v4004_v5, %v3375_v8 }
 0x24c   :  { %v4168_v17 = vpop.eup %4167  ;;  %1760 = vmatpush.bf16.msrb.mxu3 %v3378_v13 }
 0x24d   :  { %v1243_v52 = vmul.f32 %v4168_v17, %v4166_v12  ;;  %1719 = vmatpush.bf16.msrb.mxu0 %v3398_v33  ;;  %v3382_v12 = vor.u32 %v4009_v46, %v3381_v45  ;;  %v3383_v17 = vld [vmem:[%s6289_s2 + $0x90] sm:$0xf0]  ;;  %v3359_v33 = vld [vmem:[%s6289_s2 + $0x58] sm:$0xf0]  ;;  %v3338_v45 = vor.u32 %v3995_v10, %v3335_v56  ;;  %v3342_v46 = vor.u32 %v3998_v28, %v3341_v9 }
 0x24e   :  { %v3386_v23 = vor.u32 %v4007_v50, %v3383_v17  ;;  %v3362_v35 = vor.u32 %v4000_v30, %v3359_v33  ;;  %v3996_v50 = vld [vmem:[%s6289_s2 + $0x2c] sm:$0xf]  ;;  %v3317_v17 = vld [vmem:[%s6289_s2] sm:$0xf] }
 0x24f   :  { %v1244_v54 = vpack.c.bf16 %v1243_v52, %v1243_v52  ;;  %v3389_v52 = vld [vmem:[%s6289_s2 + $0x88] sm:$0xf] }
 0x250   :  { %1733 = vmatpush.bf16.msrb.mxu1 %v3386_v23  ;;  %1761 = vmatpush.bf16.msrb.mxu3 %v3362_v35  ;;  %v3991_v23 = vld [vmem:[%s6289_s2 + $0x4] sm:$0xf] }
 0x251   :  { %1245 = vst [vmem:[%s6293_s6 + $0x8] sm:$0xf] %v1244_v54  ;;  %1450 = vmatmul.bf16.vlgmr.msra.gmra.mxu0 %v1244_v54  ;;  %1463 = vmatmul.bf16.vlgmr.msra.gmra.mxu1 %v1244_v54 }
 0x252   :  { %1476 = vmatmul.bf16.vlgmr.msra.gmra.mxu2 %v1244_v54  ;;  %1489 = vmatmul.bf16.vlgmr.msra.gmra.mxu3 %v1244_v54  ;;  %v4010_v54 = vld [vmem:[%s6289_s2 + $0x94] sm:$0xf0] }
 0x253   :  { %v3390_v11 = vor.u32 %v4010_v54, %v3389_v52  ;;  %1720 = vmatpush.bf16.msrb.mxu0 %v3382_v12  ;;  %v3343_v12 = vld [vmem:[%s6289_s2 + $0x38] sm:$0xf0]  ;;  %v3993_v54 = vld [vmem:[%s6289_s2 + $0xc] sm:$0xf0] }
 0x254   :  { %1734 = vmatpush.bf16.msrb.mxu1 %v3370_v3  ;;  %v3346_v52 = vor.u32 %v3996_v50, %v3343_v12  ;;  %v3318_v60 = vor.u32 %v3993_v54, %v3317_v17  ;;  %v3327_v3 = vld [vmem:[%s6289_s2 + $0x18] sm:$0xf0]  ;;  %v4053_v17 = vld [vmem:[%s6289_s2 + $0xec] sm:$0xf0] }
 0x255   :  { %1746 = vmatpush.bf16.msrb.mxu2 %v3390_v11  ;;  %v3319_v11 = vld [vmem:[%s6289_s2 + $0x10] sm:$0xf0] }
 0x256   :  { %v3322_v61 = vor.u32 %v3991_v23, %v3319_v11  ;;  %1762 = vmatpush.bf16.msrb.mxu3 %v3346_v52  ;;  %v4051_v52 = vld [vmem:[%s6289_s2 + $0xe4] sm:$0xf]  ;;  %v3559_v23 = vld [vmem:[%s6289_s2 + $0xf0] sm:$0xf0]  ;;  %v3565_v11 = vld [vmem:[%s6289_s2 + $0xe8] sm:$0xf] }
 0x257   :  { %1721 = vmatpush.bf16.msrb.mxu0 %v3366_v63  ;;  %v3992_v63 = vld [vmem:[%s6289_s2 + $0xc] sm:$0xf] }
 0x258   :  { %1735 = vmatpush.bf16.msrb.mxu1 %v3354_v29 }
 0x259   :  { %1747 = vmatpush.bf16.msrb.mxu2 %v3374_v4  ;;  %v3330_v4 = vor.u32 %v3992_v63, %v3327_v3  ;;  %v3541_v63 = vld [vmem:[%s6289_s2 + $0xc0] sm:$0xf]  ;;  %v3543_v3 = vld [vmem:[%s6289_s2 + $0xd0] sm:$0xf0] }
 0x25b   :  { %1722 = vmatpush.bf16.msrb.mxu0 %v3350_v15  ;;  %1763 = vmatpush.bf16.msrb.mxu3 %v3330_v4  ;;  %v3549_v4 = vld [vmem:[%s6289_s2 + $0xc8] sm:$0xf] }
 0x25c   :  { %1736 = vmatpush.bf16.msrb.mxu1 %v3338_v45 }
 0x25d   :  { %1748 = vmatpush.bf16.msrb.mxu2 %v3358_v20 }
 0x25f   :  { %1723 = vmatpush.bf16.msrb.mxu0 %v3334_v18 }
 0x260   :  { %1737 = vmatpush.bf16.msrb.mxu1 %v3322_v61  ;;  %v4052_v61 = vld [vmem:[%s6289_s2 + $0xec] sm:$0xf] }
 0x261   :  { %1749 = vmatpush.bf16.msrb.mxu2 %v3342_v46  ;;  %v3570_v16 = vor.u32 %v4052_v61, %v3567_v14  ;;  %v4036_v14 = vld [vmem:[%s6289_s2 + $0x6c] sm:$0xf] }
 0x263   :  { %1724 = vmatpush.bf16.msrb.mxu0 %v3318_v60  ;;  %2031 = vmatpush.bf16.msra.mxu3 %v3570_v16  ;;  %v3503_v16 = vld [vmem:[%s6289_s2 + $0x78] sm:$0xf0] }
 0x265   :  { %1750 = vmatpush.bf16.msrb.mxu2 %v3326_v2 }
 0x2ce   :  { %v1451_v55 = vpop.f32.mrf.mxu0  ;;  %v1464_v57 = vpop.f32.mrf.mxu1 }
 0x2cf   :  { %v1494_v0 = vadd.f32 %v1451_v55, %v4791_v32  ;;  %v1495_v1 = vadd.f32 %v1464_v57, %v4794_v34  ;;  %v4054_v55 = vld [vmem:[%s6289_s2 + $0xf4] sm:$0xf0]  ;;  %v3562_v57 = vor.u32 %v4051_v52, %v3559_v23  ;;  %v4037_v52 = vld [vmem:[%s6289_s2 + $0x6c] sm:$0xf0] }
 0x2d0   :  { %v3566_v60 = vor.u32 %v4054_v55, %v3565_v11  ;;  %v3495_v11 = vld [vmem:[%s6289_s2 + $0x70] sm:$0xf0]  ;;  %v3501_v55 = vld [vmem:[%s6289_s2 + $0x68] sm:$0xf] }
 0x2d1   :  { %v1498_v5 = vsub.f32 0.0, %v1494_v0  ;;  %v1499_v8 = vsub.f32 0.0, %v1495_v1  ;;  %2005 = vmatpush.bf16.msra.mxu1 %v3562_v57  ;;  %v4049_v0 = vld [vmem:[%s6289_s2 + $0xcc] sm:$0xf0]  ;;  %v4047_v1 = vld [vmem:[%s6289_s2 + $0xc4] sm:$0xf] }
 0x2d2   :  { %2018 = vmatpush.bf16.msra.mxu2 %v3566_v60  ;;  %v3542_v2 = vor.u32 %v4049_v0, %v3541_v63  ;;  %v4038_v57 = vld [vmem:[%s6289_s2 + $0x74] sm:$0xf0]  ;;  %v3506_v63 = vor.u32 %v4036_v14, %v3503_v16  ;;  %v3477_v0 = vld [vmem:[%s6289_s2 + $0x40] sm:$0xf] }
 0x2d3   :  { %v1501_v13 = vmul.f32 1.442695, %v1498_v5  ;;  %v1503_v19 = vmul.f32 1.442695, %v1499_v8  ;;  %v4050_v5 = vld [vmem:[%s6289_s2 + $0xd4] sm:$0xf0]  ;;  %v3546_v8 = vor.u32 %v4047_v1, %v3543_v3  ;;  %v3502_v61 = vor.u32 %v4038_v57, %v3501_v55 }
 0x2d4   :  { %v4033_v1 = vld [vmem:[%s6289_s2 + $0x4c] sm:$0xf0] }
 0x2d5   :  { %4169 = vpow2.f32 %v1501_v13  ;;  %v1477_v32 = vpop.f32.mrf.mxu2  ;;  %v1490_v34 = vpop.f32.mrf.mxu3  ;;  %v3550_v13 = vor.u32 %v4050_v5, %v3549_v4  ;;  %2006 = vmatpush.bf16.msra.mxu1 %v3546_v8  ;;  %v3478_v3 = vor.u32 %v4033_v1, %v3477_v0  ;;  %v3479_v4 = vld [vmem:[%s6289_s2 + $0x50] sm:$0xf0]  ;;  %v3485_v5 = vld [vmem:[%s6289_s2 + $0x48] sm:$0xf]  ;;  %v4034_v8 = vld [vmem:[%s6289_s2 + $0x54] sm:$0xf0] }
 0x2d6   :  { %4171 = vpow2.f32 %v1503_v19  ;;  %v1496_v24 = vadd.f32 %v1477_v32, %v4797_v36  ;;  %v1453_v26 = vpop.f32.mrf.mxu0  ;;  %v1466_v15 = vpop.f32.mrf.mxu1  ;;  %v1497_v22 = vadd.f32 %v1490_v34, %v4800_v39  ;;  %v4048_v19 = vld [vmem:[%s6289_s2 + $0xcc] sm:$0xf]  ;;  %v3551_v32 = vld [vmem:[%s6289_s2 + $0xd8] sm:$0xf0] }
 0x2d7   :  { %v3554_v34 = vor.u32 %v4048_v19, %v3551_v32  ;;  %2019 = vmatpush.bf16.msra.mxu2 %v3550_v13  ;;  %v4045_v26 = vld [vmem:[%s6289_s2 + $0xac] sm:$0xf0]  ;;  %v4043_v15 = vld [vmem:[%s6289_s2 + $0xa4] sm:$0xf]  ;;  %v3486_v19 = vor.u32 %v4034_v8, %v3485_v5  ;;  %v4032_v32 = vld [vmem:[%s6289_s2 + $0x4c] sm:$0xf] }
 0x2d8   :  { %v1500_v21 = vsub.f32 0.0, %v1496_v24  ;;  %v3525_v24 = vld [vmem:[%s6289_s2 + $0xa0] sm:$0xf] }
 0x2d9   :  { %2032 = vmatpush.bf16.msra.mxu3 %v3554_v34  ;;  %v3487_v34 = vld [vmem:[%s6289_s2 + $0x58] sm:$0xf0] }
 0x2da   :  { %v1505_v25 = vmul.f32 1.442695, %v1500_v21  ;;  %v3526_v21 = vor.u32 %v4045_v26, %v3525_v24  ;;  %v3490_v24 = vor.u32 %v4032_v32, %v3487_v34  ;;  %v3461_v26 = vld [vmem:[%s6289_s2 + $0x20] sm:$0xf] }
 0x2db   :  { %v4170_v29 = vpop.eup %4169 }
 0x2dc   :  { %v4172_v20 = vpop.eup %4171  ;;  %v1507_v30 = vadd.f32 1.0, %v4170_v29  ;;  %4173 = vpow2.f32 %v1505_v25  ;;  %v3533_v25 = vld [vmem:[%s6289_s2 + $0xa8] sm:$0xf]  ;;  %v4046_v29 = vld [vmem:[%s6289_s2 + $0xb4] sm:$0xf0] }
 0x2dd   :  { %v1508_v33 = vadd.f32 1.0, %v4172_v20  ;;  %4175 = vtanh.f32 %v1497_v22  ;;  %v1479_v35 = vpop.f32.mrf.mxu2  ;;  %v1492_v37 = vpop.f32.mrf.mxu3  ;;  %v3527_v22 = vld [vmem:[%s6289_s2 + $0xb0] sm:$0xf0] }
 0x2de   :  { %4177 = vrcp.f32 %v1507_v30  ;;  %v3530_v20 = vor.u32 %v4043_v15, %v3527_v22  ;;  %v3534_v30 = vor.u32 %v4046_v29, %v3533_v25  ;;  %v3535_v35 = vld [vmem:[%s6289_s2 + $0xb8] sm:$0xf0]  ;;  %v4029_v15 = vld [vmem:[%s6289_s2 + $0x2c] sm:$0xf0]  ;;  %v3463_v25 = vld [vmem:[%s6289_s2 + $0x30] sm:$0xf0] }
 0x2df   :  { %4179 = vrcp.f32 %v1508_v33  ;;  %v4044_v33 = vld [vmem:[%s6289_s2 + $0xac] sm:$0xf]  ;;  %v3462_v22 = vor.u32 %v4029_v15, %v3461_v26  ;;  %v3469_v29 = vld [vmem:[%s6289_s2 + $0x28] sm:$0xf] }
 0x2e0   :  { %v3538_v37 = vor.u32 %v4044_v33, %v3535_v35  ;;  %2007 = vmatpush.bf16.msra.mxu1 %v3530_v20  ;;  %2020 = vmatpush.bf16.msra.mxu2 %v3534_v30  ;;  %v4030_v20 = vld [vmem:[%s6289_s2 + $0x34] sm:$0xf0]  ;;  %v4028_v35 = vld [vmem:[%s6289_s2 + $0x2c] sm:$0xf] }
 0x2e1   :  { %v3470_v33 = vor.u32 %v4030_v20, %v3469_v29 }
 0x2e2   :  { %v4174_v41 = vpop.eup %4173  ;;  %2033 = vmatpush.bf16.msra.mxu3 %v3538_v37  ;;  %v3471_v37 = vld [vmem:[%s6289_s2 + $0x38] sm:$0xf0] }
 0x2e3   :  { %v4176_v10 = vpop.eup %4175  ;;  %v1509_v56 = vadd.f32 1.0, %v4174_v41  ;;  %v3509_v41 = vld [vmem:[%s6289_s2 + $0x80] sm:$0xf] }
 0x2e4   :  { %v4178_v18 = vpop.eup %4177 }
 0x2e5   :  { %v4180_v36 = vpop.eup %4179  ;;  %v1515_v9 = vmul.f32 %v4178_v18, %v4176_v10  ;;  %4181 = vrcp.f32 %v1509_v56  ;;  %v4041_v10 = vld [vmem:[%s6289_s2 + $0x8c] sm:$0xf0]  ;;  %v4039_v18 = vld [vmem:[%s6289_s2 + $0x84] sm:$0xf]  ;;  %v3511_v56 = vld [vmem:[%s6289_s2 + $0x90] sm:$0xf0] }
 0x2e6   :  { %v1514_v28 = vmul.f32 %v4180_v36, %v5459_v31  ;;  %v3557_v31 = vld [vmem:[%s6289_s2 + $0xe0] sm:$0xf]  ;;  %v3510_v36 = vor.u32 %v4041_v10, %v3509_v41  ;;  %v3474_v10 = vor.u32 %v4028_v35, %v3471_v37  ;;  %v3687_v37 = vld [vmem:[%s6289_s2 + $0xf0] sm:$0xf0] }
 0x2e7   :  { %v3558_v54 = vor.u32 %v4053_v17, %v3557_v31  ;;  %v3493_v17 = vld [vmem:[%s6289_s2 + $0x60] sm:$0xf] }
 0x2e8   :  { %v5662_v39 = vadd.f32 %v1515_v9, %v1514_v28  ;;  %v3517_v9 = vld [vmem:[%s6289_s2 + $0x88] sm:$0xf]  ;;  %v4042_v28 = vld [vmem:[%s6289_s2 + $0x94] sm:$0xf0]  ;;  %v3494_v23 = vor.u32 %v4037_v52, %v3493_v17  ;;  %v3445_v41 = vld [vmem:[%s6289_s2] sm:$0xf] }
 0x2e9   :  { %1992 = vmatpush.bf16.msra.mxu0 %v3558_v54  ;;  %v4035_v54 = vld [vmem:[%s6289_s2 + $0x64] sm:$0xf] }
 0x2ea   :  { %4183 = vtanh.f32 %v5662_v39  ;;  %v3498_v60 = vor.u32 %v4035_v54, %v3495_v11 }
 0x2eb   :  { %v4182_v45 = vpop.eup %4181 }
 0x2ed   :  { %1993 = vmatpush.bf16.msra.mxu0 %v3542_v2  ;;  %v4031_v2 = vld [vmem:[%s6289_s2 + $0x44] sm:$0xf] }
 0x2ee   :  { %v3482_v13 = vor.u32 %v4031_v2, %v3479_v4 }
 0x2f0   :  { %v4184_v46 = vpop.eup %4183 }
 0x2f1   :  { %v1518_v50 = vmul.f32 %v4184_v46, %v4182_v45  ;;  %1994 = vmatpush.bf16.msra.mxu0 %v3526_v21  ;;  %v3514_v45 = vor.u32 %v4039_v18, %v3511_v56  ;;  %v3518_v46 = vor.u32 %v4042_v28, %v3517_v9  ;;  %v4027_v21 = vld [vmem:[%s6289_s2 + $0x24] sm:$0xf]  ;;  %v4025_v18 = vld [vmem:[%s6289_s2 + $0xc] sm:$0xf0]  ;;  %v3447_v56 = vld [vmem:[%s6289_s2 + $0x10] sm:$0xf0] }
 0x2f2   :  { %v3466_v30 = vor.u32 %v4027_v21, %v3463_v25 }
 0x2f3   :  { %v1519_v12 = vpack.c.bf16 %v1518_v50, %v1518_v50  ;;  %v4040_v50 = vld [vmem:[%s6289_s2 + $0x8c] sm:$0xf]  ;;  %2008 = vmatpush.bf16.msra.mxu1 %v3514_v45  ;;  %2021 = vmatpush.bf16.msra.mxu2 %v3518_v46  ;;  %v3446_v45 = vor.u32 %v4025_v18, %v3445_v41  ;;  %v3693_v41 = vld [vmem:[%s6289_s2 + $0xe8] sm:$0xf] }
 0x2f5   :  { %1520 = vst [vmem:[%s6293_s6 + $0xc] sm:$0xf] %v1519_v12  ;;  %1725 = vmatmul.bf16.vlgmr.msrb.gmra.mxu0 %v1519_v12  ;;  %1738 = vmatmul.bf16.vlgmr.msrb.gmra.mxu1 %v1519_v12 }
 0x2f6   :  { %1751 = vmatmul.bf16.vlgmr.msrb.gmra.mxu2 %v1519_v12  ;;  %1764 = vmatmul.bf16.vlgmr.msrb.gmra.mxu3 %v1519_v12  ;;  %v3519_v12 = vld [vmem:[%s6289_s2 + $0x98] sm:$0xf0] }
 0x2f7   :  { %1995 = vmatpush.bf16.msra.mxu0 %v3510_v36  ;;  %v3522_v31 = vor.u32 %v4040_v50, %v3519_v12  ;;  %2009 = vmatpush.bf16.msra.mxu1 %v3498_v60  ;;  %v4023_v36 = vld [vmem:[%s6289_s2 + $0x4] sm:$0xf]  ;;  %v3453_v50 = vld [vmem:[%s6289_s2 + $0x8] sm:$0xf]  ;;  %v4026_v12 = vld [vmem:[%s6289_s2 + $0x14] sm:$0xf0] }
 0x2f8   :  { %2022 = vmatpush.bf16.msra.mxu2 %v3502_v61  ;;  %v3450_v46 = vor.u32 %v4023_v36, %v3447_v56  ;;  %v3454_v54 = vor.u32 %v4026_v12, %v3453_v50  ;;  %v4084_v56 = vld [vmem:[%s6289_s2 + $0xec] sm:$0xf]  ;;  %v4079_v50 = vld [vmem:[%s6289_s2 + $0xc4] sm:$0xf] }
 0x2f9   :  { %2034 = vmatpush.bf16.msra.mxu3 %v3522_v31  ;;  %v4024_v31 = vld [vmem:[%s6289_s2 + $0xc] sm:$0xf] }
 0x2fb   :  { %1996 = vmatpush.bf16.msra.mxu0 %v3494_v23  ;;  %2010 = vmatpush.bf16.msra.mxu1 %v3482_v13  ;;  %v3455_v23 = vld [vmem:[%s6289_s2 + $0x18] sm:$0xf0] }
 0x2fc   :  { %2023 = vmatpush.bf16.msra.mxu2 %v3486_v19  ;;  %v3458_v11 = vor.u32 %v4024_v31, %v3455_v23  ;;  %v3671_v31 = vld [vmem:[%s6289_s2 + $0xd0] sm:$0xf0] }
 0x2fd   :  { %2035 = vmatpush.bf16.msra.mxu3 %v3506_v63 }
 0x2ff   :  { %1997 = vmatpush.bf16.msra.mxu0 %v3478_v3  ;;  %2011 = vmatpush.bf16.msra.mxu1 %v3466_v30  ;;  %v4085_v30 = vld [vmem:[%s6289_s2 + $0xec] sm:$0xf0] }
 0x300   :  { %2024 = vmatpush.bf16.msra.mxu2 %v3470_v33  ;;  %v4083_v33 = vld [vmem:[%s6289_s2 + $0xe4] sm:$0xf] }
 0x301   :  { %2036 = vmatpush.bf16.msra.mxu3 %v3490_v24  ;;  %v3690_v18 = vor.u32 %v4083_v33, %v3687_v37  ;;  %v3629_v33 = vld [vmem:[%s6289_s2 + $0x68] sm:$0xf] }
 0x303   :  { %1998 = vmatpush.bf16.msra.mxu0 %v3462_v22  ;;  %2012 = vmatpush.bf16.msra.mxu1 %v3450_v46  ;;  %v4081_v46 = vld [vmem:[%s6289_s2 + $0xcc] sm:$0xf0] }
 0x304   :  { %2025 = vmatpush.bf16.msra.mxu2 %v3454_v54  ;;  %v3674_v54 = vor.u32 %v4079_v50, %v3671_v31  ;;  %v3613_v50 = vld [vmem:[%s6289_s2 + $0x48] sm:$0xf] }
 0x305   :  { %2037 = vmatpush.bf16.msra.mxu3 %v3474_v10  ;;  %v4086_v10 = vld [vmem:[%s6289_s2 + $0xf4] sm:$0xf0] }
 0x306   :  { %v3694_v36 = vor.u32 %v4086_v10, %v3693_v41  ;;  %v4068_v10 = vld [vmem:[%s6289_s2 + $0x6c] sm:$0xf] }
 0x307   :  { %1999 = vmatpush.bf16.msra.mxu0 %v3446_v45  ;;  %2280 = vmatpush.bf16.msrb.mxu1 %v3690_v18  ;;  %v3669_v45 = vld [vmem:[%s6289_s2 + $0xc0] sm:$0xf]  ;;  %v3631_v18 = vld [vmem:[%s6289_s2 + $0x78] sm:$0xf0] }
 0x308   :  { %2293 = vmatpush.bf16.msrb.mxu2 %v3694_v36  ;;  %v3670_v12 = vor.u32 %v4081_v46, %v3669_v45  ;;  %v3634_v36 = vor.u32 %v4068_v10, %v3631_v18  ;;  %v3607_v46 = vld [vmem:[%s6289_s2 + $0x50] sm:$0xf0] }
 0x309   :  { %2038 = vmatpush.bf16.msra.mxu3 %v3458_v11  ;;  %v4080_v11 = vld [vmem:[%s6289_s2 + $0xcc] sm:$0xf] }
 0x30b   :  { %2281 = vmatpush.bf16.msrb.mxu1 %v3674_v54  ;;  %v3615_v54 = vld [vmem:[%s6289_s2 + $0x58] sm:$0xf0] }
 0x372   :  { %v1726_v9 = vpop.f32.mrf.mxu0  ;;  %v1739_v28 = vpop.f32.mrf.mxu1 }
 0x373   :  { %v1769_v17 = vadd.f32 %v1726_v9, %v4803_v40  ;;  %v1770_v52 = vadd.f32 %v1739_v28, %v4806_v42  ;;  %v3695_v9 = vld [vmem:[%s6289_s2 + $0xf8] sm:$0xf0] }
 0x374   :  { %v3698_v28 = vor.u32 %v4084_v56, %v3695_v9  ;;  %v3605_v56 = vld [vmem:[%s6289_s2 + $0x40] sm:$0xf]  ;;  %v4065_v9 = vld [vmem:[%s6289_s2 + $0x4c] sm:$0xf0] }
 0x375   :  { %v1773_v55 = vsub.f32 0.0, %v1769_v17  ;;  %v1774_v57 = vsub.f32 0.0, %v1770_v52  ;;  %v3677_v17 = vld [vmem:[%s6289_s2 + $0xc8] sm:$0xf]  ;;  %v4082_v52 = vld [vmem:[%s6289_s2 + $0xd4] sm:$0xf0]  ;;  %v3606_v45 = vor.u32 %v4065_v9, %v3605_v56 }
 0x376   :  { %2306 = vmatpush.bf16.msrb.mxu3 %v3698_v28  ;;  %v3678_v23 = vor.u32 %v4082_v52, %v3677_v17  ;;  %v4063_v28 = vld [vmem:[%s6289_s2 + $0x44] sm:$0xf]  ;;  %v4064_v52 = vld [vmem:[%s6289_s2 + $0x4c] sm:$0xf] }
 0x377   :  { %v1776_v60 = vmul.f32 1.442695, %v1773_v55  ;;  %v1778_v61 = vmul.f32 1.442695, %v1774_v57  ;;  %v3679_v55 = vld [vmem:[%s6289_s2 + $0xd8] sm:$0xf0]  ;;  %v3610_v31 = vor.u32 %v4063_v28, %v3607_v46 }
 0x378   :  { %v3682_v57 = vor.u32 %v4080_v11, %v3679_v55  ;;  %2294 = vmatpush.bf16.msrb.mxu2 %v3678_v23  ;;  %v3618_v23 = vor.u32 %v4064_v52, %v3615_v54  ;;  %v3589_v11 = vld [vmem:[%s6289_s2 + $0x20] sm:$0xf]  ;;  %v4061_v55 = vld [vmem:[%s6289_s2 + $0x2c] sm:$0xf0] }
 0x379   :  { %4185 = vpow2.f32 %v1776_v60  ;;  %v1752_v40 = vpop.f32.mrf.mxu2  ;;  %v1765_v42 = vpop.f32.mrf.mxu3  ;;  %v3653_v60 = vld [vmem:[%s6289_s2 + $0xa0] sm:$0xf] }
 0x37a   :  { %4187 = vpow2.f32 %v1778_v61  ;;  %v1771_v14 = vadd.f32 %v1752_v40, %v4827_v51  ;;  %v1728_v16 = vpop.f32.mrf.mxu0  ;;  %v1741_v63 = vpop.f32.mrf.mxu1  ;;  %v1772_v1 = vadd.f32 %v1765_v42, %v4836_v58  ;;  %v4077_v61 = vld [vmem:[%s6289_s2 + $0xac] sm:$0xf0]  ;;  %v4075_v40 = vld [vmem:[%s6289_s2 + $0xa4] sm:$0xf]  ;;  %2307 = vmatpush.bf16.msrb.mxu3 %v3682_v57 }
 0x37b   :  { %v3654_v42 = vor.u32 %v4077_v61, %v3653_v60  ;;  %v3661_v16 = vld [vmem:[%s6289_s2 + $0xa8] sm:$0xf]  ;;  %v4078_v63 = vld [vmem:[%s6289_s2 + $0xb4] sm:$0xf0]  ;;  %v4059_v57 = vld [vmem:[%s6289_s2 + $0x24] sm:$0xf]  ;;  %v3590_v60 = vor.u32 %v4061_v55, %v3589_v11 }
 0x37c   :  { %v1775_v0 = vsub.f32 0.0, %v1771_v14  ;;  %v3655_v14 = vld [vmem:[%s6289_s2 + $0xb0] sm:$0xf0] }
 0x37d   :  { %v3591_v61 = vld [vmem:[%s6289_s2 + $0x30] sm:$0xf0] }
 0x37e   :  { %v1780_v2 = vmul.f32 1.442695, %v1775_v0  ;;  %v3658_v0 = vor.u32 %v4075_v40, %v3655_v14  ;;  %v3597_v40 = vld [vmem:[%s6289_s2 + $0x28] sm:$0xf]  ;;  %v3594_v14 = vor.u32 %v4059_v57, %v3591_v61  ;;  %v4115_v61 = vld [vmem:[%s6289_s2 + $0xe4] sm:$0xf] }
 0x37f   :  { %v4186_v3 = vpop.eup %4185 }
 0x380   :  { %v4188_v4 = vpop.eup %4187  ;;  %v1782_v5 = vadd.f32 1.0, %v4186_v3  ;;  %4189 = vpow2.f32 %v1780_v2  ;;  %v4076_v2 = vld [vmem:[%s6289_s2 + $0xac] sm:$0xf]  ;;  %v3663_v3 = vld [vmem:[%s6289_s2 + $0xb8] sm:$0xf0]  ;;  %2282 = vmatpush.bf16.msrb.mxu1 %v3658_v0 }
 0x381   :  { %v1783_v8 = vadd.f32 1.0, %v4188_v4  ;;  %4191 = vtanh.f32 %v1772_v1  ;;  %v1754_v13 = vpop.f32.mrf.mxu2  ;;  %v1767_v19 = vpop.f32.mrf.mxu3  ;;  %v3662_v1 = vor.u32 %v4078_v63, %v3661_v16  ;;  %v3666_v4 = vor.u32 %v4076_v2, %v3663_v3  ;;  %v4060_v63 = vld [vmem:[%s6289_s2 + $0x2c] sm:$0xf]  ;;  %v3599_v0 = vld [vmem:[%s6289_s2 + $0x38] sm:$0xf0] }
 0x382   :  { %4193 = vrcp.f32 %v1782_v5  ;;  %v3637_v5 = vld [vmem:[%s6289_s2 + $0x80] sm:$0xf]  ;;  %v4071_v13 = vld [vmem:[%s6289_s2 + $0x84] sm:$0xf]  ;;  %v3602_v2 = vor.u32 %v4060_v63, %v3599_v0  ;;  %v4057_v3 = vld [vmem:[%s6289_s2 + $0xc] sm:$0xf0] }
 0x383   :  { %4195 = vrcp.f32 %v1783_v8  ;;  %2295 = vmatpush.bf16.msrb.mxu2 %v3662_v1  ;;  %v4073_v8 = vld [vmem:[%s6289_s2 + $0x8c] sm:$0xf0]  ;;  %2308 = vmatpush.bf16.msrb.mxu3 %v3666_v4  ;;  %v3573_v1 = vld [vmem:[%s6289_s2] sm:$0xf]  ;;  %v4055_v4 = vld [vmem:[%s6289_s2 + $0x4] sm:$0xf] }
 0x384   :  { %v3638_v19 = vor.u32 %v4073_v8, %v3637_v5  ;;  %v3575_v5 = vld [vmem:[%s6289_s2 + $0x10] sm:$0xf0] }
 0x386   :  { %v4190_v32 = vpop.eup %4189 }
 0x387   :  { %v4192_v34 = vpop.eup %4191  ;;  %v1784_v26 = vadd.f32 1.0, %v4190_v32  ;;  %v3639_v32 = vld [vmem:[%s6289_s2 + $0x90] sm:$0xf0] }
 0x388   :  { %v4194_v24 = vpop.eup %4193 }
 0x389   :  { %v4196_v51 = vpop.eup %4195  ;;  %v1790_v15 = vmul.f32 %v4194_v24, %v4192_v34  ;;  %4197 = vrcp.f32 %v1784_v26  ;;  %v3645_v34 = vld [vmem:[%s6289_s2 + $0x88] sm:$0xf]  ;;  %v4074_v24 = vld [vmem:[%s6289_s2 + $0x94] sm:$0xf0] }
 0x38a   :  { %v1789_v21 = vmul.f32 %v4196_v51, %v5662_v39  ;;  %v3685_v39 = vld [vmem:[%s6289_s2 + $0xe0] sm:$0xf]  ;;  %v3642_v51 = vor.u32 %v4071_v13, %v3639_v32  ;;  %v3646_v26 = vor.u32 %v4074_v24, %v3645_v34  ;;  %v3578_v32 = vor.u32 %v4055_v4, %v3575_v5  ;;  %v3581_v34 = vld [vmem:[%s6289_s2 + $0x8] sm:$0xf]  ;;  %v4058_v24 = vld [vmem:[%s6289_s2 + $0x14] sm:$0xf0] }
 0x38b   :  { %v3686_v35 = vor.u32 %v4085_v30, %v3685_v39  ;;  %v3623_v30 = vld [vmem:[%s6289_s2 + $0x70] sm:$0xf0]  ;;  %v3797_v4 = vld [vmem:[%s6289_s2 + $0xc0] sm:$0xf]  ;;  %v4113_v5 = vld [vmem:[%s6289_s2 + $0xcc] sm:$0xf0] }
 0x38c   :  { %v5865_v58 = vadd.f32 %v1790_v15, %v1789_v21  ;;  %v4072_v15 = vld [vmem:[%s6289_s2 + $0x8c] sm:$0xf]  ;;  %v3647_v21 = vld [vmem:[%s6289_s2 + $0x98] sm:$0xf0]  ;;  %2283 = vmatpush.bf16.msrb.mxu1 %v3642_v51  ;;  %2296 = vmatpush.bf16.msrb.mxu2 %v3646_v26 }
 0x38d   :  { %2267 = vmatpush.bf16.msrb.mxu0 %v3686_v35  ;;  %v4070_v35 = vld [vmem:[%s6289_s2 + $0x74] sm:$0xf0]  ;;  %v4056_v51 = vld [vmem:[%s6289_s2 + $0xc] sm:$0xf] }
 0x38e   :  { %4199 = vtanh.f32 %v5865_v58  ;;  %v3630_v41 = vor.u32 %v4070_v35, %v3629_v33 }
 0x38f   :  { %v4198_v22 = vpop.eup %4197 }
 0x390   :  { %2297 = vmatpush.bf16.msrb.mxu2 %v3630_v41 }
 0x391   :  { %2268 = vmatpush.bf16.msrb.mxu0 %v3670_v12  ;;  %v4066_v12 = vld [vmem:[%s6289_s2 + $0x54] sm:$0xf0] }
 0x392   :  { %v3614_v17 = vor.u32 %v4066_v12, %v3613_v50 }
 0x394   :  { %v4200_v25 = vpop.eup %4199  ;;  %2298 = vmatpush.bf16.msrb.mxu2 %v3614_v17 }
 0x395   :  { %v1793_v29 = vmul.f32 %v4200_v25, %v4198_v22  ;;  %2269 = vmatpush.bf16.msrb.mxu0 %v3654_v42  ;;  %v3650_v22 = vor.u32 %v4072_v15, %v3647_v21  ;;  %v3621_v25 = vld [vmem:[%s6289_s2 + $0x60] sm:$0xf]  ;;  %v4062_v42 = vld [vmem:[%s6289_s2 + $0x34] sm:$0xf0]  ;;  %v3582_v21 = vor.u32 %v4058_v24, %v3581_v34 }
 0x396   :  { %v3598_v16 = vor.u32 %v4062_v42, %v3597_v40  ;;  %v3815_v42 = vld [vmem:[%s6289_s2 + $0xf0] sm:$0xf0]  ;;  %v4114_v34 = vld [vmem:[%s6289_s2 + $0xd4] sm:$0xf0] }
 0x397   :  { %v1794_v20 = vpack.c.bf16 %v1793_v29, %v1793_v29  ;;  %v4069_v29 = vld [vmem:[%s6289_s2 + $0x6c] sm:$0xf0]  ;;  %2309 = vmatpush.bf16.msrb.mxu3 %v3650_v22  ;;  %v3583_v22 = vld [vmem:[%s6289_s2 + $0x18] sm:$0xf0]  ;;  %v3818_v63 = vor.u32 %v4115_v61, %v3815_v42  ;;  %v4100_v61 = vld [vmem:[%s6289_s2 + $0x6c] sm:$0xf] }
 0x398   :  { %v3622_v39 = vor.u32 %v4069_v29, %v3621_v25  ;;  %2299 = vmatpush.bf16.msrb.mxu2 %v3598_v16  ;;  %v3586_v25 = vor.u32 %v4056_v51, %v3583_v22  ;;  %v4118_v16 = vld [vmem:[%s6289_s2 + $0xf4] sm:$0xf0]  ;;  %v3781_v22 = vld [vmem:[%s6289_s2 + $0xa0] sm:$0xf] }
 0x399   :  { %1795 = vst [vmem:[%s6293_s6 + $0x10] sm:$0xf] %v1794_v20  ;;  %2000 = vmatmul.bf16.vlgmr.msra.gmra.mxu0 %v1794_v20  ;;  %2013 = vmatmul.bf16.vlgmr.msra.gmra.mxu1 %v1794_v20 }
 0x39a   :  { %2026 = vmatmul.bf16.vlgmr.msra.gmra.mxu2 %v1794_v20  ;;  %2039 = vmatmul.bf16.vlgmr.msra.gmra.mxu3 %v1794_v20  ;;  %v4067_v20 = vld [vmem:[%s6289_s2 + $0x64] sm:$0xf] }
 0x39b   :  { %2270 = vmatpush.bf16.msrb.mxu0 %v3638_v19  ;;  %v3626_v37 = vor.u32 %v4067_v20, %v3623_v30  ;;  %2310 = vmatpush.bf16.msrb.mxu3 %v3634_v36  ;;  %v3574_v19 = vor.u32 %v4057_v3, %v3573_v1  ;;  %v4116_v1 = vld [vmem:[%s6289_s2 + $0xec] sm:$0xf] }
 0x39c   :  { %2300 = vmatpush.bf16.msrb.mxu2 %v3582_v21 }
 0x39d   :  { %2284 = vmatpush.bf16.msrb.mxu1 %v3626_v37 }
 0x39f   :  { %2271 = vmatpush.bf16.msrb.mxu0 %v3622_v39  ;;  %2311 = vmatpush.bf16.msrb.mxu3 %v3618_v23 }
 0x3a1   :  { %2285 = vmatpush.bf16.msrb.mxu1 %v3610_v31 }
 0x3a3   :  { %2272 = vmatpush.bf16.msrb.mxu0 %v3606_v45  ;;  %2312 = vmatpush.bf16.msrb.mxu3 %v3602_v2  ;;  %v3823_v2 = vld [vmem:[%s6289_s2 + $0xf8] sm:$0xf0] }
 0x3a4   :  { %v3826_v3 = vor.u32 %v4116_v1, %v3823_v2  ;;  %v3735_v1 = vld [vmem:[%s6289_s2 + $0x50] sm:$0xf0]  ;;  %v3741_v2 = vld [vmem:[%s6289_s2 + $0x48] sm:$0xf] }
 0x3a5   :  { %2286 = vmatpush.bf16.msrb.mxu1 %v3594_v14  ;;  %v3821_v14 = vld [vmem:[%s6289_s2 + $0xe8] sm:$0xf] }
 0x3a6   :  { %v3822_v0 = vor.u32 %v4118_v16, %v3821_v14  ;;  %v3733_v14 = vld [vmem:[%s6289_s2 + $0x40] sm:$0xf]  ;;  %v4097_v16 = vld [vmem:[%s6289_s2 + $0x4c] sm:$0xf0] }
 0x3a7   :  { %2273 = vmatpush.bf16.msrb.mxu0 %v3590_v60  ;;  %2313 = vmatpush.bf16.msrb.mxu3 %v3586_v25  ;;  %v4117_v60 = vld [vmem:[%s6289_s2 + $0xec] sm:$0xf0] }
 0x3a8   :  { %2568 = vmatpush.bf16.msra.mxu2 %v3822_v0  ;;  %v4109_v25 = vld [vmem:[%s6289_s2 + $0xac] sm:$0xf0]  ;;  %v3734_v0 = vor.u32 %v4097_v16, %v3733_v14 }
 0x3a9   :  { %2287 = vmatpush.bf16.msrb.mxu1 %v3578_v32  ;;  %v3805_v32 = vld [vmem:[%s6289_s2 + $0xc8] sm:$0xf] }
 0x3aa   :  { %v3806_v51 = vor.u32 %v4114_v34, %v3805_v32  ;;  %v3717_v32 = vld [vmem:[%s6289_s2 + $0x20] sm:$0xf]  ;;  %v4093_v34 = vld [vmem:[%s6289_s2 + $0x2c] sm:$0xf0] }
 0x3ab   :  { %2274 = vmatpush.bf16.msrb.mxu0 %v3574_v19  ;;  %2581 = vmatpush.bf16.msra.mxu3 %v3826_v3  ;;  %v3799_v19 = vld [vmem:[%s6289_s2 + $0xd0] sm:$0xf0]  ;;  %v4098_v3 = vld [vmem:[%s6289_s2 + $0x54] sm:$0xf0] }
 0x3ac   :  { %2569 = vmatpush.bf16.msra.mxu2 %v3806_v51  ;;  %v3718_v51 = vor.u32 %v4093_v34, %v3717_v32 }
 0x3ad   :  { %2555 = vmatpush.bf16.msra.mxu1 %v3818_v63  ;;  %v4095_v63 = vld [vmem:[%s6289_s2 + $0x44] sm:$0xf] }
 0x416   :  { %v2001_v8 = vpop.f32.mrf.mxu0  ;;  %v2014_v13 = vpop.f32.mrf.mxu1 }
 0x417   :  { %v2044_v26 = vadd.f32 %v2001_v8, %v4839_v59  ;;  %v2045_v15 = vadd.f32 %v2014_v13, %v4842_v62  ;;  %v4111_v8 = vld [vmem:[%s6289_s2 + $0xc4] sm:$0xf]  ;;  %v3798_v13 = vor.u32 %v4113_v5, %v3797_v4  ;;  %v3738_v4 = vor.u32 %v4095_v63, %v3735_v1 }
 0x418   :  { %v3802_v24 = vor.u32 %v4111_v8, %v3799_v19  ;;  %v3742_v5 = vor.u32 %v4098_v3, %v3741_v2  ;;  %v4096_v8 = vld [vmem:[%s6289_s2 + $0x4c] sm:$0xf] }
 0x419   :  { %v2048_v29 = vsub.f32 0.0, %v2044_v26  ;;  %v2049_v20 = vsub.f32 0.0, %v2045_v15  ;;  %v4112_v26 = vld [vmem:[%s6289_s2 + $0xcc] sm:$0xf]  ;;  %v3807_v15 = vld [vmem:[%s6289_s2 + $0xd8] sm:$0xf0] }
 0x41a   :  { %v3810_v21 = vor.u32 %v4112_v26, %v3807_v15  ;;  %2556 = vmatpush.bf16.msra.mxu1 %v3802_v24  ;;  %v4091_v24 = vld [vmem:[%s6289_s2 + $0x24] sm:$0xf]  ;;  %v3719_v26 = vld [vmem:[%s6289_s2 + $0x30] sm:$0xf0]  ;;  %v3725_v15 = vld [vmem:[%s6289_s2 + $0x28] sm:$0xf] }
 0x41b   :  { %v2051_v39 = vmul.f32 1.442695, %v2048_v29  ;;  %v2053_v30 = vmul.f32 1.442695, %v2049_v20  ;;  %v4107_v29 = vld [vmem:[%s6289_s2 + $0xa4] sm:$0xf]  ;;  %v3782_v20 = vor.u32 %v4109_v25, %v3781_v22  ;;  %v3722_v22 = vor.u32 %v4091_v24, %v3719_v26 }
 0x41c   :  { %2582 = vmatpush.bf16.msra.mxu3 %v3810_v21  ;;  %v4094_v21 = vld [vmem:[%s6289_s2 + $0x34] sm:$0xf0] }
 0x41d   :  { %4201 = vpow2.f32 %v2051_v39  ;;  %v2027_v59 = vpop.f32.mrf.mxu2  ;;  %v2040_v62 = vpop.f32.mrf.mxu3  ;;  %v3783_v39 = vld [vmem:[%s6289_s2 + $0xb0] sm:$0xf0]  ;;  %v3726_v25 = vor.u32 %v4094_v21, %v3725_v15 }
 0x41e   :  { %4203 = vpow2.f32 %v2053_v30  ;;  %v2046_v33 = vadd.f32 %v2027_v59, %v4887_v38  ;;  %v2003_v35 = vpop.f32.mrf.mxu0  ;;  %v2016_v37 = vpop.f32.mrf.mxu1  ;;  %v2047_v10 = vadd.f32 %v2040_v62, %v4896_v48  ;;  %v3789_v30 = vld [vmem:[%s6289_s2 + $0xa8] sm:$0xf]  ;;  %v4110_v59 = vld [vmem:[%s6289_s2 + $0xb4] sm:$0xf0]  ;;  %v3786_v62 = vor.u32 %v4107_v29, %v3783_v39  ;;  %v4092_v29 = vld [vmem:[%s6289_s2 + $0x2c] sm:$0xf] }
 0x41f   :  { %v4108_v35 = vld [vmem:[%s6289_s2 + $0xac] sm:$0xf]  ;;  %v3791_v37 = vld [vmem:[%s6289_s2 + $0xb8] sm:$0xf0]  ;;  %v3701_v39 = vld [vmem:[%s6289_s2] sm:$0xf] }
 0x420   :  { %v2050_v41 = vsub.f32 0.0, %v2046_v33  ;;  %v3790_v33 = vor.u32 %v4110_v59, %v3789_v30  ;;  %2557 = vmatpush.bf16.msra.mxu1 %v3786_v62  ;;  %v4089_v59 = vld [vmem:[%s6289_s2 + $0xc] sm:$0xf0]  ;;  %v4087_v62 = vld [vmem:[%s6289_s2 + $0x4] sm:$0xf] }
 0x422   :  { %v2055_v18 = vmul.f32 1.442695, %v2050_v41  ;;  %v3794_v41 = vor.u32 %v4108_v35, %v3791_v37  ;;  %2570 = vmatpush.bf16.msra.mxu2 %v3790_v33  ;;  %v3703_v33 = vld [vmem:[%s6289_s2 + $0x10] sm:$0xf0] }
 0x423   :  { %v4202_v36 = vpop.eup %4201 }
 0x424   :  { %v4204_v56 = vpop.eup %4203  ;;  %v2057_v9 = vadd.f32 1.0, %v4202_v36  ;;  %4205 = vpow2.f32 %v2055_v18  ;;  %v4105_v18 = vld [vmem:[%s6289_s2 + $0x8c] sm:$0xf0]  ;;  %v4103_v36 = vld [vmem:[%s6289_s2 + $0x84] sm:$0xf]  ;;  %2583 = vmatpush.bf16.msra.mxu3 %v3794_v41  ;;  %v3702_v41 = vor.u32 %v4089_v59, %v3701_v39 }
 0x425   :  { %v2058_v28 = vadd.f32 1.0, %v4204_v56  ;;  %4207 = vtanh.f32 %v2047_v10  ;;  %v2029_v45 = vpop.f32.mrf.mxu2  ;;  %v2042_v46 = vpop.f32.mrf.mxu3  ;;  %v3765_v10 = vld [vmem:[%s6289_s2 + $0x80] sm:$0xf] }
 0x426   :  { %4209 = vrcp.f32 %v2057_v9  ;;  %v3766_v56 = vor.u32 %v4105_v18, %v3765_v10  ;;  %v3767_v9 = vld [vmem:[%s6289_s2 + $0x90] sm:$0xf0]  ;;  %v4106_v45 = vld [vmem:[%s6289_s2 + $0x94] sm:$0xf0]  ;;  %v3706_v10 = vor.u32 %v4087_v62, %v3703_v33  ;;  %v3709_v18 = vld [vmem:[%s6289_s2 + $0x8] sm:$0xf] }
 0x427   :  { %4211 = vrcp.f32 %v2058_v28  ;;  %v3773_v28 = vld [vmem:[%s6289_s2 + $0x88] sm:$0xf]  ;;  %v3770_v46 = vor.u32 %v4103_v36, %v3767_v9  ;;  %v4090_v36 = vld [vmem:[%s6289_s2 + $0x14] sm:$0xf0] }
 0x429   :  { %2558 = vmatpush.bf16.msra.mxu1 %v3770_v46  ;;  %v3711_v46 = vld [vmem:[%s6289_s2 + $0x18] sm:$0xf0] }
 0x42a   :  { %v4206_v50 = vpop.eup %4205 }
 0x42b   :  { %v4208_v12 = vpop.eup %4207  ;;  %v2059_v17 = vadd.f32 1.0, %v4206_v50  ;;  %v3774_v50 = vor.u32 %v4106_v45, %v3773_v28  ;;  %v3710_v45 = vor.u32 %v4090_v36, %v3709_v18 }
 0x42c   :  { %v4210_v31 = vpop.eup %4209 }
 0x42d   :  { %v4212_v38 = vpop.eup %4211  ;;  %v2065_v52 = vmul.f32 %v4210_v31, %v4208_v12  ;;  %4213 = vrcp.f32 %v2059_v17  ;;  %v4104_v12 = vld [vmem:[%s6289_s2 + $0x8c] sm:$0xf]  ;;  %v3775_v31 = vld [vmem:[%s6289_s2 + $0x98] sm:$0xf0]  ;;  %2571 = vmatpush.bf16.msra.mxu2 %v3774_v50  ;;  %v3749_v17 = vld [vmem:[%s6289_s2 + $0x60] sm:$0xf] }
 0x42e   :  { %v2064_v54 = vmul.f32 %v4212_v38, %v5865_v58  ;;  %v3813_v58 = vld [vmem:[%s6289_s2 + $0xe0] sm:$0xf]  ;;  %v3778_v38 = vor.u32 %v4104_v12, %v3775_v31 }
 0x42f   :  { %v3814_v40 = vor.u32 %v4117_v60, %v3813_v58 }
 0x430   :  { %v6068_v48 = vadd.f32 %v2065_v52, %v2064_v54  ;;  %v4101_v52 = vld [vmem:[%s6289_s2 + $0x6c] sm:$0xf0]  ;;  %v4099_v54 = vld [vmem:[%s6289_s2 + $0x64] sm:$0xf]  ;;  %2584 = vmatpush.bf16.msra.mxu3 %v3778_v38 }
 0x431   :  { %2542 = vmatpush.bf16.msra.mxu0 %v3814_v40  ;;  %v3759_v40 = vld [vmem:[%s6289_s2 + $0x78] sm:$0xf0] }
 0x432   :  { %4215 = vtanh.f32 %v6068_v48  ;;  %v3762_v42 = vor.u32 %v4100_v61, %v3759_v40 }
 0x433   :  { %v4214_v23 = vpop.eup %4213 }
 0x434   :  { %2585 = vmatpush.bf16.msra.mxu3 %v3762_v42 }
 0x435   :  { %2543 = vmatpush.bf16.msra.mxu0 %v3798_v13  ;;  %v3743_v13 = vld [vmem:[%s6289_s2 + $0x58] sm:$0xf0] }
 0x436   :  { %v3746_v19 = vor.u32 %v4096_v8, %v3743_v13 }
 0x438   :  { %v4216_v11 = vpop.eup %4215  ;;  %2586 = vmatpush.bf16.msra.mxu3 %v3746_v19 }
 0x439   :  { %v2068_v55 = vmul.f32 %v4216_v11, %v4214_v23  ;;  %2544 = vmatpush.bf16.msra.mxu0 %v3782_v20  ;;  %v3750_v23 = vor.u32 %v4101_v52, %v3749_v17  ;;  %v3751_v11 = vld [vmem:[%s6289_s2 + $0x70] sm:$0xf0]  ;;  %v3727_v20 = vld [vmem:[%s6289_s2 + $0x38] sm:$0xf0] }
 0x43a   :  { %v3754_v58 = vor.u32 %v4099_v54, %v3751_v11  ;;  %v3730_v30 = vor.u32 %v4092_v29, %v3727_v20 }
 0x43b   :  { %v2069_v57 = vpack.c.bf16 %v2068_v55, %v2068_v55  ;;  %v3757_v55 = vld [vmem:[%s6289_s2 + $0x68] sm:$0xf] }
 0x43c   :  { %2559 = vmatpush.bf16.msra.mxu1 %v3754_v58  ;;  %2587 = vmatpush.bf16.msra.mxu3 %v3730_v30 }
 0x43d   :  { %2070 = vst [vmem:[%s6293_s6 + $0x14] sm:$0xf] %v2069_v57  ;;  %2275 = vmatmul.bf16.vlgmr.msrb.gmra.mxu0 %v2069_v57  ;;  %2288 = vmatmul.bf16.vlgmr.msrb.gmra.mxu1 %v2069_v57 }
 0x43e   :  { %2301 = vmatmul.bf16.vlgmr.msrb.gmra.mxu2 %v2069_v57  ;;  %2314 = vmatmul.bf16.vlgmr.msrb.gmra.mxu3 %v2069_v57  ;;  %v4102_v57 = vld [vmem:[%s6289_s2 + $0x74] sm:$0xf0] }
 0x43f   :  { %2545 = vmatpush.bf16.msra.mxu0 %v3766_v56  ;;  %v3758_v60 = vor.u32 %v4102_v57, %v3757_v55  ;;  %v4088_v56 = vld [vmem:[%s6289_s2 + $0xc] sm:$0xf] }
 0x440   :  { %2560 = vmatpush.bf16.msra.mxu1 %v3738_v4  ;;  %v3714_v50 = vor.u32 %v4088_v56, %v3711_v46 }
 0x441   :  { %2572 = vmatpush.bf16.msra.mxu2 %v3758_v60 }
 0x442   :  { %2588 = vmatpush.bf16.msra.mxu3 %v3714_v50 }
 0x443   :  { %2546 = vmatpush.bf16.msra.mxu0 %v3750_v23 }
 0x444   :  { %2561 = vmatpush.bf16.msra.mxu1 %v3722_v22 }
 0x445   :  { %2573 = vmatpush.bf16.msra.mxu2 %v3742_v5 }
 0x447   :  { %2547 = vmatpush.bf16.msra.mxu0 %v3734_v0 }
 0x448   :  { %2562 = vmatpush.bf16.msra.mxu1 %v3706_v10 }
 0x449   :  { %2574 = vmatpush.bf16.msra.mxu2 %v3726_v25 }
 0x44b   :  { %2548 = vmatpush.bf16.msra.mxu0 %v3718_v51 }
 0x44d   :  { %2575 = vmatpush.bf16.msra.mxu2 %v3710_v45 }
 0x44f   :  { %2549 = vmatpush.bf16.msra.mxu0 %v3702_v41 }
 0x4ba   :  { %v2276_v35 = vpop.f32.mrf.mxu0  ;;  %v2289_v37 = vpop.f32.mrf.mxu1 }
 0x4bb   :  { %v2319_v9 = vadd.f32 %v2276_v35, %v4899_v49  ;;  %v2320_v28 = vadd.f32 %v2289_v37, %v4902_v53 }
 0x4bd   :  { %v2323_v12 = vsub.f32 0.0, %v2319_v9  ;;  %v2324_v31 = vsub.f32 0.0, %v2320_v28 }
 0x4bf   :  { %v2326_v38 = vmul.f32 1.442695, %v2323_v12  ;;  %v2328_v17 = vmul.f32 1.442695, %v2324_v31 }
 0x4c1   :  { %4217 = vpow2.f32 %v2326_v38  ;;  %v2302_v49 = vpop.f32.mrf.mxu2  ;;  %v2315_v53 = vpop.f32.mrf.mxu3 }
 0x4c2   :  { %4219 = vpow2.f32 %v2328_v17  ;;  %v2321_v52 = vadd.f32 %v2302_v49, %v4947_v27  ;;  %v2278_v54 = vpop.f32.mrf.mxu0  ;;  %v2291_v23 = vpop.f32.mrf.mxu1  ;;  %v2322_v55 = vadd.f32 %v2315_v53, %v4956_v43 }
 0x4c4   :  { %v2325_v11 = vsub.f32 0.0, %v2321_v52 }
 0x4c6   :  { %v2330_v57 = vmul.f32 1.442695, %v2325_v11 }
 0x4c7   :  { %v4218_v58 = vpop.eup %4217 }
 0x4c8   :  { %v4220_v60 = vpop.eup %4219  ;;  %v2332_v61 = vadd.f32 1.0, %v4218_v58  ;;  %4221 = vpow2.f32 %v2330_v57 }
 0x4c9   :  { %v2333_v40 = vadd.f32 1.0, %v4220_v60  ;;  %4223 = vtanh.f32 %v2322_v55  ;;  %v2304_v42 = vpop.f32.mrf.mxu2  ;;  %v2317_v14 = vpop.f32.mrf.mxu3 }
 0x4ca   :  { %4225 = vrcp.f32 %v2332_v61 }
 0x4cb   :  { %4227 = vrcp.f32 %v2333_v40 }
 0x4ce   :  { %v4222_v16 = vpop.eup %4221 }
 0x4cf   :  { %v4224_v63 = vpop.eup %4223  ;;  %v2334_v1 = vadd.f32 1.0, %v4222_v16 }
 0x4d0   :  { %v4226_v0 = vpop.eup %4225 }
 0x4d1   :  { %v4228_v27 = vpop.eup %4227  ;;  %v2340_v2 = vmul.f32 %v4226_v0, %v4224_v63  ;;  %4229 = vrcp.f32 %v2334_v1 }
 0x4d2   :  { %v2339_v3 = vmul.f32 %v4228_v27, %v6068_v48 }
 0x4d4   :  { %v2341_v43 = vadd.f32 %v2340_v2, %v2339_v3 }
 0x4d6   :  { %4231 = vtanh.f32 %v2341_v43 }
 0x4d7   :  { %v4230_v4 = vpop.eup %4229 }
 0x4dc   :  { %v4232_v5 = vpop.eup %4231 }
 0x4dd   :  { %v2343_v8 = vmul.f32 %v4232_v5, %v4230_v4 }
 0x4df   :  { %v2344_v13 = vpack.c.bf16 %v2343_v8, %v2343_v8 }
 0x4e1   :  { %2345 = vst [vmem:[%s6293_s6 + $0x18] sm:$0xf] %v2344_v13  ;;  %2550 = vmatmul.bf16.vlgmr.msra.gmra.mxu0 %v2344_v13  ;;  %2563 = vmatmul.bf16.vlgmr.msra.gmra.mxu1 %v2344_v13 }
 0x4e2   :  { %2576 = vmatmul.bf16.vlgmr.msra.gmra.mxu2 %v2344_v13  ;;  %2589 = vmatmul.bf16.vlgmr.msra.gmra.mxu3 %v2344_v13 }
 0x55e   :  { %v2551_v19 = vpop.f32.mrf.mxu0  ;;  %v2564_v32 = vpop.f32.mrf.mxu1 }
 0x55f   :  { %v2594_v34 = vadd.f32 %v2551_v19, %v4959_v44  ;;  %v2595_v48 = vadd.f32 %v2564_v32, %v4962_v47 }
 0x561   :  { %v2598_v24 = vsub.f32 0.0, %v2594_v34  ;;  %v2599_v51 = vsub.f32 0.0, %v2595_v48 }
 0x563   :  { %v2601_v26 = vmul.f32 1.442695, %v2598_v24  ;;  %v2603_v15 = vmul.f32 1.442695, %v2599_v51 }
 0x565   :  { %4233 = vpow2.f32 %v2601_v26  ;;  %v2577_v21 = vpop.f32.mrf.mxu2  ;;  %v2590_v22 = vpop.f32.mrf.mxu3 }
 0x566   :  { %4235 = vpow2.f32 %v2603_v15  ;;  %v2596_v25 = vadd.f32 %v2577_v21, %v5023_v6  ;;  %v2553_v29 = vpop.f32.mrf.mxu0  ;;  %v2566_v20 = vpop.f32.mrf.mxu1  ;;  %v2597_v30 = vadd.f32 %v2590_v22, %v5035_v7 }
 0x568   :  { %v2600_v39 = vsub.f32 0.0, %v2596_v25 }
 0x56a   :  { %v2605_v59 = vmul.f32 1.442695, %v2600_v39 }
 0x56b   :  { %v4234_v62 = vpop.eup %4233 }
 0x56c   :  { %v4236_v44 = vpop.eup %4235  ;;  %v2607_v33 = vadd.f32 1.0, %v4234_v62  ;;  %4237 = vpow2.f32 %v2605_v59 }
 0x56d   :  { %v2608_v47 = vadd.f32 1.0, %v4236_v44  ;;  %4239 = vtanh.f32 %v2597_v30  ;;  %v2579_v35 = vpop.f32.mrf.mxu2  ;;  %v2592_v37 = vpop.f32.mrf.mxu3 }
 0x56e   :  { %4241 = vrcp.f32 %v2607_v33 }
 0x56f   :  { %4243 = vrcp.f32 %v2608_v47 }
 0x572   :  { %v4238_v41 = vpop.eup %4237 }
 0x573   :  { %v4240_v10 = vpop.eup %4239  ;;  %v2609_v36 = vadd.f32 1.0, %v4238_v41 }
 0x574   :  { %v4242_v18 = vpop.eup %4241 }
 0x575   :  { %v4244_v6 = vpop.eup %4243  ;;  %v2615_v56 = vmul.f32 %v4242_v18, %v4240_v10  ;;  %4245 = vrcp.f32 %v2609_v36 }
 0x576   :  { %v2614_v7 = vmul.f32 %v4244_v6, %v2341_v43 }
 0x578   :  { %v2616_v9 = vadd.f32 %v2615_v56, %v2614_v7 }
 0x57a   :  { %4247 = vtanh.f32 %v2616_v9  ;;  %2622 = vst [vmem:[#allocation5] sm:$0xff] %v2616_v9 }
 0x57b   :  { %2646 = dma.vmem_to_hbm [thread:$0]  %s2642_s24, 128, %s2644_s5, [#allocation6]   ;;  %v4246_v28 = vpop.eup %4245 }
 0x580   :  { %v4248_v45 = vpop.eup %4247 }
 0x581   :  { %v2618_v46 = vmul.f32 %v4248_v45, %v4246_v28 }
 0x583   :  { %v2619_v50 = vpack.c.bf16 %v2618_v46, %v2618_v46  ;;  %2621 = vst [vmem:[#allocation3] sm:$0xff] %v2618_v46 }
 0x584   :  { %2635 = dma.vmem_to_hbm [thread:$0]  %s2631_s25, 128, %s2633_s28, [#allocation4]  }
 0x585   :  { %2620 = vst [vmem:[%s6293_s6 + $0x1c] sm:$0xf] %v2619_v50 }
 0x586   :  { %4297 = dma.done.wait [#allocation4], 128  }
 0x587   :  { %4298 = vsyncadd [#allocation4], 4294967168 }
 0x588   :  { %4299 = dma.done.wait [#allocation6], 128  }
 0x589   :  { %4300 = vsyncadd [#allocation6], 4294967168 }
 0x58a   :  { %2657 = vsyncpa [#allocation4], 1 }
 0x58b   :  { %2658 = vsyncpa [#allocation6], 1 }

</bundles_post_ra>
